<compile_context>
chip_gen: v5e
topology: v5e:2x2
jax: 0.10.0
libtpu: 0.0.40
codegen_flags: <defaults>
</compile_context>

<pallas_src>
import math
import functools

import jax
import jax.numpy as jnp
from jax import lax
from jax.experimental import pallas as pl
from jax.experimental.pallas import tpu as pltpu

_LN_EPS = 1e-5
_LANE = 128


# ----------------------------------------------------------------------------
# In-kernel helpers (pure functions on values already resident in VMEM/vregs)
# ----------------------------------------------------------------------------

def _layer_norm(x, g, b, eps):
    mean = jnp.mean(x, axis=-1, keepdims=True)
    var = jnp.mean(jnp.square(x - mean), axis=-1, keepdims=True)
    return (x - mean) * lax.rsqrt(var + eps) * g + b


def _mha(x, kv, wq, bq, wk, bk, wv, bv, wo, bo, *, n_heads, causal):
    """MultiHeadAttention(query=x, key=value=kv) with full-width projections."""
    Sq, D = x.shape
    Sk = kv.shape[0]
    dk = D // n_heads
    scale = 1.0 / math.sqrt(dk)

    q = jnp.dot(x, wq, preferred_element_type=jnp.float32) + bq       # (Sq, D)
    k = jnp.dot(kv, wk, preferred_element_type=jnp.float32) + bk      # (Sk, D)
    v = jnp.dot(kv, wv, preferred_element_type=jnp.float32) + bv      # (Sk, D)

    if causal:
        row = lax.broadcasted_iota(jnp.int32, (Sq, Sk), 0)
        col = lax.broadcasted_iota(jnp.int32, (Sq, Sk), 1)
        bias = jnp.where(row >= col, 0.0, -1e30).astype(jnp.float32)

    heads = []
    for h in range(n_heads):                           # static unroll, tiny H
        sl = slice(h * dk, (h + 1) * dk)
        s = lax.dot_general(q[:, sl], k[:, sl], (((1,), (1,)), ((), ())),
                            preferred_element_type=jnp.float32) * scale   # (Sq, Sk)
        if causal:
            s = s + bias
        m = jnp.max(s, axis=-1, keepdims=True)
        e = jnp.exp(s - m)
        p = e / jnp.sum(e, axis=-1, keepdims=True)                          # softmax
        heads.append(jnp.dot(p, v[:, sl], preferred_element_type=jnp.float32))
    a = jnp.concatenate(heads, axis=-1)                                     # (Sq, D)
    return jnp.dot(a, wo, preferred_element_type=jnp.float32) + bo


def _ffn(x, w1, b1, w2, b2):
    h = jnp.dot(x, w1, preferred_element_type=jnp.float32) + b1
    h = jnp.maximum(h, 0.0)                      # hidden (S, 4D) never leaves VMEM
    return jnp.dot(h, w2, preferred_element_type=jnp.float32) + b2


# ----------------------------------------------------------------------------
# Fused Pallas kernels: whole encoder / whole decoder, one grid step per batch
# ----------------------------------------------------------------------------

def _encoder_kernel(*refs, n_layers, n_heads, eps):
    (p_ref, w_in_ref, b_in_ref, pos_ref,
     wq, bq, wk, bk, wv, bv, wo, bo, ag, ab,
     w1, b1, w2, b2, fg, fb,
     o_ref) = refs

    # patch embedding: fc_in(patches) + pos_embedding
    x = (jnp.dot(p_ref[0], w_in_ref[...], preferred_element_type=jnp.float32)
         + b_in_ref[...] + pos_ref[0])                                      # (Lp, D)

    for l in range(n_layers):                          # static unroll over layers
        a = _mha(x, x, wq[l], bq[l], wk[l], bk[l], wv[l], bv[l], wo[l], bo[l],
                 n_heads=n_heads, causal=False)
        x = _layer_norm(x + a, ag[l], ab[l], eps)
        y = _ffn(x, w1[l], b1[l], w2[l], b2[l])
        x = _layer_norm(x + y, fg[l], fb[l], eps)
    o_ref[0] = x


def _decoder_kernel(*refs, n_layers, n_heads, eps):
    (t_ref, s_ref,
     m_wq, m_bq, m_wk, m_bk, m_wv, m_bv, m_wo, m_bo, m_g, m_b,
     c_wq, c_bq, c_wk, c_bk, c_wv, c_bv, c_wo, c_bo, c_g, c_b,
     w1, b1, w2, b2, f_g, f_b,
     wout_ref, bout_ref,
     o_ref) = refs

    x = t_ref[0]                                                             # (St, D)
    src = s_ref[0]                                                           # (Ls, D)

    for l in range(n_layers):                          # static unroll over layers
        a = _mha(x, x, m_wq[l], m_bq[l], m_wk[l], m_bk[l], m_wv[l], m_bv[l],
                 m_wo[l], m_bo[l], n_heads=n_heads, causal=True)
        x = _layer_norm(x + a, m_g[l], m_b[l], eps)
        a = _mha(x, src, c_wq[l], c_bq[l], c_wk[l], c_bk[l], c_wv[l], c_bv[l],
                 c_wo[l], c_bo[l], n_heads=n_heads, causal=False)
        x = _layer_norm(x + a, c_g[l], c_b[l], eps)
        y = _ffn(x, w1[l], b1[l], w2[l], b2[l])
        x = _layer_norm(x + y, f_g[l], f_b[l], eps)

    # final vocab projection (lane-padded to 128 so the output store is lane-dense)
    o_ref[0] = (jnp.dot(x, wout_ref[...], preferred_element_type=jnp.float32)
                + bout_ref[...])


# ----------------------------------------------------------------------------
# pallas_call wrappers
# ----------------------------------------------------------------------------

def _const_spec(a):
    nd = a.ndim
    return pl.BlockSpec(a.shape, lambda b, _n=nd: (0,) * _n)


def _batch_spec(a):
    nd = a.ndim
    return pl.BlockSpec((1,) + a.shape[1:], lambda b, _n=nd: (b,) + (0,) * (_n - 1))


def encoder_forward(params, src_img, patch_size, n_heads):
    patches = extract_patches(src_img, patch_size)                 # (B, Lp, C*p*p)
    B, Lp, _ = patches.shape
    D = params["fc_in"]["w"].shape[1]
    attn, ffn = params["attn"], params["ffn"]
    n_layers = attn["wq"].shape[0]

    args = [patches, params["fc_in"]["w"], params["fc_in"]["b"], params["pos_embedding"],
            attn["wq"], attn["bq"], attn["wk"], attn["bk"], attn["wv"], attn["bv"],
            attn["wo"], attn["bo"], attn["g"], attn["b"],
            ffn["w1"], ffn["b1"], ffn["w2"], ffn["b2"], ffn["g"], ffn["b"]]
    in_specs = [_batch_spec(patches)] + [_const_spec(a) for a in args[1:]]

    return pl.pallas_call(
        functools.partial(_encoder_kernel, n_layers=n_layers, n_heads=n_heads,
                          eps=_LN_EPS),
        out_shape=jax.ShapeDtypeStruct((B, Lp, D), jnp.float32),
        grid=(B,),
        in_specs=in_specs,
        out_specs=pl.BlockSpec((1, Lp, D), lambda b: (b, 0, 0)),
        compiler_params=pltpu.CompilerParams(dimension_semantics=("parallel",)),
    )(*args)


def decoder_forward(params, trg_tokens, src, n_heads):
    # TODO(synk): embedding lookup is a gather; kept in plain JAX glue.
    trg = jnp.take(params["embedding"], trg_tokens, axis=0)        # (B, St, D)
    B, St, D = trg.shape
    vocab_size = params["embedding"].shape[0]
    pos = positional_encoding(jnp.arange(St), D).reshape(1, St, D)
    trg = trg + pos

    ma, ca, ffn = params["masked_attn"], params["cross_attn"], params["ffn"]
    n_layers = ma["wq"].shape[0]
    w_out, b_out = params["Wo"]["w"], params["Wo"]["b"]            # lane-padded
    v_pad = w_out.shape[1]

    args = [trg, src,
            ma["wq"], ma["bq"], ma["wk"], ma["bk"], ma["wv"], ma["bv"],
            ma["wo"], ma["bo"], ma["g"], ma["b"],
            ca["wq"], ca["bq"], ca["wk"], ca["bk"], ca["wv"], ca["bv"],
            ca["wo"], ca["bo"], ca["g"], ca["b"],
            ffn["w1"], ffn["b1"], ffn["w2"], ffn["b2"], ffn["g"], ffn["b"],
            w_out, b_out]
    in_specs = [_batch_spec(trg), _batch_spec(src)] + [_const_spec(a) for a in args[2:]]

    logits_pad = pl.pallas_call(
        functools.partial(_decoder_kernel, n_layers=n_layers, n_heads=n_heads,
                          eps=_LN_EPS),
        out_shape=jax.ShapeDtypeStruct((B, St, v_pad), jnp.float32),
        grid=(B,),
        in_specs=in_specs,
        out_specs=pl.BlockSpec((1, St, v_pad), lambda b: (b, 0, 0)),
        compiler_params=pltpu.CompilerParams(dimension_semantics=("parallel",)),
    )(*args)
    return logits_pad[:, :, :vocab_size]


# ----------------------------------------------------------------------------
# Model glue (layout ops / gathers in plain JAX, compute inside fused kernels)
# ----------------------------------------------------------------------------

def extract_patches(x, patch_size):
    """Equivalent to nn.Unfold(kernel=stride=patch_size).transpose(1,2).reshape(...)."""
    B, C, H, W = x.shape
    p = patch_size
    x = x.reshape(B, C, H // p, p, W // p, p)
    x = x.transpose(0, 2, 4, 1, 3, 5)                              # (B, oh, ow, C, p, p)
    return x.reshape(B, (H // p) * (W // p), C * p * p)


def positional_encoding(positions, d_model):
    # Matches the reference PositionalEncoding: cat([sin, cos], dim=-1).
    half = d_model // 2
    scale = math.log(10000.0) / (half - 1)
    emb = jnp.exp(jnp.arange(half, dtype=jnp.float32) * -scale)
    emb = positions[:, None].astype(jnp.float32) * emb[None, :]
    return jnp.concatenate([jnp.sin(emb), jnp.cos(emb)], axis=-1)  # (L, d_model)


def captioning_transformer_forward(params, src_img, trg_tokens, patch_size, n_heads):
    src = encoder_forward(params["encoder"], src_img, patch_size, n_heads)
    return decoder_forward(params["decoder"], trg_tokens, src, n_heads)


# ----------------------------------------------------------------------------
# Deterministic parameter init (shapes follow the nn.Module __init__)
# ----------------------------------------------------------------------------

def init_linear_params(key, fan_in, fan_out):
    kw, kb = jax.random.split(key)
    bound = 1.0 / math.sqrt(fan_in)
    w = jax.random.uniform(kw, (fan_in, fan_out), jnp.float32, -bound, bound)
    b = jax.random.uniform(kb, (1, fan_out), jnp.float32, -bound, bound)
    return {"w": w, "b": b}


def init_attn_params(key, d_model):
    ks = jax.random.split(key, 4)
    q = init_linear_params(ks[0], d_model, d_model)
    k = init_linear_params(ks[1], d_model, d_model)
    v = init_linear_params(ks[2], d_model, d_model)
    o = init_linear_params(ks[3], d_model, d_model)
    return {"wq": q["w"], "bq": q["b"], "wk": k["w"], "bk": k["b"],
            "wv": v["w"], "bv": v["b"], "wo": o["w"], "bo": o["b"],
            "g": jnp.ones((1, d_model), jnp.float32),
            "b": jnp.zeros((1, d_model), jnp.float32)}


def init_ffn_params(key, d_model):
    k1, k2 = jax.random.split(key)
    l1 = init_linear_params(k1, d_model, d_model * 4)
    l2 = init_linear_params(k2, d_model * 4, d_model)
    return {"w1": l1["w"], "b1": l1["b"], "w2": l2["w"], "b2": l2["b"],
            "g": jnp.ones((1, d_model), jnp.float32),
            "b": jnp.zeros((1, d_model), jnp.float32)}


def _stack_layers(dicts):
    return {k: jnp.stack([d[k] for d in dicts], axis=0) for k in dicts[0]}


def init_params(key, image_size, in_channels, vocab_size, patch_size, d_model,
                n_layers, n_heads):
    del n_heads  # weights are stored full-width; heads are sliced in-kernel
    ke, kd = jax.random.split(key)

    # --- Encoder ---
    ke_fc, ke_pos, *ke_layers = jax.random.split(ke, 2 + n_layers)
    seq_length = (image_size // patch_size) ** 2
    enc_attn, enc_ffn = [], []
    for k in ke_layers:
        k1, k2 = jax.random.split(k)
        enc_attn.append(init_attn_params(k1, d_model))
        enc_ffn.append(init_ffn_params(k2, d_model))
    encoder = {
        "fc_in": init_linear_params(ke_fc, in_channels * patch_size * patch_size, d_model),
        "pos_embedding": 0.02 * jax.random.normal(ke_pos, (1, seq_length, d_model),
                                                  jnp.float32),
        "attn": _stack_layers(enc_attn),
        "ffn": _stack_layers(enc_ffn),
    }

    # --- Decoder ---
    kd_emb, kd_wo, *kd_layers = jax.random.split(kd, 2 + n_layers)
    dec_masked, dec_cross, dec_ffn = [], [], []
    for k in kd_layers:
        k1, k2, k3 = jax.random.split(k, 3)
        dec_masked.append(init_attn_params(k1, d_model))
        dec_cross.append(init_attn_params(k2, d_model))
        dec_ffn.append(init_ffn_params(k3, d_model))
    wo = init_linear_params(kd_wo, d_model, vocab_size)
    v_pad = ((vocab_size + _LANE - 1) // _LANE) * _LANE            # lane-dense output
    w_pad = jnp.zeros((d_model, v_pad), jnp.float32).at[:, :vocab_size].set(wo["w"])
    b_pad = jnp.zeros((1, v_pad), jnp.float32).at[:, :vocab_size].set(wo["b"])
    decoder = {
        "embedding": 0.001 * jax.random.normal(kd_emb, (vocab_size, d_model), jnp.float32),
        "masked_attn": _stack_layers(dec_masked),
        "cross_attn": _stack_layers(dec_cross),
        "ffn": _stack_layers(dec_ffn),
        "Wo": {"w": w_pad, "b": b_pad},
    }
    return {"encoder": encoder, "decoder": decoder}


# ----------------------------------------------------------------------------

if __name__ == "__main__":
    # Small config consistent with the module: image 16x16, 4 channels, patch 8,
    # d_model 32, 4 heads, 2 layers, vocab 64, batch 2, caption length 8.
    image_size, in_channels, patch_size = 16, 4, 8
    d_model, n_heads, n_layers, vocab_size = 32, 4, 2, 64
    batch_size, trg_len = 2, 8

    key = jax.random.PRNGKey(0)
    k_params, k_src, k_trg = jax.random.split(key, 3)

    params = init_params(k_params, image_size, in_channels, vocab_size,
                         patch_size, d_model, n_layers, n_heads)

    src = jax.random.normal(k_src, (batch_size, in_channels, image_size, image_size),
                            jnp.float32)                            # NCHW image
    trg = jax.random.randint(k_trg, (batch_size, trg_len), 0, vocab_size, jnp.int32)

    forward = jax.jit(functools.partial(captioning_transformer_forward,
                                        patch_size=patch_size, n_heads=n_heads))
    logits = forward(params, src, trg)
    logits = jax.block_until_ready(logits)

    assert logits.shape == (batch_size, trg_len, vocab_size)
    assert bool(jnp.all(jnp.isfinite(logits)))
    print("KERNEL_OK")
</pallas_src>

<mosaic_0001>
module attributes {stable_mosaic.version = 11 : i64} {
  func.func @_encoder_kernel(%arg0: i32, %arg1: memref<1x4x256xf32, #tpu.memory_space<vmem>>, %arg2: memref<256x32xf32, #tpu.memory_space<vmem>>, %arg3: memref<1x32xf32, #tpu.memory_space<vmem>>, %arg4: memref<1x4x32xf32, #tpu.memory_space<vmem>>, %arg5: memref<2x32x32xf32, #tpu.memory_space<vmem>>, %arg6: memref<2x1x32xf32, #tpu.memory_space<vmem>>, %arg7: memref<2x32x32xf32, #tpu.memory_space<vmem>>, %arg8: memref<2x1x32xf32, #tpu.memory_space<vmem>>, %arg9: memref<2x32x32xf32, #tpu.memory_space<vmem>>, %arg10: memref<2x1x32xf32, #tpu.memory_space<vmem>>, %arg11: memref<2x32x32xf32, #tpu.memory_space<vmem>>, %arg12: memref<2x1x32xf32, #tpu.memory_space<vmem>>, %arg13: memref<2x1x32xf32, #tpu.memory_space<vmem>>, %arg14: memref<2x1x32xf32, #tpu.memory_space<vmem>>, %arg15: memref<2x32x128xf32, #tpu.memory_space<vmem>>, %arg16: memref<2x1x128xf32, #tpu.memory_space<vmem>>, %arg17: memref<2x128x32xf32, #tpu.memory_space<vmem>>, %arg18: memref<2x1x32xf32, #tpu.memory_space<vmem>>, %arg19: memref<2x1x32xf32, #tpu.memory_space<vmem>>, %arg20: memref<2x1x32xf32, #tpu.memory_space<vmem>>, %arg21: memref<1x4x32xf32, #tpu.memory_space<vmem>>) attributes {dimension_semantics = [#tpu.dimension_semantics<parallel>], iteration_bounds = array<i64: 2>, scalar_prefetch = 0 : i64, scratch_operands = 0 : i64, tpu.core_type = #tpu.core_type<tc>, window_params = [{transform_indices = @transform_0, window_bounds = array<i64: 1, 4, 256>}, {pipeline_mode = #tpu.pipeline_mode<synchronous>, transform_indices = @transform_1, window_bounds = array<i64: 256, 32>}, {pipeline_mode = #tpu.pipeline_mode<synchronous>, transform_indices = @transform_2, window_bounds = array<i64: 1, 32>}, {pipeline_mode = #tpu.pipeline_mode<synchronous>, transform_indices = @transform_3, window_bounds = array<i64: 1, 4, 32>}, {pipeline_mode = #tpu.pipeline_mode<synchronous>, transform_indices = @transform_4, window_bounds = array<i64: 2, 32, 32>}, {pipeline_mode = #tpu.pipeline_mode<synchronous>, transform_indices = @transform_5, window_bounds = array<i64: 2, 1, 32>}, {pipeline_mode = #tpu.pipeline_mode<synchronous>, transform_indices = @transform_6, window_bounds = array<i64: 2, 32, 32>}, {pipeline_mode = #tpu.pipeline_mode<synchronous>, transform_indices = @transform_7, window_bounds = array<i64: 2, 1, 32>}, {pipeline_mode = #tpu.pipeline_mode<synchronous>, transform_indices = @transform_8, window_bounds = array<i64: 2, 32, 32>}, {pipeline_mode = #tpu.pipeline_mode<synchronous>, transform_indices = @transform_9, window_bounds = array<i64: 2, 1, 32>}, {pipeline_mode = #tpu.pipeline_mode<synchronous>, transform_indices = @transform_10, window_bounds = array<i64: 2, 32, 32>}, {pipeline_mode = #tpu.pipeline_mode<synchronous>, transform_indices = @transform_11, window_bounds = array<i64: 2, 1, 32>}, {pipeline_mode = #tpu.pipeline_mode<synchronous>, transform_indices = @transform_12, window_bounds = array<i64: 2, 1, 32>}, {pipeline_mode = #tpu.pipeline_mode<synchronous>, transform_indices = @transform_13, window_bounds = array<i64: 2, 1, 32>}, {pipeline_mode = #tpu.pipeline_mode<synchronous>, transform_indices = @transform_14, window_bounds = array<i64: 2, 32, 128>}, {pipeline_mode = #tpu.pipeline_mode<synchronous>, transform_indices = @transform_15, window_bounds = array<i64: 2, 1, 128>}, {pipeline_mode = #tpu.pipeline_mode<synchronous>, transform_indices = @transform_16, window_bounds = array<i64: 2, 128, 32>}, {pipeline_mode = #tpu.pipeline_mode<synchronous>, transform_indices = @transform_17, window_bounds = array<i64: 2, 1, 32>}, {pipeline_mode = #tpu.pipeline_mode<synchronous>, transform_indices = @transform_18, window_bounds = array<i64: 2, 1, 32>}, {pipeline_mode = #tpu.pipeline_mode<synchronous>, transform_indices = @transform_19, window_bounds = array<i64: 2, 1, 32>}, {transform_indices = @transform_20, window_bounds = array<i64: 1, 4, 32>}]} {
    %c0 = arith.constant 0 : index
    %c0_0 = arith.constant 0 : index
    %c0_1 = arith.constant 0 : index
    %0 = vector.load %arg1[%c0, %c0_0, %c0_1] : memref<1x4x256xf32, #tpu.memory_space<vmem>>, vector<1x4x256xf32>
    %1 = vector.shape_cast %0 : vector<1x4x256xf32> to vector<4x256xf32>
    %c0_2 = arith.constant 0 : index
    %c0_3 = arith.constant 0 : index
    %2 = vector.load %arg2[%c0_2, %c0_3] : memref<256x32xf32, #tpu.memory_space<vmem>>, vector<256x32xf32>
    %cst = arith.constant dense<0.000000e+00> : vector<4x32xf32>
    %3 = tpu.matmul %1, %2, %cst {dimension_numbers = #tpu.dot_dimension_numbers<[1], [0], [0], [1], [0, 0, 1, 1], [], []>} : vector<4x256xf32>, vector<256x32xf32>, vector<4x32xf32> -> vector<4x32xf32>
    %c0_4 = arith.constant 0 : index
    %c0_5 = arith.constant 0 : index
    %4 = vector.load %arg3[%c0_4, %c0_5] : memref<1x32xf32, #tpu.memory_space<vmem>>, vector<1x32xf32>
    %5 = vector.broadcast %4 : vector<1x32xf32> to vector<4x32xf32>
    %6 = arith.addf %3, %5 : vector<4x32xf32>
    %c0_6 = arith.constant 0 : index
    %c0_7 = arith.constant 0 : index
    %c0_8 = arith.constant 0 : index
    %7 = vector.load %arg4[%c0_6, %c0_7, %c0_8] : memref<1x4x32xf32, #tpu.memory_space<vmem>>, vector<1x4x32xf32>
    %8 = vector.shape_cast %7 : vector<1x4x32xf32> to vector<4x32xf32>
    %9 = arith.addf %6, %8 : vector<4x32xf32>
    %c0_9 = arith.constant 0 : index
    %c0_10 = arith.constant 0 : index
    %c0_11 = arith.constant 0 : index
    %10 = vector.load %arg5[%c0_9, %c0_10, %c0_11] : memref<2x32x32xf32, #tpu.memory_space<vmem>>, vector<1x32x32xf32>
    %11 = vector.shape_cast %10 : vector<1x32x32xf32> to vector<32x32xf32>
    %c0_12 = arith.constant 0 : index
    %c0_13 = arith.constant 0 : index
    %c0_14 = arith.constant 0 : index
    %12 = vector.load %arg6[%c0_12, %c0_13, %c0_14] : memref<2x1x32xf32, #tpu.memory_space<vmem>>, vector<1x1x32xf32>
    %13 = vector.shape_cast %12 : vector<1x1x32xf32> to vector<1x32xf32>
    %c0_15 = arith.constant 0 : index
    %c0_16 = arith.constant 0 : index
    %c0_17 = arith.constant 0 : index
    %14 = vector.load %arg7[%c0_15, %c0_16, %c0_17] : memref<2x32x32xf32, #tpu.memory_space<vmem>>, vector<1x32x32xf32>
    %15 = vector.shape_cast %14 : vector<1x32x32xf32> to vector<32x32xf32>
    %c0_18 = arith.constant 0 : index
    %c0_19 = arith.constant 0 : index
    %c0_20 = arith.constant 0 : index
    %16 = vector.load %arg8[%c0_18, %c0_19, %c0_20] : memref<2x1x32xf32, #tpu.memory_space<vmem>>, vector<1x1x32xf32>
    %17 = vector.shape_cast %16 : vector<1x1x32xf32> to vector<1x32xf32>
    %c0_21 = arith.constant 0 : index
    %c0_22 = arith.constant 0 : index
    %c0_23 = arith.constant 0 : index
    %18 = vector.load %arg9[%c0_21, %c0_22, %c0_23] : memref<2x32x32xf32, #tpu.memory_space<vmem>>, vector<1x32x32xf32>
    %19 = vector.shape_cast %18 : vector<1x32x32xf32> to vector<32x32xf32>
    %c0_24 = arith.constant 0 : index
    %c0_25 = arith.constant 0 : index
    %c0_26 = arith.constant 0 : index
    %20 = vector.load %arg10[%c0_24, %c0_25, %c0_26] : memref<2x1x32xf32, #tpu.memory_space<vmem>>, vector<1x1x32xf32>
    %21 = vector.shape_cast %20 : vector<1x1x32xf32> to vector<1x32xf32>
    %c0_27 = arith.constant 0 : index
    %c0_28 = arith.constant 0 : index
    %c0_29 = arith.constant 0 : index
    %22 = vector.load %arg11[%c0_27, %c0_28, %c0_29] : memref<2x32x32xf32, #tpu.memory_space<vmem>>, vector<1x32x32xf32>
    %23 = vector.shape_cast %22 : vector<1x32x32xf32> to vector<32x32xf32>
    %c0_30 = arith.constant 0 : index
    %c0_31 = arith.constant 0 : index
    %c0_32 = arith.constant 0 : index
    %24 = vector.load %arg12[%c0_30, %c0_31, %c0_32] : memref<2x1x32xf32, #tpu.memory_space<vmem>>, vector<1x1x32xf32>
    %25 = vector.shape_cast %24 : vector<1x1x32xf32> to vector<1x32xf32>
    %cst_33 = arith.constant dense<0.000000e+00> : vector<4x32xf32>
    %26 = tpu.matmul %9, %11, %cst_33 {dimension_numbers = #tpu.dot_dimension_numbers<[1], [0], [0], [1], [0, 0, 1, 1], [], []>} : vector<4x32xf32>, vector<32x32xf32>, vector<4x32xf32> -> vector<4x32xf32>
    %27 = vector.broadcast %13 : vector<1x32xf32> to vector<4x32xf32>
    %28 = arith.addf %26, %27 : vector<4x32xf32>
    %cst_34 = arith.constant dense<0.000000e+00> : vector<4x32xf32>
    %29 = tpu.matmul %9, %15, %cst_34 {dimension_numbers = #tpu.dot_dimension_numbers<[1], [0], [0], [1], [0, 0, 1, 1], [], []>} : vector<4x32xf32>, vector<32x32xf32>, vector<4x32xf32> -> vector<4x32xf32>
    %30 = vector.broadcast %17 : vector<1x32xf32> to vector<4x32xf32>
    %31 = arith.addf %29, %30 : vector<4x32xf32>
    %cst_35 = arith.constant dense<0.000000e+00> : vector<4x32xf32>
    %32 = tpu.matmul %9, %19, %cst_35 {dimension_numbers = #tpu.dot_dimension_numbers<[1], [0], [0], [1], [0, 0, 1, 1], [], []>} : vector<4x32xf32>, vector<32x32xf32>, vector<4x32xf32> -> vector<4x32xf32>
    %33 = vector.broadcast %21 : vector<1x32xf32> to vector<4x32xf32>
    %34 = arith.addf %32, %33 : vector<4x32xf32>
    %35 = vector.extract_strided_slice %28 {offsets = [0, 0], sizes = [4, 8], strides = [1, 1]} : vector<4x32xf32> to vector<4x8xf32>
    %36 = vector.extract_strided_slice %31 {offsets = [0, 0], sizes = [4, 8], strides = [1, 1]} : vector<4x32xf32> to vector<4x8xf32>
    %cst_36 = arith.constant dense<0.000000e+00> : vector<4x4xf32>
    %37 = tpu.matmul %35, %36, %cst_36 {dimension_numbers = #tpu.dot_dimension_numbers<[1], [1], [0], [0], [0, 0, 1, 0], [], []>} : vector<4x8xf32>, vector<4x8xf32>, vector<4x4xf32> -> vector<4x4xf32>
    %cst_37 = arith.constant 0.353553385 : f32
    %38 = vector.broadcast %cst_37 : f32 to vector<4x4xf32>
    %39 = arith.mulf %37, %38 : vector<4x4xf32>
    %cst_38 = arith.constant dense<0xFF800000> : vector<4xf32>
    %40 = vector.multi_reduction <maximumf>, %39, %cst_38 [1] : vector<4x4xf32> to vector<4xf32>
    %41 = vector.shape_cast %40 : vector<4xf32> to vector<4x1xf32>
    %42 = vector.broadcast %41 : vector<4x1xf32> to vector<4x4xf32>
    %43 = arith.subf %39, %42 : vector<4x4xf32>
    %44 = math.exp %43 : vector<4x4xf32>
    %cst_39 = arith.constant dense<0.000000e+00> : vector<4xf32>
    %45 = vector.multi_reduction <add>, %44, %cst_39 [1] : vector<4x4xf32> to vector<4xf32>
    %46 = vector.shape_cast %45 : vector<4xf32> to vector<4x1xf32>
    %47 = vector.broadcast %46 : vector<4x1xf32> to vector<4x4xf32>
    %48 = arith.divf %44, %47 : vector<4x4xf32>
    %49 = vector.extract_strided_slice %34 {offsets = [0, 0], sizes = [4, 8], strides = [1, 1]} : vector<4x32xf32> to vector<4x8xf32>
    %cst_40 = arith.constant dense<0.000000e+00> : vector<4x8xf32>
    %50 = tpu.matmul %48, %49, %cst_40 {dimension_numbers = #tpu.dot_dimension_numbers<[1], [0], [0], [1], [0, 0, 1, 1], [], []>} : vector<4x4xf32>, vector<4x8xf32>, vector<4x8xf32> -> vector<4x8xf32>
    %51 = vector.extract_strided_slice %28 {offsets = [0, 8], sizes = [4, 8], strides = [1, 1]} : vector<4x32xf32> to vector<4x8xf32>
    %52 = vector.extract_strided_slice %31 {offsets = [0, 8], sizes = [4, 8], strides = [1, 1]} : vector<4x32xf32> to vector<4x8xf32>
    %cst_41 = arith.constant dense<0.000000e+00> : vector<4x4xf32>
    %53 = tpu.matmul %51, %52, %cst_41 {dimension_numbers = #tpu.dot_dimension_numbers<[1], [1], [0], [0], [0, 0, 1, 0], [], []>} : vector<4x8xf32>, vector<4x8xf32>, vector<4x4xf32> -> vector<4x4xf32>
    %cst_42 = arith.constant 0.353553385 : f32
    %54 = vector.broadcast %cst_42 : f32 to vector<4x4xf32>
    %55 = arith.mulf %53, %54 : vector<4x4xf32>
    %cst_43 = arith.constant dense<0xFF800000> : vector<4xf32>
    %56 = vector.multi_reduction <maximumf>, %55, %cst_43 [1] : vector<4x4xf32> to vector<4xf32>
    %57 = vector.shape_cast %56 : vector<4xf32> to vector<4x1xf32>
    %58 = vector.broadcast %57 : vector<4x1xf32> to vector<4x4xf32>
    %59 = arith.subf %55, %58 : vector<4x4xf32>
    %60 = math.exp %59 : vector<4x4xf32>
    %cst_44 = arith.constant dense<0.000000e+00> : vector<4xf32>
    %61 = vector.multi_reduction <add>, %60, %cst_44 [1] : vector<4x4xf32> to vector<4xf32>
    %62 = vector.shape_cast %61 : vector<4xf32> to vector<4x1xf32>
    %63 = vector.broadcast %62 : vector<4x1xf32> to vector<4x4xf32>
    %64 = arith.divf %60, %63 : vector<4x4xf32>
    %65 = vector.extract_strided_slice %34 {offsets = [0, 8], sizes = [4, 8], strides = [1, 1]} : vector<4x32xf32> to vector<4x8xf32>
    %cst_45 = arith.constant dense<0.000000e+00> : vector<4x8xf32>
    %66 = tpu.matmul %64, %65, %cst_45 {dimension_numbers = #tpu.dot_dimension_numbers<[1], [0], [0], [1], [0, 0, 1, 1], [], []>} : vector<4x4xf32>, vector<4x8xf32>, vector<4x8xf32> -> vector<4x8xf32>
    %67 = vector.extract_strided_slice %28 {offsets = [0, 16], sizes = [4, 8], strides = [1, 1]} : vector<4x32xf32> to vector<4x8xf32>
    %68 = vector.extract_strided_slice %31 {offsets = [0, 16], sizes = [4, 8], strides = [1, 1]} : vector<4x32xf32> to vector<4x8xf32>
    %cst_46 = arith.constant dense<0.000000e+00> : vector<4x4xf32>
    %69 = tpu.matmul %67, %68, %cst_46 {dimension_numbers = #tpu.dot_dimension_numbers<[1], [1], [0], [0], [0, 0, 1, 0], [], []>} : vector<4x8xf32>, vector<4x8xf32>, vector<4x4xf32> -> vector<4x4xf32>
    %cst_47 = arith.constant 0.353553385 : f32
    %70 = vector.broadcast %cst_47 : f32 to vector<4x4xf32>
    %71 = arith.mulf %69, %70 : vector<4x4xf32>
    %cst_48 = arith.constant dense<0xFF800000> : vector<4xf32>
    %72 = vector.multi_reduction <maximumf>, %71, %cst_48 [1] : vector<4x4xf32> to vector<4xf32>
    %73 = vector.shape_cast %72 : vector<4xf32> to vector<4x1xf32>
    %74 = vector.broadcast %73 : vector<4x1xf32> to vector<4x4xf32>
    %75 = arith.subf %71, %74 : vector<4x4xf32>
    %76 = math.exp %75 : vector<4x4xf32>
    %cst_49 = arith.constant dense<0.000000e+00> : vector<4xf32>
    %77 = vector.multi_reduction <add>, %76, %cst_49 [1] : vector<4x4xf32> to vector<4xf32>
    %78 = vector.shape_cast %77 : vector<4xf32> to vector<4x1xf32>
    %79 = vector.broadcast %78 : vector<4x1xf32> to vector<4x4xf32>
    %80 = arith.divf %76, %79 : vector<4x4xf32>
    %81 = vector.extract_strided_slice %34 {offsets = [0, 16], sizes = [4, 8], strides = [1, 1]} : vector<4x32xf32> to vector<4x8xf32>
    %cst_50 = arith.constant dense<0.000000e+00> : vector<4x8xf32>
    %82 = tpu.matmul %80, %81, %cst_50 {dimension_numbers = #tpu.dot_dimension_numbers<[1], [0], [0], [1], [0, 0, 1, 1], [], []>} : vector<4x4xf32>, vector<4x8xf32>, vector<4x8xf32> -> vector<4x8xf32>
    %83 = vector.extract_strided_slice %28 {offsets = [0, 24], sizes = [4, 8], strides = [1, 1]} : vector<4x32xf32> to vector<4x8xf32>
    %84 = vector.extract_strided_slice %31 {offsets = [0, 24], sizes = [4, 8], strides = [1, 1]} : vector<4x32xf32> to vector<4x8xf32>
    %cst_51 = arith.constant dense<0.000000e+00> : vector<4x4xf32>
    %85 = tpu.matmul %83, %84, %cst_51 {dimension_numbers = #tpu.dot_dimension_numbers<[1], [1], [0], [0], [0, 0, 1, 0], [], []>} : vector<4x8xf32>, vector<4x8xf32>, vector<4x4xf32> -> vector<4x4xf32>
    %cst_52 = arith.constant 0.353553385 : f32
    %86 = vector.broadcast %cst_52 : f32 to vector<4x4xf32>
    %87 = arith.mulf %85, %86 : vector<4x4xf32>
    %cst_53 = arith.constant dense<0xFF800000> : vector<4xf32>
    %88 = vector.multi_reduction <maximumf>, %87, %cst_53 [1] : vector<4x4xf32> to vector<4xf32>
    %89 = vector.shape_cast %88 : vector<4xf32> to vector<4x1xf32>
    %90 = vector.broadcast %89 : vector<4x1xf32> to vector<4x4xf32>
    %91 = arith.subf %87, %90 : vector<4x4xf32>
    %92 = math.exp %91 : vector<4x4xf32>
    %cst_54 = arith.constant dense<0.000000e+00> : vector<4xf32>
    %93 = vector.multi_reduction <add>, %92, %cst_54 [1] : vector<4x4xf32> to vector<4xf32>
    %94 = vector.shape_cast %93 : vector<4xf32> to vector<4x1xf32>
    %95 = vector.broadcast %94 : vector<4x1xf32> to vector<4x4xf32>
    %96 = arith.divf %92, %95 : vector<4x4xf32>
    %97 = vector.extract_strided_slice %34 {offsets = [0, 24], sizes = [4, 8], strides = [1, 1]} : vector<4x32xf32> to vector<4x8xf32>
    %cst_55 = arith.constant dense<0.000000e+00> : vector<4x8xf32>
    %98 = tpu.matmul %96, %97, %cst_55 {dimension_numbers = #tpu.dot_dimension_numbers<[1], [0], [0], [1], [0, 0, 1, 1], [], []>} : vector<4x4xf32>, vector<4x8xf32>, vector<4x8xf32> -> vector<4x8xf32>
    %99 = tpu.concatenate %50, %66, %82, %98 in 1 : vector<4x8xf32>, vector<4x8xf32>, vector<4x8xf32>, vector<4x8xf32> -> vector<4x32xf32>
    %cst_56 = arith.constant dense<0.000000e+00> : vector<4x32xf32>
    %100 = tpu.matmul %99, %23, %cst_56 {dimension_numbers = #tpu.dot_dimension_numbers<[1], [0], [0], [1], [0, 0, 1, 1], [], []>} : vector<4x32xf32>, vector<32x32xf32>, vector<4x32xf32> -> vector<4x32xf32>
    %101 = vector.broadcast %25 : vector<1x32xf32> to vector<4x32xf32>
    %102 = arith.addf %100, %101 : vector<4x32xf32>
    %103 = arith.addf %9, %102 : vector<4x32xf32>
    %c0_57 = arith.constant 0 : index
    %c0_58 = arith.constant 0 : index
    %c0_59 = arith.constant 0 : index
    %104 = vector.load %arg13[%c0_57, %c0_58, %c0_59] : memref<2x1x32xf32, #tpu.memory_space<vmem>>, vector<1x1x32xf32>
    %105 = vector.shape_cast %104 : vector<1x1x32xf32> to vector<1x32xf32>
    %c0_60 = arith.constant 0 : index
    %c0_61 = arith.constant 0 : index
    %c0_62 = arith.constant 0 : index
    %106 = vector.load %arg14[%c0_60, %c0_61, %c0_62] : memref<2x1x32xf32, #tpu.memory_space<vmem>>, vector<1x1x32xf32>
    %107 = vector.shape_cast %106 : vector<1x1x32xf32> to vector<1x32xf32>
    %cst_63 = arith.constant dense<0.000000e+00> : vector<4xf32>
    %108 = vector.multi_reduction <add>, %103, %cst_63 [1] : vector<4x32xf32> to vector<4xf32>
    %109 = vector.shape_cast %108 : vector<4xf32> to vector<4x1xf32>
    %cst_64 = arith.constant 3.200000e+01 : f32
    %110 = vector.broadcast %cst_64 : f32 to vector<4x1xf32>
    %111 = arith.divf %109, %110 : vector<4x1xf32>
    %112 = vector.broadcast %111 : vector<4x1xf32> to vector<4x32xf32>
    %113 = arith.subf %103, %112 : vector<4x32xf32>
    %114 = arith.mulf %113, %113 : vector<4x32xf32>
    %cst_65 = arith.constant dense<0.000000e+00> : vector<4xf32>
    %115 = vector.multi_reduction <add>, %114, %cst_65 [1] : vector<4x32xf32> to vector<4xf32>
    %116 = vector.shape_cast %115 : vector<4xf32> to vector<4x1xf32>
    %cst_66 = arith.constant 3.200000e+01 : f32
    %117 = vector.broadcast %cst_66 : f32 to vector<4x1xf32>
    %118 = arith.divf %116, %117 : vector<4x1xf32>
    %119 = vector.broadcast %111 : vector<4x1xf32> to vector<4x32xf32>
    %120 = arith.subf %103, %119 : vector<4x32xf32>
    %cst_67 = arith.constant 9.99999974E-6 : f32
    %121 = vector.broadcast %cst_67 : f32 to vector<4x1xf32>
    %122 = arith.addf %118, %121 : vector<4x1xf32>
    %123 = math.rsqrt %122 : vector<4x1xf32>
    %124 = vector.broadcast %123 : vector<4x1xf32> to vector<4x32xf32>
    %125 = arith.mulf %120, %124 : vector<4x32xf32>
    %126 = vector.broadcast %105 : vector<1x32xf32> to vector<4x32xf32>
    %127 = arith.mulf %125, %126 : vector<4x32xf32>
    %128 = vector.broadcast %107 : vector<1x32xf32> to vector<4x32xf32>
    %129 = arith.addf %127, %128 : vector<4x32xf32>
    %c0_68 = arith.constant 0 : index
    %c0_69 = arith.constant 0 : index
    %c0_70 = arith.constant 0 : index
    %130 = vector.load %arg15[%c0_68, %c0_69, %c0_70] : memref<2x32x128xf32, #tpu.memory_space<vmem>>, vector<1x32x128xf32>
    %131 = vector.shape_cast %130 : vector<1x32x128xf32> to vector<32x128xf32>
    %c0_71 = arith.constant 0 : index
    %c0_72 = arith.constant 0 : index
    %c0_73 = arith.constant 0 : index
    %132 = vector.load %arg16[%c0_71, %c0_72, %c0_73] : memref<2x1x128xf32, #tpu.memory_space<vmem>>, vector<1x1x128xf32>
    %133 = vector.shape_cast %132 : vector<1x1x128xf32> to vector<1x128xf32>
    %c0_74 = arith.constant 0 : index
    %c0_75 = arith.constant 0 : index
    %c0_76 = arith.constant 0 : index
    %134 = vector.load %arg17[%c0_74, %c0_75, %c0_76] : memref<2x128x32xf32, #tpu.memory_space<vmem>>, vector<1x128x32xf32>
    %135 = vector.shape_cast %134 : vector<1x128x32xf32> to vector<128x32xf32>
    %c0_77 = arith.constant 0 : index
    %c0_78 = arith.constant 0 : index
    %c0_79 = arith.constant 0 : index
    %136 = vector.load %arg18[%c0_77, %c0_78, %c0_79] : memref<2x1x32xf32, #tpu.memory_space<vmem>>, vector<1x1x32xf32>
    %137 = vector.shape_cast %136 : vector<1x1x32xf32> to vector<1x32xf32>
    %cst_80 = arith.constant dense<0.000000e+00> : vector<4x128xf32>
    %138 = tpu.matmul %129, %131, %cst_80 {dimension_numbers = #tpu.dot_dimension_numbers<[1], [0], [0], [1], [0, 0, 1, 1], [], []>} : vector<4x32xf32>, vector<32x128xf32>, vector<4x128xf32> -> vector<4x128xf32>
    %139 = vector.broadcast %133 : vector<1x128xf32> to vector<4x128xf32>
    %140 = arith.addf %138, %139 : vector<4x128xf32>
    %cst_81 = arith.constant 0.000000e+00 : f32
    %141 = vector.broadcast %cst_81 : f32 to vector<4x128xf32>
    %142 = arith.maximumf %140, %141 : vector<4x128xf32>
    %cst_82 = arith.constant dense<0.000000e+00> : vector<4x32xf32>
    %143 = tpu.matmul %142, %135, %cst_82 {dimension_numbers = #tpu.dot_dimension_numbers<[1], [0], [0], [1], [0, 0, 1, 1], [], []>} : vector<4x128xf32>, vector<128x32xf32>, vector<4x32xf32> -> vector<4x32xf32>
    %144 = vector.broadcast %137 : vector<1x32xf32> to vector<4x32xf32>
    %145 = arith.addf %143, %144 : vector<4x32xf32>
    %146 = arith.addf %129, %145 : vector<4x32xf32>
    %c0_83 = arith.constant 0 : index
    %c0_84 = arith.constant 0 : index
    %c0_85 = arith.constant 0 : index
    %147 = vector.load %arg19[%c0_83, %c0_84, %c0_85] : memref<2x1x32xf32, #tpu.memory_space<vmem>>, vector<1x1x32xf32>
    %148 = vector.shape_cast %147 : vector<1x1x32xf32> to vector<1x32xf32>
    %c0_86 = arith.constant 0 : index
    %c0_87 = arith.constant 0 : index
    %c0_88 = arith.constant 0 : index
    %149 = vector.load %arg20[%c0_86, %c0_87, %c0_88] : memref<2x1x32xf32, #tpu.memory_space<vmem>>, vector<1x1x32xf32>
    %150 = vector.shape_cast %149 : vector<1x1x32xf32> to vector<1x32xf32>
    %cst_89 = arith.constant dense<0.000000e+00> : vector<4xf32>
    %151 = vector.multi_reduction <add>, %146, %cst_89 [1] : vector<4x32xf32> to vector<4xf32>
    %152 = vector.shape_cast %151 : vector<4xf32> to vector<4x1xf32>
    %cst_90 = arith.constant 3.200000e+01 : f32
    %153 = vector.broadcast %cst_90 : f32 to vector<4x1xf32>
    %154 = arith.divf %152, %153 : vector<4x1xf32>
    %155 = vector.broadcast %154 : vector<4x1xf32> to vector<4x32xf32>
    %156 = arith.subf %146, %155 : vector<4x32xf32>
    %157 = arith.mulf %156, %156 : vector<4x32xf32>
    %cst_91 = arith.constant dense<0.000000e+00> : vector<4xf32>
    %158 = vector.multi_reduction <add>, %157, %cst_91 [1] : vector<4x32xf32> to vector<4xf32>
    %159 = vector.shape_cast %158 : vector<4xf32> to vector<4x1xf32>
    %cst_92 = arith.constant 3.200000e+01 : f32
    %160 = vector.broadcast %cst_92 : f32 to vector<4x1xf32>
    %161 = arith.divf %159, %160 : vector<4x1xf32>
    %162 = vector.broadcast %154 : vector<4x1xf32> to vector<4x32xf32>
    %163 = arith.subf %146, %162 : vector<4x32xf32>
    %cst_93 = arith.constant 9.99999974E-6 : f32
    %164 = vector.broadcast %cst_93 : f32 to vector<4x1xf32>
    %165 = arith.addf %161, %164 : vector<4x1xf32>
    %166 = math.rsqrt %165 : vector<4x1xf32>
    %167 = vector.broadcast %166 : vector<4x1xf32> to vector<4x32xf32>
    %168 = arith.mulf %163, %167 : vector<4x32xf32>
    %169 = vector.broadcast %148 : vector<1x32xf32> to vector<4x32xf32>
    %170 = arith.mulf %168, %169 : vector<4x32xf32>
    %171 = vector.broadcast %150 : vector<1x32xf32> to vector<4x32xf32>
    %172 = arith.addf %170, %171 : vector<4x32xf32>
    %c1 = arith.constant 1 : index
    %c0_94 = arith.constant 0 : index
    %c0_95 = arith.constant 0 : index
    %173 = vector.load %arg5[%c1, %c0_94, %c0_95] : memref<2x32x32xf32, #tpu.memory_space<vmem>>, vector<1x32x32xf32>
    %174 = vector.shape_cast %173 : vector<1x32x32xf32> to vector<32x32xf32>
    %c1_96 = arith.constant 1 : index
    %c0_97 = arith.constant 0 : index
    %c0_98 = arith.constant 0 : index
    %175 = vector.load %arg6[%c1_96, %c0_97, %c0_98] : memref<2x1x32xf32, #tpu.memory_space<vmem>>, vector<1x1x32xf32>
    %176 = vector.shape_cast %175 : vector<1x1x32xf32> to vector<1x32xf32>
    %c1_99 = arith.constant 1 : index
    %c0_100 = arith.constant 0 : index
    %c0_101 = arith.constant 0 : index
    %177 = vector.load %arg7[%c1_99, %c0_100, %c0_101] : memref<2x32x32xf32, #tpu.memory_space<vmem>>, vector<1x32x32xf32>
    %178 = vector.shape_cast %177 : vector<1x32x32xf32> to vector<32x32xf32>
    %c1_102 = arith.constant 1 : index
    %c0_103 = arith.constant 0 : index
    %c0_104 = arith.constant 0 : index
    %179 = vector.load %arg8[%c1_102, %c0_103, %c0_104] : memref<2x1x32xf32, #tpu.memory_space<vmem>>, vector<1x1x32xf32>
    %180 = vector.shape_cast %179 : vector<1x1x32xf32> to vector<1x32xf32>
    %c1_105 = arith.constant 1 : index
    %c0_106 = arith.constant 0 : index
    %c0_107 = arith.constant 0 : index
    %181 = vector.load %arg9[%c1_105, %c0_106, %c0_107] : memref<2x32x32xf32, #tpu.memory_space<vmem>>, vector<1x32x32xf32>
    %182 = vector.shape_cast %181 : vector<1x32x32xf32> to vector<32x32xf32>
    %c1_108 = arith.constant 1 : index
    %c0_109 = arith.constant 0 : index
    %c0_110 = arith.constant 0 : index
    %183 = vector.load %arg10[%c1_108, %c0_109, %c0_110] : memref<2x1x32xf32, #tpu.memory_space<vmem>>, vector<1x1x32xf32>
    %184 = vector.shape_cast %183 : vector<1x1x32xf32> to vector<1x32xf32>
    %c1_111 = arith.constant 1 : index
    %c0_112 = arith.constant 0 : index
    %c0_113 = arith.constant 0 : index
    %185 = vector.load %arg11[%c1_111, %c0_112, %c0_113] : memref<2x32x32xf32, #tpu.memory_space<vmem>>, vector<1x32x32xf32>
    %186 = vector.shape_cast %185 : vector<1x32x32xf32> to vector<32x32xf32>
    %c1_114 = arith.constant 1 : index
    %c0_115 = arith.constant 0 : index
    %c0_116 = arith.constant 0 : index
    %187 = vector.load %arg12[%c1_114, %c0_115, %c0_116] : memref<2x1x32xf32, #tpu.memory_space<vmem>>, vector<1x1x32xf32>
    %188 = vector.shape_cast %187 : vector<1x1x32xf32> to vector<1x32xf32>
    %cst_117 = arith.constant dense<0.000000e+00> : vector<4x32xf32>
    %189 = tpu.matmul %172, %174, %cst_117 {dimension_numbers = #tpu.dot_dimension_numbers<[1], [0], [0], [1], [0, 0, 1, 1], [], []>} : vector<4x32xf32>, vector<32x32xf32>, vector<4x32xf32> -> vector<4x32xf32>
    %190 = vector.broadcast %176 : vector<1x32xf32> to vector<4x32xf32>
    %191 = arith.addf %189, %190 : vector<4x32xf32>
    %cst_118 = arith.constant dense<0.000000e+00> : vector<4x32xf32>
    %192 = tpu.matmul %172, %178, %cst_118 {dimension_numbers = #tpu.dot_dimension_numbers<[1], [0], [0], [1], [0, 0, 1, 1], [], []>} : vector<4x32xf32>, vector<32x32xf32>, vector<4x32xf32> -> vector<4x32xf32>
    %193 = vector.broadcast %180 : vector<1x32xf32> to vector<4x32xf32>
    %194 = arith.addf %192, %193 : vector<4x32xf32>
    %cst_119 = arith.constant dense<0.000000e+00> : vector<4x32xf32>
    %195 = tpu.matmul %172, %182, %cst_119 {dimension_numbers = #tpu.dot_dimension_numbers<[1], [0], [0], [1], [0, 0, 1, 1], [], []>} : vector<4x32xf32>, vector<32x32xf32>, vector<4x32xf32> -> vector<4x32xf32>
    %196 = vector.broadcast %184 : vector<1x32xf32> to vector<4x32xf32>
    %197 = arith.addf %195, %196 : vector<4x32xf32>
    %198 = vector.extract_strided_slice %191 {offsets = [0, 0], sizes = [4, 8], strides = [1, 1]} : vector<4x32xf32> to vector<4x8xf32>
    %199 = vector.extract_strided_slice %194 {offsets = [0, 0], sizes = [4, 8], strides = [1, 1]} : vector<4x32xf32> to vector<4x8xf32>
    %cst_120 = arith.constant dense<0.000000e+00> : vector<4x4xf32>
    %200 = tpu.matmul %198, %199, %cst_120 {dimension_numbers = #tpu.dot_dimension_numbers<[1], [1], [0], [0], [0, 0, 1, 0], [], []>} : vector<4x8xf32>, vector<4x8xf32>, vector<4x4xf32> -> vector<4x4xf32>
    %cst_121 = arith.constant 0.353553385 : f32
    %201 = vector.broadcast %cst_121 : f32 to vector<4x4xf32>
    %202 = arith.mulf %200, %201 : vector<4x4xf32>
    %cst_122 = arith.constant dense<0xFF800000> : vector<4xf32>
    %203 = vector.multi_reduction <maximumf>, %202, %cst_122 [1] : vector<4x4xf32> to vector<4xf32>
    %204 = vector.shape_cast %203 : vector<4xf32> to vector<4x1xf32>
    %205 = vector.broadcast %204 : vector<4x1xf32> to vector<4x4xf32>
    %206 = arith.subf %202, %205 : vector<4x4xf32>
    %207 = math.exp %206 : vector<4x4xf32>
    %cst_123 = arith.constant dense<0.000000e+00> : vector<4xf32>
    %208 = vector.multi_reduction <add>, %207, %cst_123 [1] : vector<4x4xf32> to vector<4xf32>
    %209 = vector.shape_cast %208 : vector<4xf32> to vector<4x1xf32>
    %210 = vector.broadcast %209 : vector<4x1xf32> to vector<4x4xf32>
    %211 = arith.divf %207, %210 : vector<4x4xf32>
    %212 = vector.extract_strided_slice %197 {offsets = [0, 0], sizes = [4, 8], strides = [1, 1]} : vector<4x32xf32> to vector<4x8xf32>
    %cst_124 = arith.constant dense<0.000000e+00> : vector<4x8xf32>
    %213 = tpu.matmul %211, %212, %cst_124 {dimension_numbers = #tpu.dot_dimension_numbers<[1], [0], [0], [1], [0, 0, 1, 1], [], []>} : vector<4x4xf32>, vector<4x8xf32>, vector<4x8xf32> -> vector<4x8xf32>
    %214 = vector.extract_strided_slice %191 {offsets = [0, 8], sizes = [4, 8], strides = [1, 1]} : vector<4x32xf32> to vector<4x8xf32>
    %215 = vector.extract_strided_slice %194 {offsets = [0, 8], sizes = [4, 8], strides = [1, 1]} : vector<4x32xf32> to vector<4x8xf32>
    %cst_125 = arith.constant dense<0.000000e+00> : vector<4x4xf32>
    %216 = tpu.matmul %214, %215, %cst_125 {dimension_numbers = #tpu.dot_dimension_numbers<[1], [1], [0], [0], [0, 0, 1, 0], [], []>} : vector<4x8xf32>, vector<4x8xf32>, vector<4x4xf32> -> vector<4x4xf32>
    %cst_126 = arith.constant 0.353553385 : f32
    %217 = vector.broadcast %cst_126 : f32 to vector<4x4xf32>
    %218 = arith.mulf %216, %217 : vector<4x4xf32>
    %cst_127 = arith.constant dense<0xFF800000> : vector<4xf32>
    %219 = vector.multi_reduction <maximumf>, %218, %cst_127 [1] : vector<4x4xf32> to vector<4xf32>
    %220 = vector.shape_cast %219 : vector<4xf32> to vector<4x1xf32>
    %221 = vector.broadcast %220 : vector<4x1xf32> to vector<4x4xf32>
    %222 = arith.subf %218, %221 : vector<4x4xf32>
    %223 = math.exp %222 : vector<4x4xf32>
    %cst_128 = arith.constant dense<0.000000e+00> : vector<4xf32>
    %224 = vector.multi_reduction <add>, %223, %cst_128 [1] : vector<4x4xf32> to vector<4xf32>
    %225 = vector.shape_cast %224 : vector<4xf32> to vector<4x1xf32>
    %226 = vector.broadcast %225 : vector<4x1xf32> to vector<4x4xf32>
    %227 = arith.divf %223, %226 : vector<4x4xf32>
    %228 = vector.extract_strided_slice %197 {offsets = [0, 8], sizes = [4, 8], strides = [1, 1]} : vector<4x32xf32> to vector<4x8xf32>
    %cst_129 = arith.constant dense<0.000000e+00> : vector<4x8xf32>
    %229 = tpu.matmul %227, %228, %cst_129 {dimension_numbers = #tpu.dot_dimension_numbers<[1], [0], [0], [1], [0, 0, 1, 1], [], []>} : vector<4x4xf32>, vector<4x8xf32>, vector<4x8xf32> -> vector<4x8xf32>
    %230 = vector.extract_strided_slice %191 {offsets = [0, 16], sizes = [4, 8], strides = [1, 1]} : vector<4x32xf32> to vector<4x8xf32>
    %231 = vector.extract_strided_slice %194 {offsets = [0, 16], sizes = [4, 8], strides = [1, 1]} : vector<4x32xf32> to vector<4x8xf32>
    %cst_130 = arith.constant dense<0.000000e+00> : vector<4x4xf32>
    %232 = tpu.matmul %230, %231, %cst_130 {dimension_numbers = #tpu.dot_dimension_numbers<[1], [1], [0], [0], [0, 0, 1, 0], [], []>} : vector<4x8xf32>, vector<4x8xf32>, vector<4x4xf32> -> vector<4x4xf32>
    %cst_131 = arith.constant 0.353553385 : f32
    %233 = vector.broadcast %cst_131 : f32 to vector<4x4xf32>
    %234 = arith.mulf %232, %233 : vector<4x4xf32>
    %cst_132 = arith.constant dense<0xFF800000> : vector<4xf32>
    %235 = vector.multi_reduction <maximumf>, %234, %cst_132 [1] : vector<4x4xf32> to vector<4xf32>
    %236 = vector.shape_cast %235 : vector<4xf32> to vector<4x1xf32>
    %237 = vector.broadcast %236 : vector<4x1xf32> to vector<4x4xf32>
    %238 = arith.subf %234, %237 : vector<4x4xf32>
    %239 = math.exp %238 : vector<4x4xf32>
    %cst_133 = arith.constant dense<0.000000e+00> : vector<4xf32>
    %240 = vector.multi_reduction <add>, %239, %cst_133 [1] : vector<4x4xf32> to vector<4xf32>
    %241 = vector.shape_cast %240 : vector<4xf32> to vector<4x1xf32>
    %242 = vector.broadcast %241 : vector<4x1xf32> to vector<4x4xf32>
    %243 = arith.divf %239, %242 : vector<4x4xf32>
    %244 = vector.extract_strided_slice %197 {offsets = [0, 16], sizes = [4, 8], strides = [1, 1]} : vector<4x32xf32> to vector<4x8xf32>
    %cst_134 = arith.constant dense<0.000000e+00> : vector<4x8xf32>
    %245 = tpu.matmul %243, %244, %cst_134 {dimension_numbers = #tpu.dot_dimension_numbers<[1], [0], [0], [1], [0, 0, 1, 1], [], []>} : vector<4x4xf32>, vector<4x8xf32>, vector<4x8xf32> -> vector<4x8xf32>
    %246 = vector.extract_strided_slice %191 {offsets = [0, 24], sizes = [4, 8], strides = [1, 1]} : vector<4x32xf32> to vector<4x8xf32>
    %247 = vector.extract_strided_slice %194 {offsets = [0, 24], sizes = [4, 8], strides = [1, 1]} : vector<4x32xf32> to vector<4x8xf32>
    %cst_135 = arith.constant dense<0.000000e+00> : vector<4x4xf32>
    %248 = tpu.matmul %246, %247, %cst_135 {dimension_numbers = #tpu.dot_dimension_numbers<[1], [1], [0], [0], [0, 0, 1, 0], [], []>} : vector<4x8xf32>, vector<4x8xf32>, vector<4x4xf32> -> vector<4x4xf32>
    %cst_136 = arith.constant 0.353553385 : f32
    %249 = vector.broadcast %cst_136 : f32 to vector<4x4xf32>
    %250 = arith.mulf %248, %249 : vector<4x4xf32>
    %cst_137 = arith.constant dense<0xFF800000> : vector<4xf32>
    %251 = vector.multi_reduction <maximumf>, %250, %cst_137 [1] : vector<4x4xf32> to vector<4xf32>
    %252 = vector.shape_cast %251 : vector<4xf32> to vector<4x1xf32>
    %253 = vector.broadcast %252 : vector<4x1xf32> to vector<4x4xf32>
    %254 = arith.subf %250, %253 : vector<4x4xf32>
    %255 = math.exp %254 : vector<4x4xf32>
    %cst_138 = arith.constant dense<0.000000e+00> : vector<4xf32>
    %256 = vector.multi_reduction <add>, %255, %cst_138 [1] : vector<4x4xf32> to vector<4xf32>
    %257 = vector.shape_cast %256 : vector<4xf32> to vector<4x1xf32>
    %258 = vector.broadcast %257 : vector<4x1xf32> to vector<4x4xf32>
    %259 = arith.divf %255, %258 : vector<4x4xf32>
    %260 = vector.extract_strided_slice %197 {offsets = [0, 24], sizes = [4, 8], strides = [1, 1]} : vector<4x32xf32> to vector<4x8xf32>
    %cst_139 = arith.constant dense<0.000000e+00> : vector<4x8xf32>
    %261 = tpu.matmul %259, %260, %cst_139 {dimension_numbers = #tpu.dot_dimension_numbers<[1], [0], [0], [1], [0, 0, 1, 1], [], []>} : vector<4x4xf32>, vector<4x8xf32>, vector<4x8xf32> -> vector<4x8xf32>
    %262 = tpu.concatenate %213, %229, %245, %261 in 1 : vector<4x8xf32>, vector<4x8xf32>, vector<4x8xf32>, vector<4x8xf32> -> vector<4x32xf32>
    %cst_140 = arith.constant dense<0.000000e+00> : vector<4x32xf32>
    %263 = tpu.matmul %262, %186, %cst_140 {dimension_numbers = #tpu.dot_dimension_numbers<[1], [0], [0], [1], [0, 0, 1, 1], [], []>} : vector<4x32xf32>, vector<32x32xf32>, vector<4x32xf32> -> vector<4x32xf32>
    %264 = vector.broadcast %188 : vector<1x32xf32> to vector<4x32xf32>
    %265 = arith.addf %263, %264 : vector<4x32xf32>
    %266 = arith.addf %172, %265 : vector<4x32xf32>
    %c1_141 = arith.constant 1 : index
    %c0_142 = arith.constant 0 : index
    %c0_143 = arith.constant 0 : index
    %267 = vector.load %arg13[%c1_141, %c0_142, %c0_143] : memref<2x1x32xf32, #tpu.memory_space<vmem>>, vector<1x1x32xf32>
    %268 = vector.shape_cast %267 : vector<1x1x32xf32> to vector<1x32xf32>
    %c1_144 = arith.constant 1 : index
    %c0_145 = arith.constant 0 : index
    %c0_146 = arith.constant 0 : index
    %269 = vector.load %arg14[%c1_144, %c0_145, %c0_146] : memref<2x1x32xf32, #tpu.memory_space<vmem>>, vector<1x1x32xf32>
    %270 = vector.shape_cast %269 : vector<1x1x32xf32> to vector<1x32xf32>
    %cst_147 = arith.constant dense<0.000000e+00> : vector<4xf32>
    %271 = vector.multi_reduction <add>, %266, %cst_147 [1] : vector<4x32xf32> to vector<4xf32>
    %272 = vector.shape_cast %271 : vector<4xf32> to vector<4x1xf32>
    %cst_148 = arith.constant 3.200000e+01 : f32
    %273 = vector.broadcast %cst_148 : f32 to vector<4x1xf32>
    %274 = arith.divf %272, %273 : vector<4x1xf32>
    %275 = vector.broadcast %274 : vector<4x1xf32> to vector<4x32xf32>
    %276 = arith.subf %266, %275 : vector<4x32xf32>
    %277 = arith.mulf %276, %276 : vector<4x32xf32>
    %cst_149 = arith.constant dense<0.000000e+00> : vector<4xf32>
    %278 = vector.multi_reduction <add>, %277, %cst_149 [1] : vector<4x32xf32> to vector<4xf32>
    %279 = vector.shape_cast %278 : vector<4xf32> to vector<4x1xf32>
    %cst_150 = arith.constant 3.200000e+01 : f32
    %280 = vector.broadcast %cst_150 : f32 to vector<4x1xf32>
    %281 = arith.divf %279, %280 : vector<4x1xf32>
    %282 = vector.broadcast %274 : vector<4x1xf32> to vector<4x32xf32>
    %283 = arith.subf %266, %282 : vector<4x32xf32>
    %cst_151 = arith.constant 9.99999974E-6 : f32
    %284 = vector.broadcast %cst_151 : f32 to vector<4x1xf32>
    %285 = arith.addf %281, %284 : vector<4x1xf32>
    %286 = math.rsqrt %285 : vector<4x1xf32>
    %287 = vector.broadcast %286 : vector<4x1xf32> to vector<4x32xf32>
    %288 = arith.mulf %283, %287 : vector<4x32xf32>
    %289 = vector.broadcast %268 : vector<1x32xf32> to vector<4x32xf32>
    %290 = arith.mulf %288, %289 : vector<4x32xf32>
    %291 = vector.broadcast %270 : vector<1x32xf32> to vector<4x32xf32>
    %292 = arith.addf %290, %291 : vector<4x32xf32>
    %c1_152 = arith.constant 1 : index
    %c0_153 = arith.constant 0 : index
    %c0_154 = arith.constant 0 : index
    %293 = vector.load %arg15[%c1_152, %c0_153, %c0_154] : memref<2x32x128xf32, #tpu.memory_space<vmem>>, vector<1x32x128xf32>
    %294 = vector.shape_cast %293 : vector<1x32x128xf32> to vector<32x128xf32>
    %c1_155 = arith.constant 1 : index
    %c0_156 = arith.constant 0 : index
    %c0_157 = arith.constant 0 : index
    %295 = vector.load %arg16[%c1_155, %c0_156, %c0_157] : memref<2x1x128xf32, #tpu.memory_space<vmem>>, vector<1x1x128xf32>
    %296 = vector.shape_cast %295 : vector<1x1x128xf32> to vector<1x128xf32>
    %c1_158 = arith.constant 1 : index
    %c0_159 = arith.constant 0 : index
    %c0_160 = arith.constant 0 : index
    %297 = vector.load %arg17[%c1_158, %c0_159, %c0_160] : memref<2x128x32xf32, #tpu.memory_space<vmem>>, vector<1x128x32xf32>
    %298 = vector.shape_cast %297 : vector<1x128x32xf32> to vector<128x32xf32>
    %c1_161 = arith.constant 1 : index
    %c0_162 = arith.constant 0 : index
    %c0_163 = arith.constant 0 : index
    %299 = vector.load %arg18[%c1_161, %c0_162, %c0_163] : memref<2x1x32xf32, #tpu.memory_space<vmem>>, vector<1x1x32xf32>
    %300 = vector.shape_cast %299 : vector<1x1x32xf32> to vector<1x32xf32>
    %cst_164 = arith.constant dense<0.000000e+00> : vector<4x128xf32>
    %301 = tpu.matmul %292, %294, %cst_164 {dimension_numbers = #tpu.dot_dimension_numbers<[1], [0], [0], [1], [0, 0, 1, 1], [], []>} : vector<4x32xf32>, vector<32x128xf32>, vector<4x128xf32> -> vector<4x128xf32>
    %302 = vector.broadcast %296 : vector<1x128xf32> to vector<4x128xf32>
    %303 = arith.addf %301, %302 : vector<4x128xf32>
    %cst_165 = arith.constant 0.000000e+00 : f32
    %304 = vector.broadcast %cst_165 : f32 to vector<4x128xf32>
    %305 = arith.maximumf %303, %304 : vector<4x128xf32>
    %cst_166 = arith.constant dense<0.000000e+00> : vector<4x32xf32>
    %306 = tpu.matmul %305, %298, %cst_166 {dimension_numbers = #tpu.dot_dimension_numbers<[1], [0], [0], [1], [0, 0, 1, 1], [], []>} : vector<4x128xf32>, vector<128x32xf32>, vector<4x32xf32> -> vector<4x32xf32>
    %307 = vector.broadcast %300 : vector<1x32xf32> to vector<4x32xf32>
    %308 = arith.addf %306, %307 : vector<4x32xf32>
    %309 = arith.addf %292, %308 : vector<4x32xf32>
    %c1_167 = arith.constant 1 : index
    %c0_168 = arith.constant 0 : index
    %c0_169 = arith.constant 0 : index
    %310 = vector.load %arg19[%c1_167, %c0_168, %c0_169] : memref<2x1x32xf32, #tpu.memory_space<vmem>>, vector<1x1x32xf32>
    %311 = vector.shape_cast %310 : vector<1x1x32xf32> to vector<1x32xf32>
    %c1_170 = arith.constant 1 : index
    %c0_171 = arith.constant 0 : index
    %c0_172 = arith.constant 0 : index
    %312 = vector.load %arg20[%c1_170, %c0_171, %c0_172] : memref<2x1x32xf32, #tpu.memory_space<vmem>>, vector<1x1x32xf32>
    %313 = vector.shape_cast %312 : vector<1x1x32xf32> to vector<1x32xf32>
    %cst_173 = arith.constant dense<0.000000e+00> : vector<4xf32>
    %314 = vector.multi_reduction <add>, %309, %cst_173 [1] : vector<4x32xf32> to vector<4xf32>
    %315 = vector.shape_cast %314 : vector<4xf32> to vector<4x1xf32>
    %cst_174 = arith.constant 3.200000e+01 : f32
    %316 = vector.broadcast %cst_174 : f32 to vector<4x1xf32>
    %317 = arith.divf %315, %316 : vector<4x1xf32>
    %318 = vector.broadcast %317 : vector<4x1xf32> to vector<4x32xf32>
    %319 = arith.subf %309, %318 : vector<4x32xf32>
    %320 = arith.mulf %319, %319 : vector<4x32xf32>
    %cst_175 = arith.constant dense<0.000000e+00> : vector<4xf32>
    %321 = vector.multi_reduction <add>, %320, %cst_175 [1] : vector<4x32xf32> to vector<4xf32>
    %322 = vector.shape_cast %321 : vector<4xf32> to vector<4x1xf32>
    %cst_176 = arith.constant 3.200000e+01 : f32
    %323 = vector.broadcast %cst_176 : f32 to vector<4x1xf32>
    %324 = arith.divf %322, %323 : vector<4x1xf32>
    %325 = vector.broadcast %317 : vector<4x1xf32> to vector<4x32xf32>
    %326 = arith.subf %309, %325 : vector<4x32xf32>
    %cst_177 = arith.constant 9.99999974E-6 : f32
    %327 = vector.broadcast %cst_177 : f32 to vector<4x1xf32>
    %328 = arith.addf %324, %327 : vector<4x1xf32>
    %329 = math.rsqrt %328 : vector<4x1xf32>
    %330 = vector.broadcast %329 : vector<4x1xf32> to vector<4x32xf32>
    %331 = arith.mulf %326, %330 : vector<4x32xf32>
    %332 = vector.broadcast %311 : vector<1x32xf32> to vector<4x32xf32>
    %333 = arith.mulf %331, %332 : vector<4x32xf32>
    %334 = vector.broadcast %313 : vector<1x32xf32> to vector<4x32xf32>
    %335 = arith.addf %333, %334 : vector<4x32xf32>
    %c0_178 = arith.constant 0 : index
    %c0_179 = arith.constant 0 : index
    %c0_180 = arith.constant 0 : index
    %336 = vector.load %arg21[%c0_178, %c0_179, %c0_180] : memref<1x4x32xf32, #tpu.memory_space<vmem>>, vector<1x4x32xf32>
    %337 = vector.shape_cast %336 : vector<1x4x32xf32> to vector<4x32xf32>
    %338 = vector.shape_cast %335 : vector<4x32xf32> to vector<1x4x32xf32>
    tpu.vector_store %arg21[%c0_178, %c0_179, %c0_180], %338 {strides = array<i32>} : memref<1x4x32xf32, #tpu.memory_space<vmem>>, vector<1x4x32xf32>,
    return
  }
  func.func @transform_0(%arg0: i32) -> (i32, i32, i32) {
    %c0_i32 = arith.constant 0 : i32
    %c0_i32_0 = arith.constant 0 : i32
    %c0_i32_1 = arith.constant 0 : i32
    return %arg0, %c0_i32, %c0_i32_0 : i32, i32, i32
  }
  func.func @transform_1(%arg0: i32) -> (i32, i32) {
    %c0_i32 = arith.constant 0 : i32
    %c0_i32_0 = arith.constant 0 : i32
    %c0_i32_1 = arith.constant 0 : i32
    return %c0_i32, %c0_i32_0 : i32, i32
  }
  func.func @transform_2(%arg0: i32) -> (i32, i32) {
    %c0_i32 = arith.constant 0 : i32
    %c0_i32_0 = arith.constant 0 : i32
    %c0_i32_1 = arith.constant 0 : i32
    return %c0_i32, %c0_i32_0 : i32, i32
  }
  func.func @transform_3(%arg0: i32) -> (i32, i32, i32) {
    %c0_i32 = arith.constant 0 : i32
    %c0_i32_0 = arith.constant 0 : i32
    %c0_i32_1 = arith.constant 0 : i32
    %c0_i32_2 = arith.constant 0 : i32
    return %c0_i32, %c0_i32_0, %c0_i32_1 : i32, i32, i32
  }
  func.func @transform_4(%arg0: i32) -> (i32, i32, i32) {
    %c0_i32 = arith.constant 0 : i32
    %c0_i32_0 = arith.constant 0 : i32
    %c0_i32_1 = arith.constant 0 : i32
    %c0_i32_2 = arith.constant 0 : i32
    return %c0_i32, %c0_i32_0, %c0_i32_1 : i32, i32, i32
  }
  func.func @transform_5(%arg0: i32) -> (i32, i32, i32) {
    %c0_i32 = arith.constant 0 : i32
    %c0_i32_0 = arith.constant 0 : i32
    %c0_i32_1 = arith.constant 0 : i32
    %c0_i32_2 = arith.constant 0 : i32
    return %c0_i32, %c0_i32_0, %c0_i32_1 : i32, i32, i32
  }
  func.func @transform_6(%arg0: i32) -> (i32, i32, i32) {
    %c0_i32 = arith.constant 0 : i32
    %c0_i32_0 = arith.constant 0 : i32
    %c0_i32_1 = arith.constant 0 : i32
    %c0_i32_2 = arith.constant 0 : i32
    return %c0_i32, %c0_i32_0, %c0_i32_1 : i32, i32, i32
  }
  func.func @transform_7(%arg0: i32) -> (i32, i32, i32) {
    %c0_i32 = arith.constant 0 : i32
    %c0_i32_0 = arith.constant 0 : i32
    %c0_i32_1 = arith.constant 0 : i32
    %c0_i32_2 = arith.constant 0 : i32
    return %c0_i32, %c0_i32_0, %c0_i32_1 : i32, i32, i32
  }
  func.func @transform_8(%arg0: i32) -> (i32, i32, i32) {
    %c0_i32 = arith.constant 0 : i32
    %c0_i32_0 = arith.constant 0 : i32
    %c0_i32_1 = arith.constant 0 : i32
    %c0_i32_2 = arith.constant 0 : i32
    return %c0_i32, %c0_i32_0, %c0_i32_1 : i32, i32, i32
  }
  func.func @transform_9(%arg0: i32) -> (i32, i32, i32) {
    %c0_i32 = arith.constant 0 : i32
    %c0_i32_0 = arith.constant 0 : i32
    %c0_i32_1 = arith.constant 0 : i32
    %c0_i32_2 = arith.constant 0 : i32
    return %c0_i32, %c0_i32_0, %c0_i32_1 : i32, i32, i32
  }
  func.func @transform_10(%arg0: i32) -> (i32, i32, i32) {
    %c0_i32 = arith.constant 0 : i32
    %c0_i32_0 = arith.constant 0 : i32
    %c0_i32_1 = arith.constant 0 : i32
    %c0_i32_2 = arith.constant 0 : i32
    return %c0_i32, %c0_i32_0, %c0_i32_1 : i32, i32, i32
  }
  func.func @transform_11(%arg0: i32) -> (i32, i32, i32) {
    %c0_i32 = arith.constant 0 : i32
    %c0_i32_0 = arith.constant 0 : i32
    %c0_i32_1 = arith.constant 0 : i32
    %c0_i32_2 = arith.constant 0 : i32
    return %c0_i32, %c0_i32_0, %c0_i32_1 : i32, i32, i32
  }
  func.func @transform_12(%arg0: i32) -> (i32, i32, i32) {
    %c0_i32 = arith.constant 0 : i32
    %c0_i32_0 = arith.constant 0 : i32
    %c0_i32_1 = arith.constant 0 : i32
    %c0_i32_2 = arith.constant 0 : i32
    return %c0_i32, %c0_i32_0, %c0_i32_1 : i32, i32, i32
  }
  func.func @transform_13(%arg0: i32) -> (i32, i32, i32) {
    %c0_i32 = arith.constant 0 : i32
    %c0_i32_0 = arith.constant 0 : i32
    %c0_i32_1 = arith.constant 0 : i32
    %c0_i32_2 = arith.constant 0 : i32
    return %c0_i32, %c0_i32_0, %c0_i32_1 : i32, i32, i32
  }
  func.func @transform_14(%arg0: i32) -> (i32, i32, i32) {
    %c0_i32 = arith.constant 0 : i32
    %c0_i32_0 = arith.constant 0 : i32
    %c0_i32_1 = arith.constant 0 : i32
    %c0_i32_2 = arith.constant 0 : i32
    return %c0_i32, %c0_i32_0, %c0_i32_1 : i32, i32, i32
  }
  func.func @transform_15(%arg0: i32) -> (i32, i32, i32) {
    %c0_i32 = arith.constant 0 : i32
    %c0_i32_0 = arith.constant 0 : i32
    %c0_i32_1 = arith.constant 0 : i32
    %c0_i32_2 = arith.constant 0 : i32
    return %c0_i32, %c0_i32_0, %c0_i32_1 : i32, i32, i32
  }
  func.func @transform_16(%arg0: i32) -> (i32, i32, i32) {
    %c0_i32 = arith.constant 0 : i32
    %c0_i32_0 = arith.constant 0 : i32
    %c0_i32_1 = arith.constant 0 : i32
    %c0_i32_2 = arith.constant 0 : i32
    return %c0_i32, %c0_i32_0, %c0_i32_1 : i32, i32, i32
  }
  func.func @transform_17(%arg0: i32) -> (i32, i32, i32) {
    %c0_i32 = arith.constant 0 : i32
    %c0_i32_0 = arith.constant 0 : i32
    %c0_i32_1 = arith.constant 0 : i32
    %c0_i32_2 = arith.constant 0 : i32
    return %c0_i32, %c0_i32_0, %c0_i32_1 : i32, i32, i32
  }
  func.func @transform_18(%arg0: i32) -> (i32, i32, i32) {
    %c0_i32 = arith.constant 0 : i32
    %c0_i32_0 = arith.constant 0 : i32
    %c0_i32_1 = arith.constant 0 : i32
    %c0_i32_2 = arith.constant 0 : i32
    return %c0_i32, %c0_i32_0, %c0_i32_1 : i32, i32, i32
  }
  func.func @transform_19(%arg0: i32) -> (i32, i32, i32) {
    %c0_i32 = arith.constant 0 : i32
    %c0_i32_0 = arith.constant 0 : i32
    %c0_i32_1 = arith.constant 0 : i32
    %c0_i32_2 = arith.constant 0 : i32
    return %c0_i32, %c0_i32_0, %c0_i32_1 : i32, i32, i32
  }
  func.func @transform_20(%arg0: i32) -> (i32, i32, i32) {
    %c0_i32 = arith.constant 0 : i32
    %c0_i32_0 = arith.constant 0 : i32
    %c0_i32_1 = arith.constant 0 : i32
    return %arg0, %c0_i32, %c0_i32_0 : i32, i32, i32
  }
}

module attributes {stable_mosaic.version = 11 : i64} {
  func.func @_decoder_kernel(%arg0: i32, %arg1: memref<1x8x32xf32, #tpu.memory_space<vmem>>, %arg2: memref<1x4x32xf32, #tpu.memory_space<vmem>>, %arg3: memref<2x32x32xf32, #tpu.memory_space<vmem>>, %arg4: memref<2x1x32xf32, #tpu.memory_space<vmem>>, %arg5: memref<2x32x32xf32, #tpu.memory_space<vmem>>, %arg6: memref<2x1x32xf32, #tpu.memory_space<vmem>>, %arg7: memref<2x32x32xf32, #tpu.memory_space<vmem>>, %arg8: memref<2x1x32xf32, #tpu.memory_space<vmem>>, %arg9: memref<2x32x32xf32, #tpu.memory_space<vmem>>, %arg10: memref<2x1x32xf32, #tpu.memory_space<vmem>>, %arg11: memref<2x1x32xf32, #tpu.memory_space<vmem>>, %arg12: memref<2x1x32xf32, #tpu.memory_space<vmem>>, %arg13: memref<2x32x32xf32, #tpu.memory_space<vmem>>, %arg14: memref<2x1x32xf32, #tpu.memory_space<vmem>>, %arg15: memref<2x32x32xf32, #tpu.memory_space<vmem>>, %arg16: memref<2x1x32xf32, #tpu.memory_space<vmem>>, %arg17: memref<2x32x32xf32, #tpu.memory_space<vmem>>, %arg18: memref<2x1x32xf32, #tpu.memory_space<vmem>>, %arg19: memref<2x32x32xf32, #tpu.memory_space<vmem>>, %arg20: memref<2x1x32xf32, #tpu.memory_space<vmem>>, %arg21: memref<2x1x32xf32, #tpu.memory_space<vmem>>, %arg22: memref<2x1x32xf32, #tpu.memory_space<vmem>>, %arg23: memref<2x32x128xf32, #tpu.memory_space<vmem>>, %arg24: memref<2x1x128xf32, #tpu.memory_space<vmem>>, %arg25: memref<2x128x32xf32, #tpu.memory_space<vmem>>, %arg26: memref<2x1x32xf32, #tpu.memory_space<vmem>>, %arg27: memref<2x1x32xf32, #tpu.memory_space<vmem>>, %arg28: memref<2x1x32xf32, #tpu.memory_space<vmem>>, %arg29: memref<32x128xf32, #tpu.memory_space<vmem>>, %arg30: memref<1x128xf32, #tpu.memory_space<vmem>>, %arg31: memref<1x8x128xf32, #tpu.memory_space<vmem>>) attributes {dimension_semantics = [#tpu.dimension_semantics<parallel>], iteration_bounds = array<i64: 2>, scalar_prefetch = 0 : i64, scratch_operands = 0 : i64, tpu.core_type = #tpu.core_type<tc>, window_params = [{transform_indices = @transform_0, window_bounds = array<i64: 1, 8, 32>}, {transform_indices = @transform_1, window_bounds = array<i64: 1, 4, 32>}, {pipeline_mode = #tpu.pipeline_mode<synchronous>, transform_indices = @transform_2, window_bounds = array<i64: 2, 32, 32>}, {pipeline_mode = #tpu.pipeline_mode<synchronous>, transform_indices = @transform_3, window_bounds = array<i64: 2, 1, 32>}, {pipeline_mode = #tpu.pipeline_mode<synchronous>, transform_indices = @transform_4, window_bounds = array<i64: 2, 32, 32>}, {pipeline_mode = #tpu.pipeline_mode<synchronous>, transform_indices = @transform_5, window_bounds = array<i64: 2, 1, 32>}, {pipeline_mode = #tpu.pipeline_mode<synchronous>, transform_indices = @transform_6, window_bounds = array<i64: 2, 32, 32>}, {pipeline_mode = #tpu.pipeline_mode<synchronous>, transform_indices = @transform_7, window_bounds = array<i64: 2, 1, 32>}, {pipeline_mode = #tpu.pipeline_mode<synchronous>, transform_indices = @transform_8, window_bounds = array<i64: 2, 32, 32>}, {pipeline_mode = #tpu.pipeline_mode<synchronous>, transform_indices = @transform_9, window_bounds = array<i64: 2, 1, 32>}, {pipeline_mode = #tpu.pipeline_mode<synchronous>, transform_indices = @transform_10, window_bounds = array<i64: 2, 1, 32>}, {pipeline_mode = #tpu.pipeline_mode<synchronous>, transform_indices = @transform_11, window_bounds = array<i64: 2, 1, 32>}, {pipeline_mode = #tpu.pipeline_mode<synchronous>, transform_indices = @transform_12, window_bounds = array<i64: 2, 32, 32>}, {pipeline_mode = #tpu.pipeline_mode<synchronous>, transform_indices = @transform_13, window_bounds = array<i64: 2, 1, 32>}, {pipeline_mode = #tpu.pipeline_mode<synchronous>, transform_indices = @transform_14, window_bounds = array<i64: 2, 32, 32>}, {pipeline_mode = #tpu.pipeline_mode<synchronous>, transform_indices = @transform_15, window_bounds = array<i64: 2, 1, 32>}, {pipeline_mode = #tpu.pipeline_mode<synchronous>, transform_indices = @transform_16, window_bounds = array<i64: 2, 32, 32>}, {pipeline_mode = #tpu.pipeline_mode<synchronous>, transform_indices = @transform_17, window_bounds = array<i64: 2, 1, 32>}, {pipeline_mode = #tpu.pipeline_mode<synchronous>, transform_indices = @transform_18, window_bounds = array<i64: 2, 32, 32>}, {pipeline_mode = #tpu.pipeline_mode<synchronous>, transform_indices = @transform_19, window_bounds = array<i64: 2, 1, 32>}, {pipeline_mode = #tpu.pipeline_mode<synchronous>, transform_indices = @transform_20, window_bounds = array<i64: 2, 1, 32>}, {pipeline_mode = #tpu.pipeline_mode<synchronous>, transform_indices = @transform_21, window_bounds = array<i64: 2, 1, 32>}, {pipeline_mode = #tpu.pipeline_mode<synchronous>, transform_indices = @transform_22, window_bounds = array<i64: 2, 32, 128>}, {pipeline_mode = #tpu.pipeline_mode<synchronous>, transform_indices = @transform_23, window_bounds = array<i64: 2, 1, 128>}, {pipeline_mode = #tpu.pipeline_mode<synchronous>, transform_indices = @transform_24, window_bounds = array<i64: 2, 128, 32>}, {pipeline_mode = #tpu.pipeline_mode<synchronous>, transform_indices = @transform_25, window_bounds = array<i64: 2, 1, 32>}, {pipeline_mode = #tpu.pipeline_mode<synchronous>, transform_indices = @transform_26, window_bounds = array<i64: 2, 1, 32>}, {pipeline_mode = #tpu.pipeline_mode<synchronous>, transform_indices = @transform_27, window_bounds = array<i64: 2, 1, 32>}, {pipeline_mode = #tpu.pipeline_mode<synchronous>, transform_indices = @transform_28, window_bounds = array<i64: 32, 128>}, {pipeline_mode = #tpu.pipeline_mode<synchronous>, transform_indices = @transform_29, window_bounds = array<i64: 1, 128>}, {transform_indices = @transform_30, window_bounds = array<i64: 1, 8, 128>}]} {
    %c0 = arith.constant 0 : index
    %c0_0 = arith.constant 0 : index
    %c0_1 = arith.constant 0 : index
    %0 = vector.load %arg1[%c0, %c0_0, %c0_1] : memref<1x8x32xf32, #tpu.memory_space<vmem>>, vector<1x8x32xf32>
    %1 = vector.shape_cast %0 : vector<1x8x32xf32> to vector<8x32xf32>
    %c0_2 = arith.constant 0 : index
    %c0_3 = arith.constant 0 : index
    %c0_4 = arith.constant 0 : index
    %2 = vector.load %arg2[%c0_2, %c0_3, %c0_4] : memref<1x4x32xf32, #tpu.memory_space<vmem>>, vector<1x4x32xf32>
    %3 = vector.shape_cast %2 : vector<1x4x32xf32> to vector<4x32xf32>
    %c0_5 = arith.constant 0 : index
    %c0_6 = arith.constant 0 : index
    %c0_7 = arith.constant 0 : index
    %4 = vector.load %arg3[%c0_5, %c0_6, %c0_7] : memref<2x32x32xf32, #tpu.memory_space<vmem>>, vector<1x32x32xf32>
    %5 = vector.shape_cast %4 : vector<1x32x32xf32> to vector<32x32xf32>
    %c0_8 = arith.constant 0 : index
    %c0_9 = arith.constant 0 : index
    %c0_10 = arith.constant 0 : index
    %6 = vector.load %arg4[%c0_8, %c0_9, %c0_10] : memref<2x1x32xf32, #tpu.memory_space<vmem>>, vector<1x1x32xf32>
    %7 = vector.shape_cast %6 : vector<1x1x32xf32> to vector<1x32xf32>
    %c0_11 = arith.constant 0 : index
    %c0_12 = arith.constant 0 : index
    %c0_13 = arith.constant 0 : index
    %8 = vector.load %arg5[%c0_11, %c0_12, %c0_13] : memref<2x32x32xf32, #tpu.memory_space<vmem>>, vector<1x32x32xf32>
    %9 = vector.shape_cast %8 : vector<1x32x32xf32> to vector<32x32xf32>
    %c0_14 = arith.constant 0 : index
    %c0_15 = arith.constant 0 : index
    %c0_16 = arith.constant 0 : index
    %10 = vector.load %arg6[%c0_14, %c0_15, %c0_16] : memref<2x1x32xf32, #tpu.memory_space<vmem>>, vector<1x1x32xf32>
    %11 = vector.shape_cast %10 : vector<1x1x32xf32> to vector<1x32xf32>
    %c0_17 = arith.constant 0 : index
    %c0_18 = arith.constant 0 : index
    %c0_19 = arith.constant 0 : index
    %12 = vector.load %arg7[%c0_17, %c0_18, %c0_19] : memref<2x32x32xf32, #tpu.memory_space<vmem>>, vector<1x32x32xf32>
    %13 = vector.shape_cast %12 : vector<1x32x32xf32> to vector<32x32xf32>
    %c0_20 = arith.constant 0 : index
    %c0_21 = arith.constant 0 : index
    %c0_22 = arith.constant 0 : index
    %14 = vector.load %arg8[%c0_20, %c0_21, %c0_22] : memref<2x1x32xf32, #tpu.memory_space<vmem>>, vector<1x1x32xf32>
    %15 = vector.shape_cast %14 : vector<1x1x32xf32> to vector<1x32xf32>
    %c0_23 = arith.constant 0 : index
    %c0_24 = arith.constant 0 : index
    %c0_25 = arith.constant 0 : index
    %16 = vector.load %arg9[%c0_23, %c0_24, %c0_25] : memref<2x32x32xf32, #tpu.memory_space<vmem>>, vector<1x32x32xf32>
    %17 = vector.shape_cast %16 : vector<1x32x32xf32> to vector<32x32xf32>
    %c0_26 = arith.constant 0 : index
    %c0_27 = arith.constant 0 : index
    %c0_28 = arith.constant 0 : index
    %18 = vector.load %arg10[%c0_26, %c0_27, %c0_28] : memref<2x1x32xf32, #tpu.memory_space<vmem>>, vector<1x1x32xf32>
    %19 = vector.shape_cast %18 : vector<1x1x32xf32> to vector<1x32xf32>
    %cst = arith.constant dense<0.000000e+00> : vector<8x32xf32>
    %20 = tpu.matmul %1, %5, %cst {dimension_numbers = #tpu.dot_dimension_numbers<[1], [0], [0], [1], [0, 0, 1, 1], [], []>} : vector<8x32xf32>, vector<32x32xf32>, vector<8x32xf32> -> vector<8x32xf32>
    %21 = vector.broadcast %7 : vector<1x32xf32> to vector<8x32xf32>
    %22 = arith.addf %20, %21 : vector<8x32xf32>
    %cst_29 = arith.constant dense<0.000000e+00> : vector<8x32xf32>
    %23 = tpu.matmul %1, %9, %cst_29 {dimension_numbers = #tpu.dot_dimension_numbers<[1], [0], [0], [1], [0, 0, 1, 1], [], []>} : vector<8x32xf32>, vector<32x32xf32>, vector<8x32xf32> -> vector<8x32xf32>
    %24 = vector.broadcast %11 : vector<1x32xf32> to vector<8x32xf32>
    %25 = arith.addf %23, %24 : vector<8x32xf32>
    %cst_30 = arith.constant dense<0.000000e+00> : vector<8x32xf32>
    %26 = tpu.matmul %1, %13, %cst_30 {dimension_numbers = #tpu.dot_dimension_numbers<[1], [0], [0], [1], [0, 0, 1, 1], [], []>} : vector<8x32xf32>, vector<32x32xf32>, vector<8x32xf32> -> vector<8x32xf32>
    %27 = vector.broadcast %15 : vector<1x32xf32> to vector<8x32xf32>
    %28 = arith.addf %26, %27 : vector<8x32xf32>
    %29 = tpu.iota {dimensions = array<i32: 0>} : vector<8x8xi32>
    %30 = tpu.iota {dimensions = array<i32: 1>} : vector<8x8xi32>
    %31 = arith.cmpi sge, %29, %30 : vector<8x8xi32>
    %cst_31 = arith.constant 0.000000e+00 : f32
    %cst_32 = arith.constant -1.000000e+30 : f32
    %32 = vector.broadcast %cst_31 : f32 to vector<8x8xf32>
    %33 = vector.broadcast %cst_32 : f32 to vector<8x8xf32>
    %34 = arith.select %31, %32, %33 : vector<8x8xi1>, vector<8x8xf32>
    %35 = vector.extract_strided_slice %22 {offsets = [0, 0], sizes = [8, 8], strides = [1, 1]} : vector<8x32xf32> to vector<8x8xf32>
    %36 = vector.extract_strided_slice %25 {offsets = [0, 0], sizes = [8, 8], strides = [1, 1]} : vector<8x32xf32> to vector<8x8xf32>
    %cst_33 = arith.constant dense<0.000000e+00> : vector<8x8xf32>
    %37 = tpu.matmul %35, %36, %cst_33 {dimension_numbers = #tpu.dot_dimension_numbers<[1], [1], [0], [0], [0, 0, 1, 0], [], []>} : vector<8x8xf32>, vector<8x8xf32>, vector<8x8xf32> -> vector<8x8xf32>
    %cst_34 = arith.constant 0.353553385 : f32
    %38 = vector.broadcast %cst_34 : f32 to vector<8x8xf32>
    %39 = arith.mulf %37, %38 : vector<8x8xf32>
    %40 = arith.addf %39, %34 : vector<8x8xf32>
    %cst_35 = arith.constant dense<0xFF800000> : vector<8xf32>
    %41 = vector.multi_reduction <maximumf>, %40, %cst_35 [1] : vector<8x8xf32> to vector<8xf32>
    %42 = vector.shape_cast %41 : vector<8xf32> to vector<8x1xf32>
    %43 = vector.broadcast %42 : vector<8x1xf32> to vector<8x8xf32>
    %44 = arith.subf %40, %43 : vector<8x8xf32>
    %45 = math.exp %44 : vector<8x8xf32>
    %cst_36 = arith.constant dense<0.000000e+00> : vector<8xf32>
    %46 = vector.multi_reduction <add>, %45, %cst_36 [1] : vector<8x8xf32> to vector<8xf32>
    %47 = vector.shape_cast %46 : vector<8xf32> to vector<8x1xf32>
    %48 = vector.broadcast %47 : vector<8x1xf32> to vector<8x8xf32>
    %49 = arith.divf %45, %48 : vector<8x8xf32>
    %50 = vector.extract_strided_slice %28 {offsets = [0, 0], sizes = [8, 8], strides = [1, 1]} : vector<8x32xf32> to vector<8x8xf32>
    %cst_37 = arith.constant dense<0.000000e+00> : vector<8x8xf32>
    %51 = tpu.matmul %49, %50, %cst_37 {dimension_numbers = #tpu.dot_dimension_numbers<[1], [0], [0], [1], [0, 0, 1, 1], [], []>} : vector<8x8xf32>, vector<8x8xf32>, vector<8x8xf32> -> vector<8x8xf32>
    %52 = vector.extract_strided_slice %22 {offsets = [0, 8], sizes = [8, 8], strides = [1, 1]} : vector<8x32xf32> to vector<8x8xf32>
    %53 = vector.extract_strided_slice %25 {offsets = [0, 8], sizes = [8, 8], strides = [1, 1]} : vector<8x32xf32> to vector<8x8xf32>
    %cst_38 = arith.constant dense<0.000000e+00> : vector<8x8xf32>
    %54 = tpu.matmul %52, %53, %cst_38 {dimension_numbers = #tpu.dot_dimension_numbers<[1], [1], [0], [0], [0, 0, 1, 0], [], []>} : vector<8x8xf32>, vector<8x8xf32>, vector<8x8xf32> -> vector<8x8xf32>
    %cst_39 = arith.constant 0.353553385 : f32
    %55 = vector.broadcast %cst_39 : f32 to vector<8x8xf32>
    %56 = arith.mulf %54, %55 : vector<8x8xf32>
    %57 = arith.addf %56, %34 : vector<8x8xf32>
    %cst_40 = arith.constant dense<0xFF800000> : vector<8xf32>
    %58 = vector.multi_reduction <maximumf>, %57, %cst_40 [1] : vector<8x8xf32> to vector<8xf32>
    %59 = vector.shape_cast %58 : vector<8xf32> to vector<8x1xf32>
    %60 = vector.broadcast %59 : vector<8x1xf32> to vector<8x8xf32>
    %61 = arith.subf %57, %60 : vector<8x8xf32>
    %62 = math.exp %61 : vector<8x8xf32>
    %cst_41 = arith.constant dense<0.000000e+00> : vector<8xf32>
    %63 = vector.multi_reduction <add>, %62, %cst_41 [1] : vector<8x8xf32> to vector<8xf32>
    %64 = vector.shape_cast %63 : vector<8xf32> to vector<8x1xf32>
    %65 = vector.broadcast %64 : vector<8x1xf32> to vector<8x8xf32>
    %66 = arith.divf %62, %65 : vector<8x8xf32>
    %67 = vector.extract_strided_slice %28 {offsets = [0, 8], sizes = [8, 8], strides = [1, 1]} : vector<8x32xf32> to vector<8x8xf32>
    %cst_42 = arith.constant dense<0.000000e+00> : vector<8x8xf32>
    %68 = tpu.matmul %66, %67, %cst_42 {dimension_numbers = #tpu.dot_dimension_numbers<[1], [0], [0], [1], [0, 0, 1, 1], [], []>} : vector<8x8xf32>, vector<8x8xf32>, vector<8x8xf32> -> vector<8x8xf32>
    %69 = vector.extract_strided_slice %22 {offsets = [0, 16], sizes = [8, 8], strides = [1, 1]} : vector<8x32xf32> to vector<8x8xf32>
    %70 = vector.extract_strided_slice %25 {offsets = [0, 16], sizes = [8, 8], strides = [1, 1]} : vector<8x32xf32> to vector<8x8xf32>
    %cst_43 = arith.constant dense<0.000000e+00> : vector<8x8xf32>
    %71 = tpu.matmul %69, %70, %cst_43 {dimension_numbers = #tpu.dot_dimension_numbers<[1], [1], [0], [0], [0, 0, 1, 0], [], []>} : vector<8x8xf32>, vector<8x8xf32>, vector<8x8xf32> -> vector<8x8xf32>
    %cst_44 = arith.constant 0.353553385 : f32
    %72 = vector.broadcast %cst_44 : f32 to vector<8x8xf32>
    %73 = arith.mulf %71, %72 : vector<8x8xf32>
    %74 = arith.addf %73, %34 : vector<8x8xf32>
    %cst_45 = arith.constant dense<0xFF800000> : vector<8xf32>
    %75 = vector.multi_reduction <maximumf>, %74, %cst_45 [1] : vector<8x8xf32> to vector<8xf32>
    %76 = vector.shape_cast %75 : vector<8xf32> to vector<8x1xf32>
    %77 = vector.broadcast %76 : vector<8x1xf32> to vector<8x8xf32>
    %78 = arith.subf %74, %77 : vector<8x8xf32>
    %79 = math.exp %78 : vector<8x8xf32>
    %cst_46 = arith.constant dense<0.000000e+00> : vector<8xf32>
    %80 = vector.multi_reduction <add>, %79, %cst_46 [1] : vector<8x8xf32> to vector<8xf32>
    %81 = vector.shape_cast %80 : vector<8xf32> to vector<8x1xf32>
    %82 = vector.broadcast %81 : vector<8x1xf32> to vector<8x8xf32>
    %83 = arith.divf %79, %82 : vector<8x8xf32>
    %84 = vector.extract_strided_slice %28 {offsets = [0, 16], sizes = [8, 8], strides = [1, 1]} : vector<8x32xf32> to vector<8x8xf32>
    %cst_47 = arith.constant dense<0.000000e+00> : vector<8x8xf32>
    %85 = tpu.matmul %83, %84, %cst_47 {dimension_numbers = #tpu.dot_dimension_numbers<[1], [0], [0], [1], [0, 0, 1, 1], [], []>} : vector<8x8xf32>, vector<8x8xf32>, vector<8x8xf32> -> vector<8x8xf32>
    %86 = vector.extract_strided_slice %22 {offsets = [0, 24], sizes = [8, 8], strides = [1, 1]} : vector<8x32xf32> to vector<8x8xf32>
    %87 = vector.extract_strided_slice %25 {offsets = [0, 24], sizes = [8, 8], strides = [1, 1]} : vector<8x32xf32> to vector<8x8xf32>
    %cst_48 = arith.constant dense<0.000000e+00> : vector<8x8xf32>
    %88 = tpu.matmul %86, %87, %cst_48 {dimension_numbers = #tpu.dot_dimension_numbers<[1], [1], [0], [0], [0, 0, 1, 0], [], []>} : vector<8x8xf32>, vector<8x8xf32>, vector<8x8xf32> -> vector<8x8xf32>
    %cst_49 = arith.constant 0.353553385 : f32
    %89 = vector.broadcast %cst_49 : f32 to vector<8x8xf32>
    %90 = arith.mulf %88, %89 : vector<8x8xf32>
    %91 = arith.addf %90, %34 : vector<8x8xf32>
    %cst_50 = arith.constant dense<0xFF800000> : vector<8xf32>
    %92 = vector.multi_reduction <maximumf>, %91, %cst_50 [1] : vector<8x8xf32> to vector<8xf32>
    %93 = vector.shape_cast %92 : vector<8xf32> to vector<8x1xf32>
    %94 = vector.broadcast %93 : vector<8x1xf32> to vector<8x8xf32>
    %95 = arith.subf %91, %94 : vector<8x8xf32>
    %96 = math.exp %95 : vector<8x8xf32>
    %cst_51 = arith.constant dense<0.000000e+00> : vector<8xf32>
    %97 = vector.multi_reduction <add>, %96, %cst_51 [1] : vector<8x8xf32> to vector<8xf32>
    %98 = vector.shape_cast %97 : vector<8xf32> to vector<8x1xf32>
    %99 = vector.broadcast %98 : vector<8x1xf32> to vector<8x8xf32>
    %100 = arith.divf %96, %99 : vector<8x8xf32>
    %101 = vector.extract_strided_slice %28 {offsets = [0, 24], sizes = [8, 8], strides = [1, 1]} : vector<8x32xf32> to vector<8x8xf32>
    %cst_52 = arith.constant dense<0.000000e+00> : vector<8x8xf32>
    %102 = tpu.matmul %100, %101, %cst_52 {dimension_numbers = #tpu.dot_dimension_numbers<[1], [0], [0], [1], [0, 0, 1, 1], [], []>} : vector<8x8xf32>, vector<8x8xf32>, vector<8x8xf32> -> vector<8x8xf32>
    %103 = tpu.concatenate %51, %68, %85, %102 in 1 : vector<8x8xf32>, vector<8x8xf32>, vector<8x8xf32>, vector<8x8xf32> -> vector<8x32xf32>
    %cst_53 = arith.constant dense<0.000000e+00> : vector<8x32xf32>
    %104 = tpu.matmul %103, %17, %cst_53 {dimension_numbers = #tpu.dot_dimension_numbers<[1], [0], [0], [1], [0, 0, 1, 1], [], []>} : vector<8x32xf32>, vector<32x32xf32>, vector<8x32xf32> -> vector<8x32xf32>
    %105 = vector.broadcast %19 : vector<1x32xf32> to vector<8x32xf32>
    %106 = arith.addf %104, %105 : vector<8x32xf32>
    %107 = arith.addf %1, %106 : vector<8x32xf32>
    %c0_54 = arith.constant 0 : index
    %c0_55 = arith.constant 0 : index
    %c0_56 = arith.constant 0 : index
    %108 = vector.load %arg11[%c0_54, %c0_55, %c0_56] : memref<2x1x32xf32, #tpu.memory_space<vmem>>, vector<1x1x32xf32>
    %109 = vector.shape_cast %108 : vector<1x1x32xf32> to vector<1x32xf32>
    %c0_57 = arith.constant 0 : index
    %c0_58 = arith.constant 0 : index
    %c0_59 = arith.constant 0 : index
    %110 = vector.load %arg12[%c0_57, %c0_58, %c0_59] : memref<2x1x32xf32, #tpu.memory_space<vmem>>, vector<1x1x32xf32>
    %111 = vector.shape_cast %110 : vector<1x1x32xf32> to vector<1x32xf32>
    %cst_60 = arith.constant dense<0.000000e+00> : vector<8xf32>
    %112 = vector.multi_reduction <add>, %107, %cst_60 [1] : vector<8x32xf32> to vector<8xf32>
    %113 = vector.shape_cast %112 : vector<8xf32> to vector<8x1xf32>
    %cst_61 = arith.constant 3.200000e+01 : f32
    %114 = vector.broadcast %cst_61 : f32 to vector<8x1xf32>
    %115 = arith.divf %113, %114 : vector<8x1xf32>
    %116 = vector.broadcast %115 : vector<8x1xf32> to vector<8x32xf32>
    %117 = arith.subf %107, %116 : vector<8x32xf32>
    %118 = arith.mulf %117, %117 : vector<8x32xf32>
    %cst_62 = arith.constant dense<0.000000e+00> : vector<8xf32>
    %119 = vector.multi_reduction <add>, %118, %cst_62 [1] : vector<8x32xf32> to vector<8xf32>
    %120 = vector.shape_cast %119 : vector<8xf32> to vector<8x1xf32>
    %cst_63 = arith.constant 3.200000e+01 : f32
    %121 = vector.broadcast %cst_63 : f32 to vector<8x1xf32>
    %122 = arith.divf %120, %121 : vector<8x1xf32>
    %123 = vector.broadcast %115 : vector<8x1xf32> to vector<8x32xf32>
    %124 = arith.subf %107, %123 : vector<8x32xf32>
    %cst_64 = arith.constant 9.99999974E-6 : f32
    %125 = vector.broadcast %cst_64 : f32 to vector<8x1xf32>
    %126 = arith.addf %122, %125 : vector<8x1xf32>
    %127 = math.rsqrt %126 : vector<8x1xf32>
    %128 = vector.broadcast %127 : vector<8x1xf32> to vector<8x32xf32>
    %129 = arith.mulf %124, %128 : vector<8x32xf32>
    %130 = vector.broadcast %109 : vector<1x32xf32> to vector<8x32xf32>
    %131 = arith.mulf %129, %130 : vector<8x32xf32>
    %132 = vector.broadcast %111 : vector<1x32xf32> to vector<8x32xf32>
    %133 = arith.addf %131, %132 : vector<8x32xf32>
    %c0_65 = arith.constant 0 : index
    %c0_66 = arith.constant 0 : index
    %c0_67 = arith.constant 0 : index
    %134 = vector.load %arg13[%c0_65, %c0_66, %c0_67] : memref<2x32x32xf32, #tpu.memory_space<vmem>>, vector<1x32x32xf32>
    %135 = vector.shape_cast %134 : vector<1x32x32xf32> to vector<32x32xf32>
    %c0_68 = arith.constant 0 : index
    %c0_69 = arith.constant 0 : index
    %c0_70 = arith.constant 0 : index
    %136 = vector.load %arg14[%c0_68, %c0_69, %c0_70] : memref<2x1x32xf32, #tpu.memory_space<vmem>>, vector<1x1x32xf32>
    %137 = vector.shape_cast %136 : vector<1x1x32xf32> to vector<1x32xf32>
    %c0_71 = arith.constant 0 : index
    %c0_72 = arith.constant 0 : index
    %c0_73 = arith.constant 0 : index
    %138 = vector.load %arg15[%c0_71, %c0_72, %c0_73] : memref<2x32x32xf32, #tpu.memory_space<vmem>>, vector<1x32x32xf32>
    %139 = vector.shape_cast %138 : vector<1x32x32xf32> to vector<32x32xf32>
    %c0_74 = arith.constant 0 : index
    %c0_75 = arith.constant 0 : index
    %c0_76 = arith.constant 0 : index
    %140 = vector.load %arg16[%c0_74, %c0_75, %c0_76] : memref<2x1x32xf32, #tpu.memory_space<vmem>>, vector<1x1x32xf32>
    %141 = vector.shape_cast %140 : vector<1x1x32xf32> to vector<1x32xf32>
    %c0_77 = arith.constant 0 : index
    %c0_78 = arith.constant 0 : index
    %c0_79 = arith.constant 0 : index
    %142 = vector.load %arg17[%c0_77, %c0_78, %c0_79] : memref<2x32x32xf32, #tpu.memory_space<vmem>>, vector<1x32x32xf32>
    %143 = vector.shape_cast %142 : vector<1x32x32xf32> to vector<32x32xf32>
    %c0_80 = arith.constant 0 : index
    %c0_81 = arith.constant 0 : index
    %c0_82 = arith.constant 0 : index
    %144 = vector.load %arg18[%c0_80, %c0_81, %c0_82] : memref<2x1x32xf32, #tpu.memory_space<vmem>>, vector<1x1x32xf32>
    %145 = vector.shape_cast %144 : vector<1x1x32xf32> to vector<1x32xf32>
    %c0_83 = arith.constant 0 : index
    %c0_84 = arith.constant 0 : index
    %c0_85 = arith.constant 0 : index
    %146 = vector.load %arg19[%c0_83, %c0_84, %c0_85] : memref<2x32x32xf32, #tpu.memory_space<vmem>>, vector<1x32x32xf32>
    %147 = vector.shape_cast %146 : vector<1x32x32xf32> to vector<32x32xf32>
    %c0_86 = arith.constant 0 : index
    %c0_87 = arith.constant 0 : index
    %c0_88 = arith.constant 0 : index
    %148 = vector.load %arg20[%c0_86, %c0_87, %c0_88] : memref<2x1x32xf32, #tpu.memory_space<vmem>>, vector<1x1x32xf32>
    %149 = vector.shape_cast %148 : vector<1x1x32xf32> to vector<1x32xf32>
    %cst_89 = arith.constant dense<0.000000e+00> : vector<8x32xf32>
    %150 = tpu.matmul %133, %135, %cst_89 {dimension_numbers = #tpu.dot_dimension_numbers<[1], [0], [0], [1], [0, 0, 1, 1], [], []>} : vector<8x32xf32>, vector<32x32xf32>, vector<8x32xf32> -> vector<8x32xf32>
    %151 = vector.broadcast %137 : vector<1x32xf32> to vector<8x32xf32>
    %152 = arith.addf %150, %151 : vector<8x32xf32>
    %cst_90 = arith.constant dense<0.000000e+00> : vector<4x32xf32>
    %153 = tpu.matmul %3, %139, %cst_90 {dimension_numbers = #tpu.dot_dimension_numbers<[1], [0], [0], [1], [0, 0, 1, 1], [], []>} : vector<4x32xf32>, vector<32x32xf32>, vector<4x32xf32> -> vector<4x32xf32>
    %154 = vector.broadcast %141 : vector<1x32xf32> to vector<4x32xf32>
    %155 = arith.addf %153, %154 : vector<4x32xf32>
    %cst_91 = arith.constant dense<0.000000e+00> : vector<4x32xf32>
    %156 = tpu.matmul %3, %143, %cst_91 {dimension_numbers = #tpu.dot_dimension_numbers<[1], [0], [0], [1], [0, 0, 1, 1], [], []>} : vector<4x32xf32>, vector<32x32xf32>, vector<4x32xf32> -> vector<4x32xf32>
    %157 = vector.broadcast %145 : vector<1x32xf32> to vector<4x32xf32>
    %158 = arith.addf %156, %157 : vector<4x32xf32>
    %159 = vector.extract_strided_slice %152 {offsets = [0, 0], sizes = [8, 8], strides = [1, 1]} : vector<8x32xf32> to vector<8x8xf32>
    %160 = vector.extract_strided_slice %155 {offsets = [0, 0], sizes = [4, 8], strides = [1, 1]} : vector<4x32xf32> to vector<4x8xf32>
    %cst_92 = arith.constant dense<0.000000e+00> : vector<8x4xf32>
    %161 = tpu.matmul %159, %160, %cst_92 {dimension_numbers = #tpu.dot_dimension_numbers<[1], [1], [0], [0], [0, 0, 1, 0], [], []>} : vector<8x8xf32>, vector<4x8xf32>, vector<8x4xf32> -> vector<8x4xf32>
    %cst_93 = arith.constant 0.353553385 : f32
    %162 = vector.broadcast %cst_93 : f32 to vector<8x4xf32>
    %163 = arith.mulf %161, %162 : vector<8x4xf32>
    %cst_94 = arith.constant dense<0xFF800000> : vector<8xf32>
    %164 = vector.multi_reduction <maximumf>, %163, %cst_94 [1] : vector<8x4xf32> to vector<8xf32>
    %165 = vector.shape_cast %164 : vector<8xf32> to vector<8x1xf32>
    %166 = vector.broadcast %165 : vector<8x1xf32> to vector<8x4xf32>
    %167 = arith.subf %163, %166 : vector<8x4xf32>
    %168 = math.exp %167 : vector<8x4xf32>
    %cst_95 = arith.constant dense<0.000000e+00> : vector<8xf32>
    %169 = vector.multi_reduction <add>, %168, %cst_95 [1] : vector<8x4xf32> to vector<8xf32>
    %170 = vector.shape_cast %169 : vector<8xf32> to vector<8x1xf32>
    %171 = vector.broadcast %170 : vector<8x1xf32> to vector<8x4xf32>
    %172 = arith.divf %168, %171 : vector<8x4xf32>
    %173 = vector.extract_strided_slice %158 {offsets = [0, 0], sizes = [4, 8], strides = [1, 1]} : vector<4x32xf32> to vector<4x8xf32>
    %cst_96 = arith.constant dense<0.000000e+00> : vector<8x8xf32>
    %174 = tpu.matmul %172, %173, %cst_96 {dimension_numbers = #tpu.dot_dimension_numbers<[1], [0], [0], [1], [0, 0, 1, 1], [], []>} : vector<8x4xf32>, vector<4x8xf32>, vector<8x8xf32> -> vector<8x8xf32>
    %175 = vector.extract_strided_slice %152 {offsets = [0, 8], sizes = [8, 8], strides = [1, 1]} : vector<8x32xf32> to vector<8x8xf32>
    %176 = vector.extract_strided_slice %155 {offsets = [0, 8], sizes = [4, 8], strides = [1, 1]} : vector<4x32xf32> to vector<4x8xf32>
    %cst_97 = arith.constant dense<0.000000e+00> : vector<8x4xf32>
    %177 = tpu.matmul %175, %176, %cst_97 {dimension_numbers = #tpu.dot_dimension_numbers<[1], [1], [0], [0], [0, 0, 1, 0], [], []>} : vector<8x8xf32>, vector<4x8xf32>, vector<8x4xf32> -> vector<8x4xf32>
    %cst_98 = arith.constant 0.353553385 : f32
    %178 = vector.broadcast %cst_98 : f32 to vector<8x4xf32>
    %179 = arith.mulf %177, %178 : vector<8x4xf32>
    %cst_99 = arith.constant dense<0xFF800000> : vector<8xf32>
    %180 = vector.multi_reduction <maximumf>, %179, %cst_99 [1] : vector<8x4xf32> to vector<8xf32>
    %181 = vector.shape_cast %180 : vector<8xf32> to vector<8x1xf32>
    %182 = vector.broadcast %181 : vector<8x1xf32> to vector<8x4xf32>
    %183 = arith.subf %179, %182 : vector<8x4xf32>
    %184 = math.exp %183 : vector<8x4xf32>
    %cst_100 = arith.constant dense<0.000000e+00> : vector<8xf32>
    %185 = vector.multi_reduction <add>, %184, %cst_100 [1] : vector<8x4xf32> to vector<8xf32>
    %186 = vector.shape_cast %185 : vector<8xf32> to vector<8x1xf32>
    %187 = vector.broadcast %186 : vector<8x1xf32> to vector<8x4xf32>
    %188 = arith.divf %184, %187 : vector<8x4xf32>
    %189 = vector.extract_strided_slice %158 {offsets = [0, 8], sizes = [4, 8], strides = [1, 1]} : vector<4x32xf32> to vector<4x8xf32>
    %cst_101 = arith.constant dense<0.000000e+00> : vector<8x8xf32>
    %190 = tpu.matmul %188, %189, %cst_101 {dimension_numbers = #tpu.dot_dimension_numbers<[1], [0], [0], [1], [0, 0, 1, 1], [], []>} : vector<8x4xf32>, vector<4x8xf32>, vector<8x8xf32> -> vector<8x8xf32>
    %191 = vector.extract_strided_slice %152 {offsets = [0, 16], sizes = [8, 8], strides = [1, 1]} : vector<8x32xf32> to vector<8x8xf32>
    %192 = vector.extract_strided_slice %155 {offsets = [0, 16], sizes = [4, 8], strides = [1, 1]} : vector<4x32xf32> to vector<4x8xf32>
    %cst_102 = arith.constant dense<0.000000e+00> : vector<8x4xf32>
    %193 = tpu.matmul %191, %192, %cst_102 {dimension_numbers = #tpu.dot_dimension_numbers<[1], [1], [0], [0], [0, 0, 1, 0], [], []>} : vector<8x8xf32>, vector<4x8xf32>, vector<8x4xf32> -> vector<8x4xf32>
    %cst_103 = arith.constant 0.353553385 : f32
    %194 = vector.broadcast %cst_103 : f32 to vector<8x4xf32>
    %195 = arith.mulf %193, %194 : vector<8x4xf32>
    %cst_104 = arith.constant dense<0xFF800000> : vector<8xf32>
    %196 = vector.multi_reduction <maximumf>, %195, %cst_104 [1] : vector<8x4xf32> to vector<8xf32>
    %197 = vector.shape_cast %196 : vector<8xf32> to vector<8x1xf32>
    %198 = vector.broadcast %197 : vector<8x1xf32> to vector<8x4xf32>
    %199 = arith.subf %195, %198 : vector<8x4xf32>
    %200 = math.exp %199 : vector<8x4xf32>
    %cst_105 = arith.constant dense<0.000000e+00> : vector<8xf32>
    %201 = vector.multi_reduction <add>, %200, %cst_105 [1] : vector<8x4xf32> to vector<8xf32>
    %202 = vector.shape_cast %201 : vector<8xf32> to vector<8x1xf32>
    %203 = vector.broadcast %202 : vector<8x1xf32> to vector<8x4xf32>
    %204 = arith.divf %200, %203 : vector<8x4xf32>
    %205 = vector.extract_strided_slice %158 {offsets = [0, 16], sizes = [4, 8], strides = [1, 1]} : vector<4x32xf32> to vector<4x8xf32>
    %cst_106 = arith.constant dense<0.000000e+00> : vector<8x8xf32>
    %206 = tpu.matmul %204, %205, %cst_106 {dimension_numbers = #tpu.dot_dimension_numbers<[1], [0], [0], [1], [0, 0, 1, 1], [], []>} : vector<8x4xf32>, vector<4x8xf32>, vector<8x8xf32> -> vector<8x8xf32>
    %207 = vector.extract_strided_slice %152 {offsets = [0, 24], sizes = [8, 8], strides = [1, 1]} : vector<8x32xf32> to vector<8x8xf32>
    %208 = vector.extract_strided_slice %155 {offsets = [0, 24], sizes = [4, 8], strides = [1, 1]} : vector<4x32xf32> to vector<4x8xf32>
    %cst_107 = arith.constant dense<0.000000e+00> : vector<8x4xf32>
    %209 = tpu.matmul %207, %208, %cst_107 {dimension_numbers = #tpu.dot_dimension_numbers<[1], [1], [0], [0], [0, 0, 1, 0], [], []>} : vector<8x8xf32>, vector<4x8xf32>, vector<8x4xf32> -> vector<8x4xf32>
    %cst_108 = arith.constant 0.353553385 : f32
    %210 = vector.broadcast %cst_108 : f32 to vector<8x4xf32>
    %211 = arith.mulf %209, %210 : vector<8x4xf32>
    %cst_109 = arith.constant dense<0xFF800000> : vector<8xf32>
    %212 = vector.multi_reduction <maximumf>, %211, %cst_109 [1] : vector<8x4xf32> to vector<8xf32>
    %213 = vector.shape_cast %212 : vector<8xf32> to vector<8x1xf32>
    %214 = vector.broadcast %213 : vector<8x1xf32> to vector<8x4xf32>
    %215 = arith.subf %211, %214 : vector<8x4xf32>
    %216 = math.exp %215 : vector<8x4xf32>
    %cst_110 = arith.constant dense<0.000000e+00> : vector<8xf32>
    %217 = vector.multi_reduction <add>, %216, %cst_110 [1] : vector<8x4xf32> to vector<8xf32>
    %218 = vector.shape_cast %217 : vector<8xf32> to vector<8x1xf32>
    %219 = vector.broadcast %218 : vector<8x1xf32> to vector<8x4xf32>
    %220 = arith.divf %216, %219 : vector<8x4xf32>
    %221 = vector.extract_strided_slice %158 {offsets = [0, 24], sizes = [4, 8], strides = [1, 1]} : vector<4x32xf32> to vector<4x8xf32>
    %cst_111 = arith.constant dense<0.000000e+00> : vector<8x8xf32>
    %222 = tpu.matmul %220, %221, %cst_111 {dimension_numbers = #tpu.dot_dimension_numbers<[1], [0], [0], [1], [0, 0, 1, 1], [], []>} : vector<8x4xf32>, vector<4x8xf32>, vector<8x8xf32> -> vector<8x8xf32>
    %223 = tpu.concatenate %174, %190, %206, %222 in 1 : vector<8x8xf32>, vector<8x8xf32>, vector<8x8xf32>, vector<8x8xf32> -> vector<8x32xf32>
    %cst_112 = arith.constant dense<0.000000e+00> : vector<8x32xf32>
    %224 = tpu.matmul %223, %147, %cst_112 {dimension_numbers = #tpu.dot_dimension_numbers<[1], [0], [0], [1], [0, 0, 1, 1], [], []>} : vector<8x32xf32>, vector<32x32xf32>, vector<8x32xf32> -> vector<8x32xf32>
    %225 = vector.broadcast %149 : vector<1x32xf32> to vector<8x32xf32>
    %226 = arith.addf %224, %225 : vector<8x32xf32>
    %227 = arith.addf %133, %226 : vector<8x32xf32>
    %c0_113 = arith.constant 0 : index
    %c0_114 = arith.constant 0 : index
    %c0_115 = arith.constant 0 : index
    %228 = vector.load %arg21[%c0_113, %c0_114, %c0_115] : memref<2x1x32xf32, #tpu.memory_space<vmem>>, vector<1x1x32xf32>
    %229 = vector.shape_cast %228 : vector<1x1x32xf32> to vector<1x32xf32>
    %c0_116 = arith.constant 0 : index
    %c0_117 = arith.constant 0 : index
    %c0_118 = arith.constant 0 : index
    %230 = vector.load %arg22[%c0_116, %c0_117, %c0_118] : memref<2x1x32xf32, #tpu.memory_space<vmem>>, vector<1x1x32xf32>
    %231 = vector.shape_cast %230 : vector<1x1x32xf32> to vector<1x32xf32>
    %cst_119 = arith.constant dense<0.000000e+00> : vector<8xf32>
    %232 = vector.multi_reduction <add>, %227, %cst_119 [1] : vector<8x32xf32> to vector<8xf32>
    %233 = vector.shape_cast %232 : vector<8xf32> to vector<8x1xf32>
    %cst_120 = arith.constant 3.200000e+01 : f32
    %234 = vector.broadcast %cst_120 : f32 to vector<8x1xf32>
    %235 = arith.divf %233, %234 : vector<8x1xf32>
    %236 = vector.broadcast %235 : vector<8x1xf32> to vector<8x32xf32>
    %237 = arith.subf %227, %236 : vector<8x32xf32>
    %238 = arith.mulf %237, %237 : vector<8x32xf32>
    %cst_121 = arith.constant dense<0.000000e+00> : vector<8xf32>
    %239 = vector.multi_reduction <add>, %238, %cst_121 [1] : vector<8x32xf32> to vector<8xf32>
    %240 = vector.shape_cast %239 : vector<8xf32> to vector<8x1xf32>
    %cst_122 = arith.constant 3.200000e+01 : f32
    %241 = vector.broadcast %cst_122 : f32 to vector<8x1xf32>
    %242 = arith.divf %240, %241 : vector<8x1xf32>
    %243 = vector.broadcast %235 : vector<8x1xf32> to vector<8x32xf32>
    %244 = arith.subf %227, %243 : vector<8x32xf32>
    %cst_123 = arith.constant 9.99999974E-6 : f32
    %245 = vector.broadcast %cst_123 : f32 to vector<8x1xf32>
    %246 = arith.addf %242, %245 : vector<8x1xf32>
    %247 = math.rsqrt %246 : vector<8x1xf32>
    %248 = vector.broadcast %247 : vector<8x1xf32> to vector<8x32xf32>
    %249 = arith.mulf %244, %248 : vector<8x32xf32>
    %250 = vector.broadcast %229 : vector<1x32xf32> to vector<8x32xf32>
    %251 = arith.mulf %249, %250 : vector<8x32xf32>
    %252 = vector.broadcast %231 : vector<1x32xf32> to vector<8x32xf32>
    %253 = arith.addf %251, %252 : vector<8x32xf32>
    %c0_124 = arith.constant 0 : index
    %c0_125 = arith.constant 0 : index
    %c0_126 = arith.constant 0 : index
    %254 = vector.load %arg23[%c0_124, %c0_125, %c0_126] : memref<2x32x128xf32, #tpu.memory_space<vmem>>, vector<1x32x128xf32>
    %255 = vector.shape_cast %254 : vector<1x32x128xf32> to vector<32x128xf32>
    %c0_127 = arith.constant 0 : index
    %c0_128 = arith.constant 0 : index
    %c0_129 = arith.constant 0 : index
    %256 = vector.load %arg24[%c0_127, %c0_128, %c0_129] : memref<2x1x128xf32, #tpu.memory_space<vmem>>, vector<1x1x128xf32>
    %257 = vector.shape_cast %256 : vector<1x1x128xf32> to vector<1x128xf32>
    %c0_130 = arith.constant 0 : index
    %c0_131 = arith.constant 0 : index
    %c0_132 = arith.constant 0 : index
    %258 = vector.load %arg25[%c0_130, %c0_131, %c0_132] : memref<2x128x32xf32, #tpu.memory_space<vmem>>, vector<1x128x32xf32>
    %259 = vector.shape_cast %258 : vector<1x128x32xf32> to vector<128x32xf32>
    %c0_133 = arith.constant 0 : index
    %c0_134 = arith.constant 0 : index
    %c0_135 = arith.constant 0 : index
    %260 = vector.load %arg26[%c0_133, %c0_134, %c0_135] : memref<2x1x32xf32, #tpu.memory_space<vmem>>, vector<1x1x32xf32>
    %261 = vector.shape_cast %260 : vector<1x1x32xf32> to vector<1x32xf32>
    %cst_136 = arith.constant dense<0.000000e+00> : vector<8x128xf32>
    %262 = tpu.matmul %253, %255, %cst_136 {dimension_numbers = #tpu.dot_dimension_numbers<[1], [0], [0], [1], [0, 0, 1, 1], [], []>} : vector<8x32xf32>, vector<32x128xf32>, vector<8x128xf32> -> vector<8x128xf32>
    %263 = vector.broadcast %257 : vector<1x128xf32> to vector<8x128xf32>
    %264 = arith.addf %262, %263 : vector<8x128xf32>
    %cst_137 = arith.constant 0.000000e+00 : f32
    %265 = vector.broadcast %cst_137 : f32 to vector<8x128xf32>
    %266 = arith.maximumf %264, %265 : vector<8x128xf32>
    %cst_138 = arith.constant dense<0.000000e+00> : vector<8x32xf32>
    %267 = tpu.matmul %266, %259, %cst_138 {dimension_numbers = #tpu.dot_dimension_numbers<[1], [0], [0], [1], [0, 0, 1, 1], [], []>} : vector<8x128xf32>, vector<128x32xf32>, vector<8x32xf32> -> vector<8x32xf32>
    %268 = vector.broadcast %261 : vector<1x32xf32> to vector<8x32xf32>
    %269 = arith.addf %267, %268 : vector<8x32xf32>
    %270 = arith.addf %253, %269 : vector<8x32xf32>
    %c0_139 = arith.constant 0 : index
    %c0_140 = arith.constant 0 : index
    %c0_141 = arith.constant 0 : index
    %271 = vector.load %arg27[%c0_139, %c0_140, %c0_141] : memref<2x1x32xf32, #tpu.memory_space<vmem>>, vector<1x1x32xf32>
    %272 = vector.shape_cast %271 : vector<1x1x32xf32> to vector<1x32xf32>
    %c0_142 = arith.constant 0 : index
    %c0_143 = arith.constant 0 : index
    %c0_144 = arith.constant 0 : index
    %273 = vector.load %arg28[%c0_142, %c0_143, %c0_144] : memref<2x1x32xf32, #tpu.memory_space<vmem>>, vector<1x1x32xf32>
    %274 = vector.shape_cast %273 : vector<1x1x32xf32> to vector<1x32xf32>
    %cst_145 = arith.constant dense<0.000000e+00> : vector<8xf32>
    %275 = vector.multi_reduction <add>, %270, %cst_145 [1] : vector<8x32xf32> to vector<8xf32>
    %276 = vector.shape_cast %275 : vector<8xf32> to vector<8x1xf32>
    %cst_146 = arith.constant 3.200000e+01 : f32
    %277 = vector.broadcast %cst_146 : f32 to vector<8x1xf32>
    %278 = arith.divf %276, %277 : vector<8x1xf32>
    %279 = vector.broadcast %278 : vector<8x1xf32> to vector<8x32xf32>
    %280 = arith.subf %270, %279 : vector<8x32xf32>
    %281 = arith.mulf %280, %280 : vector<8x32xf32>
    %cst_147 = arith.constant dense<0.000000e+00> : vector<8xf32>
    %282 = vector.multi_reduction <add>, %281, %cst_147 [1] : vector<8x32xf32> to vector<8xf32>
    %283 = vector.shape_cast %282 : vector<8xf32> to vector<8x1xf32>
    %cst_148 = arith.constant 3.200000e+01 : f32
    %284 = vector.broadcast %cst_148 : f32 to vector<8x1xf32>
    %285 = arith.divf %283, %284 : vector<8x1xf32>
    %286 = vector.broadcast %278 : vector<8x1xf32> to vector<8x32xf32>
    %287 = arith.subf %270, %286 : vector<8x32xf32>
    %cst_149 = arith.constant 9.99999974E-6 : f32
    %288 = vector.broadcast %cst_149 : f32 to vector<8x1xf32>
    %289 = arith.addf %285, %288 : vector<8x1xf32>
    %290 = math.rsqrt %289 : vector<8x1xf32>
    %291 = vector.broadcast %290 : vector<8x1xf32> to vector<8x32xf32>
    %292 = arith.mulf %287, %291 : vector<8x32xf32>
    %293 = vector.broadcast %272 : vector<1x32xf32> to vector<8x32xf32>
    %294 = arith.mulf %292, %293 : vector<8x32xf32>
    %295 = vector.broadcast %274 : vector<1x32xf32> to vector<8x32xf32>
    %296 = arith.addf %294, %295 : vector<8x32xf32>
    %c1 = arith.constant 1 : index
    %c0_150 = arith.constant 0 : index
    %c0_151 = arith.constant 0 : index
    %297 = vector.load %arg3[%c1, %c0_150, %c0_151] : memref<2x32x32xf32, #tpu.memory_space<vmem>>, vector<1x32x32xf32>
    %298 = vector.shape_cast %297 : vector<1x32x32xf32> to vector<32x32xf32>
    %c1_152 = arith.constant 1 : index
    %c0_153 = arith.constant 0 : index
    %c0_154 = arith.constant 0 : index
    %299 = vector.load %arg4[%c1_152, %c0_153, %c0_154] : memref<2x1x32xf32, #tpu.memory_space<vmem>>, vector<1x1x32xf32>
    %300 = vector.shape_cast %299 : vector<1x1x32xf32> to vector<1x32xf32>
    %c1_155 = arith.constant 1 : index
    %c0_156 = arith.constant 0 : index
    %c0_157 = arith.constant 0 : index
    %301 = vector.load %arg5[%c1_155, %c0_156, %c0_157] : memref<2x32x32xf32, #tpu.memory_space<vmem>>, vector<1x32x32xf32>
    %302 = vector.shape_cast %301 : vector<1x32x32xf32> to vector<32x32xf32>
    %c1_158 = arith.constant 1 : index
    %c0_159 = arith.constant 0 : index
    %c0_160 = arith.constant 0 : index
    %303 = vector.load %arg6[%c1_158, %c0_159, %c0_160] : memref<2x1x32xf32, #tpu.memory_space<vmem>>, vector<1x1x32xf32>
    %304 = vector.shape_cast %303 : vector<1x1x32xf32> to vector<1x32xf32>
    %c1_161 = arith.constant 1 : index
    %c0_162 = arith.constant 0 : index
    %c0_163 = arith.constant 0 : index
    %305 = vector.load %arg7[%c1_161, %c0_162, %c0_163] : memref<2x32x32xf32, #tpu.memory_space<vmem>>, vector<1x32x32xf32>
    %306 = vector.shape_cast %305 : vector<1x32x32xf32> to vector<32x32xf32>
    %c1_164 = arith.constant 1 : index
    %c0_165 = arith.constant 0 : index
    %c0_166 = arith.constant 0 : index
    %307 = vector.load %arg8[%c1_164, %c0_165, %c0_166] : memref<2x1x32xf32, #tpu.memory_space<vmem>>, vector<1x1x32xf32>
    %308 = vector.shape_cast %307 : vector<1x1x32xf32> to vector<1x32xf32>
    %c1_167 = arith.constant 1 : index
    %c0_168 = arith.constant 0 : index
    %c0_169 = arith.constant 0 : index
    %309 = vector.load %arg9[%c1_167, %c0_168, %c0_169] : memref<2x32x32xf32, #tpu.memory_space<vmem>>, vector<1x32x32xf32>
    %310 = vector.shape_cast %309 : vector<1x32x32xf32> to vector<32x32xf32>
    %c1_170 = arith.constant 1 : index
    %c0_171 = arith.constant 0 : index
    %c0_172 = arith.constant 0 : index
    %311 = vector.load %arg10[%c1_170, %c0_171, %c0_172] : memref<2x1x32xf32, #tpu.memory_space<vmem>>, vector<1x1x32xf32>
    %312 = vector.shape_cast %311 : vector<1x1x32xf32> to vector<1x32xf32>
    %cst_173 = arith.constant dense<0.000000e+00> : vector<8x32xf32>
    %313 = tpu.matmul %296, %298, %cst_173 {dimension_numbers = #tpu.dot_dimension_numbers<[1], [0], [0], [1], [0, 0, 1, 1], [], []>} : vector<8x32xf32>, vector<32x32xf32>, vector<8x32xf32> -> vector<8x32xf32>
    %314 = vector.broadcast %300 : vector<1x32xf32> to vector<8x32xf32>
    %315 = arith.addf %313, %314 : vector<8x32xf32>
    %cst_174 = arith.constant dense<0.000000e+00> : vector<8x32xf32>
    %316 = tpu.matmul %296, %302, %cst_174 {dimension_numbers = #tpu.dot_dimension_numbers<[1], [0], [0], [1], [0, 0, 1, 1], [], []>} : vector<8x32xf32>, vector<32x32xf32>, vector<8x32xf32> -> vector<8x32xf32>
    %317 = vector.broadcast %304 : vector<1x32xf32> to vector<8x32xf32>
    %318 = arith.addf %316, %317 : vector<8x32xf32>
    %cst_175 = arith.constant dense<0.000000e+00> : vector<8x32xf32>
    %319 = tpu.matmul %296, %306, %cst_175 {dimension_numbers = #tpu.dot_dimension_numbers<[1], [0], [0], [1], [0, 0, 1, 1], [], []>} : vector<8x32xf32>, vector<32x32xf32>, vector<8x32xf32> -> vector<8x32xf32>
    %320 = vector.broadcast %308 : vector<1x32xf32> to vector<8x32xf32>
    %321 = arith.addf %319, %320 : vector<8x32xf32>
    %322 = tpu.iota {dimensions = array<i32: 0>} : vector<8x8xi32>
    %323 = tpu.iota {dimensions = array<i32: 1>} : vector<8x8xi32>
    %324 = arith.cmpi sge, %322, %323 : vector<8x8xi32>
    %cst_176 = arith.constant 0.000000e+00 : f32
    %cst_177 = arith.constant -1.000000e+30 : f32
    %325 = vector.broadcast %cst_176 : f32 to vector<8x8xf32>
    %326 = vector.broadcast %cst_177 : f32 to vector<8x8xf32>
    %327 = arith.select %324, %325, %326 : vector<8x8xi1>, vector<8x8xf32>
    %328 = vector.extract_strided_slice %315 {offsets = [0, 0], sizes = [8, 8], strides = [1, 1]} : vector<8x32xf32> to vector<8x8xf32>
    %329 = vector.extract_strided_slice %318 {offsets = [0, 0], sizes = [8, 8], strides = [1, 1]} : vector<8x32xf32> to vector<8x8xf32>
    %cst_178 = arith.constant dense<0.000000e+00> : vector<8x8xf32>
    %330 = tpu.matmul %328, %329, %cst_178 {dimension_numbers = #tpu.dot_dimension_numbers<[1], [1], [0], [0], [0, 0, 1, 0], [], []>} : vector<8x8xf32>, vector<8x8xf32>, vector<8x8xf32> -> vector<8x8xf32>
    %cst_179 = arith.constant 0.353553385 : f32
    %331 = vector.broadcast %cst_179 : f32 to vector<8x8xf32>
    %332 = arith.mulf %330, %331 : vector<8x8xf32>
    %333 = arith.addf %332, %327 : vector<8x8xf32>
    %cst_180 = arith.constant dense<0xFF800000> : vector<8xf32>
    %334 = vector.multi_reduction <maximumf>, %333, %cst_180 [1] : vector<8x8xf32> to vector<8xf32>
    %335 = vector.shape_cast %334 : vector<8xf32> to vector<8x1xf32>
    %336 = vector.broadcast %335 : vector<8x1xf32> to vector<8x8xf32>
    %337 = arith.subf %333, %336 : vector<8x8xf32>
    %338 = math.exp %337 : vector<8x8xf32>
    %cst_181 = arith.constant dense<0.000000e+00> : vector<8xf32>
    %339 = vector.multi_reduction <add>, %338, %cst_181 [1] : vector<8x8xf32> to vector<8xf32>
    %340 = vector.shape_cast %339 : vector<8xf32> to vector<8x1xf32>
    %341 = vector.broadcast %340 : vector<8x1xf32> to vector<8x8xf32>
    %342 = arith.divf %338, %341 : vector<8x8xf32>
    %343 = vector.extract_strided_slice %321 {offsets = [0, 0], sizes = [8, 8], strides = [1, 1]} : vector<8x32xf32> to vector<8x8xf32>
    %cst_182 = arith.constant dense<0.000000e+00> : vector<8x8xf32>
    %344 = tpu.matmul %342, %343, %cst_182 {dimension_numbers = #tpu.dot_dimension_numbers<[1], [0], [0], [1], [0, 0, 1, 1], [], []>} : vector<8x8xf32>, vector<8x8xf32>, vector<8x8xf32> -> vector<8x8xf32>
    %345 = vector.extract_strided_slice %315 {offsets = [0, 8], sizes = [8, 8], strides = [1, 1]} : vector<8x32xf32> to vector<8x8xf32>
    %346 = vector.extract_strided_slice %318 {offsets = [0, 8], sizes = [8, 8], strides = [1, 1]} : vector<8x32xf32> to vector<8x8xf32>
    %cst_183 = arith.constant dense<0.000000e+00> : vector<8x8xf32>
    %347 = tpu.matmul %345, %346, %cst_183 {dimension_numbers = #tpu.dot_dimension_numbers<[1], [1], [0], [0], [0, 0, 1, 0], [], []>} : vector<8x8xf32>, vector<8x8xf32>, vector<8x8xf32> -> vector<8x8xf32>
    %cst_184 = arith.constant 0.353553385 : f32
    %348 = vector.broadcast %cst_184 : f32 to vector<8x8xf32>
    %349 = arith.mulf %347, %348 : vector<8x8xf32>
    %350 = arith.addf %349, %327 : vector<8x8xf32>
    %cst_185 = arith.constant dense<0xFF800000> : vector<8xf32>
    %351 = vector.multi_reduction <maximumf>, %350, %cst_185 [1] : vector<8x8xf32> to vector<8xf32>
    %352 = vector.shape_cast %351 : vector<8xf32> to vector<8x1xf32>
    %353 = vector.broadcast %352 : vector<8x1xf32> to vector<8x8xf32>
    %354 = arith.subf %350, %353 : vector<8x8xf32>
    %355 = math.exp %354 : vector<8x8xf32>
    %cst_186 = arith.constant dense<0.000000e+00> : vector<8xf32>
    %356 = vector.multi_reduction <add>, %355, %cst_186 [1] : vector<8x8xf32> to vector<8xf32>
    %357 = vector.shape_cast %356 : vector<8xf32> to vector<8x1xf32>
    %358 = vector.broadcast %357 : vector<8x1xf32> to vector<8x8xf32>
    %359 = arith.divf %355, %358 : vector<8x8xf32>
    %360 = vector.extract_strided_slice %321 {offsets = [0, 8], sizes = [8, 8], strides = [1, 1]} : vector<8x32xf32> to vector<8x8xf32>
    %cst_187 = arith.constant dense<0.000000e+00> : vector<8x8xf32>
    %361 = tpu.matmul %359, %360, %cst_187 {dimension_numbers = #tpu.dot_dimension_numbers<[1], [0], [0], [1], [0, 0, 1, 1], [], []>} : vector<8x8xf32>, vector<8x8xf32>, vector<8x8xf32> -> vector<8x8xf32>
    %362 = vector.extract_strided_slice %315 {offsets = [0, 16], sizes = [8, 8], strides = [1, 1]} : vector<8x32xf32> to vector<8x8xf32>
    %363 = vector.extract_strided_slice %318 {offsets = [0, 16], sizes = [8, 8], strides = [1, 1]} : vector<8x32xf32> to vector<8x8xf32>
    %cst_188 = arith.constant dense<0.000000e+00> : vector<8x8xf32>
    %364 = tpu.matmul %362, %363, %cst_188 {dimension_numbers = #tpu.dot_dimension_numbers<[1], [1], [0], [0], [0, 0, 1, 0], [], []>} : vector<8x8xf32>, vector<8x8xf32>, vector<8x8xf32> -> vector<8x8xf32>
    %cst_189 = arith.constant 0.353553385 : f32
    %365 = vector.broadcast %cst_189 : f32 to vector<8x8xf32>
    %366 = arith.mulf %364, %365 : vector<8x8xf32>
    %367 = arith.addf %366, %327 : vector<8x8xf32>
    %cst_190 = arith.constant dense<0xFF800000> : vector<8xf32>
    %368 = vector.multi_reduction <maximumf>, %367, %cst_190 [1] : vector<8x8xf32> to vector<8xf32>
    %369 = vector.shape_cast %368 : vector<8xf32> to vector<8x1xf32>
    %370 = vector.broadcast %369 : vector<8x1xf32> to vector<8x8xf32>
    %371 = arith.subf %367, %370 : vector<8x8xf32>
    %372 = math.exp %371 : vector<8x8xf32>
    %cst_191 = arith.constant dense<0.000000e+00> : vector<8xf32>
    %373 = vector.multi_reduction <add>, %372, %cst_191 [1] : vector<8x8xf32> to vector<8xf32>
    %374 = vector.shape_cast %373 : vector<8xf32> to vector<8x1xf32>
    %375 = vector.broadcast %374 : vector<8x1xf32> to vector<8x8xf32>
    %376 = arith.divf %372, %375 : vector<8x8xf32>
    %377 = vector.extract_strided_slice %321 {offsets = [0, 16], sizes = [8, 8], strides = [1, 1]} : vector<8x32xf32> to vector<8x8xf32>
    %cst_192 = arith.constant dense<0.000000e+00> : vector<8x8xf32>
    %378 = tpu.matmul %376, %377, %cst_192 {dimension_numbers = #tpu.dot_dimension_numbers<[1], [0], [0], [1], [0, 0, 1, 1], [], []>} : vector<8x8xf32>, vector<8x8xf32>, vector<8x8xf32> -> vector<8x8xf32>
    %379 = vector.extract_strided_slice %315 {offsets = [0, 24], sizes = [8, 8], strides = [1, 1]} : vector<8x32xf32> to vector<8x8xf32>
    %380 = vector.extract_strided_slice %318 {offsets = [0, 24], sizes = [8, 8], strides = [1, 1]} : vector<8x32xf32> to vector<8x8xf32>
    %cst_193 = arith.constant dense<0.000000e+00> : vector<8x8xf32>
    %381 = tpu.matmul %379, %380, %cst_193 {dimension_numbers = #tpu.dot_dimension_numbers<[1], [1], [0], [0], [0, 0, 1, 0], [], []>} : vector<8x8xf32>, vector<8x8xf32>, vector<8x8xf32> -> vector<8x8xf32>
    %cst_194 = arith.constant 0.353553385 : f32
    %382 = vector.broadcast %cst_194 : f32 to vector<8x8xf32>
    %383 = arith.mulf %381, %382 : vector<8x8xf32>
    %384 = arith.addf %383, %327 : vector<8x8xf32>
    %cst_195 = arith.constant dense<0xFF800000> : vector<8xf32>
    %385 = vector.multi_reduction <maximumf>, %384, %cst_195 [1] : vector<8x8xf32> to vector<8xf32>
    %386 = vector.shape_cast %385 : vector<8xf32> to vector<8x1xf32>
    %387 = vector.broadcast %386 : vector<8x1xf32> to vector<8x8xf32>
    %388 = arith.subf %384, %387 : vector<8x8xf32>
    %389 = math.exp %388 : vector<8x8xf32>
    %cst_196 = arith.constant dense<0.000000e+00> : vector<8xf32>
    %390 = vector.multi_reduction <add>, %389, %cst_196 [1] : vector<8x8xf32> to vector<8xf32>
    %391 = vector.shape_cast %390 : vector<8xf32> to vector<8x1xf32>
    %392 = vector.broadcast %391 : vector<8x1xf32> to vector<8x8xf32>
    %393 = arith.divf %389, %392 : vector<8x8xf32>
    %394 = vector.extract_strided_slice %321 {offsets = [0, 24], sizes = [8, 8], strides = [1, 1]} : vector<8x32xf32> to vector<8x8xf32>
    %cst_197 = arith.constant dense<0.000000e+00> : vector<8x8xf32>
    %395 = tpu.matmul %393, %394, %cst_197 {dimension_numbers = #tpu.dot_dimension_numbers<[1], [0], [0], [1], [0, 0, 1, 1], [], []>} : vector<8x8xf32>, vector<8x8xf32>, vector<8x8xf32> -> vector<8x8xf32>
    %396 = tpu.concatenate %344, %361, %378, %395 in 1 : vector<8x8xf32>, vector<8x8xf32>, vector<8x8xf32>, vector<8x8xf32> -> vector<8x32xf32>
    %cst_198 = arith.constant dense<0.000000e+00> : vector<8x32xf32>
    %397 = tpu.matmul %396, %310, %cst_198 {dimension_numbers = #tpu.dot_dimension_numbers<[1], [0], [0], [1], [0, 0, 1, 1], [], []>} : vector<8x32xf32>, vector<32x32xf32>, vector<8x32xf32> -> vector<8x32xf32>
    %398 = vector.broadcast %312 : vector<1x32xf32> to vector<8x32xf32>
    %399 = arith.addf %397, %398 : vector<8x32xf32>
    %400 = arith.addf %296, %399 : vector<8x32xf32>
    %c1_199 = arith.constant 1 : index
    %c0_200 = arith.constant 0 : index
    %c0_201 = arith.constant 0 : index
    %401 = vector.load %arg11[%c1_199, %c0_200, %c0_201] : memref<2x1x32xf32, #tpu.memory_space<vmem>>, vector<1x1x32xf32>
    %402 = vector.shape_cast %401 : vector<1x1x32xf32> to vector<1x32xf32>
    %c1_202 = arith.constant 1 : index
    %c0_203 = arith.constant 0 : index
    %c0_204 = arith.constant 0 : index
    %403 = vector.load %arg12[%c1_202, %c0_203, %c0_204] : memref<2x1x32xf32, #tpu.memory_space<vmem>>, vector<1x1x32xf32>
    %404 = vector.shape_cast %403 : vector<1x1x32xf32> to vector<1x32xf32>
    %cst_205 = arith.constant dense<0.000000e+00> : vector<8xf32>
    %405 = vector.multi_reduction <add>, %400, %cst_205 [1] : vector<8x32xf32> to vector<8xf32>
    %406 = vector.shape_cast %405 : vector<8xf32> to vector<8x1xf32>
    %cst_206 = arith.constant 3.200000e+01 : f32
    %407 = vector.broadcast %cst_206 : f32 to vector<8x1xf32>
    %408 = arith.divf %406, %407 : vector<8x1xf32>
    %409 = vector.broadcast %408 : vector<8x1xf32> to vector<8x32xf32>
    %410 = arith.subf %400, %409 : vector<8x32xf32>
    %411 = arith.mulf %410, %410 : vector<8x32xf32>
    %cst_207 = arith.constant dense<0.000000e+00> : vector<8xf32>
    %412 = vector.multi_reduction <add>, %411, %cst_207 [1] : vector<8x32xf32> to vector<8xf32>
    %413 = vector.shape_cast %412 : vector<8xf32> to vector<8x1xf32>
    %cst_208 = arith.constant 3.200000e+01 : f32
    %414 = vector.broadcast %cst_208 : f32 to vector<8x1xf32>
    %415 = arith.divf %413, %414 : vector<8x1xf32>
    %416 = vector.broadcast %408 : vector<8x1xf32> to vector<8x32xf32>
    %417 = arith.subf %400, %416 : vector<8x32xf32>
    %cst_209 = arith.constant 9.99999974E-6 : f32
    %418 = vector.broadcast %cst_209 : f32 to vector<8x1xf32>
    %419 = arith.addf %415, %418 : vector<8x1xf32>
    %420 = math.rsqrt %419 : vector<8x1xf32>
    %421 = vector.broadcast %420 : vector<8x1xf32> to vector<8x32xf32>
    %422 = arith.mulf %417, %421 : vector<8x32xf32>
    %423 = vector.broadcast %402 : vector<1x32xf32> to vector<8x32xf32>
    %424 = arith.mulf %422, %423 : vector<8x32xf32>
    %425 = vector.broadcast %404 : vector<1x32xf32> to vector<8x32xf32>
    %426 = arith.addf %424, %425 : vector<8x32xf32>
    %c1_210 = arith.constant 1 : index
    %c0_211 = arith.constant 0 : index
    %c0_212 = arith.constant 0 : index
    %427 = vector.load %arg13[%c1_210, %c0_211, %c0_212] : memref<2x32x32xf32, #tpu.memory_space<vmem>>, vector<1x32x32xf32>
    %428 = vector.shape_cast %427 : vector<1x32x32xf32> to vector<32x32xf32>
    %c1_213 = arith.constant 1 : index
    %c0_214 = arith.constant 0 : index
    %c0_215 = arith.constant 0 : index
    %429 = vector.load %arg14[%c1_213, %c0_214, %c0_215] : memref<2x1x32xf32, #tpu.memory_space<vmem>>, vector<1x1x32xf32>
    %430 = vector.shape_cast %429 : vector<1x1x32xf32> to vector<1x32xf32>
    %c1_216 = arith.constant 1 : index
    %c0_217 = arith.constant 0 : index
    %c0_218 = arith.constant 0 : index
    %431 = vector.load %arg15[%c1_216, %c0_217, %c0_218] : memref<2x32x32xf32, #tpu.memory_space<vmem>>, vector<1x32x32xf32>
    %432 = vector.shape_cast %431 : vector<1x32x32xf32> to vector<32x32xf32>
    %c1_219 = arith.constant 1 : index
    %c0_220 = arith.constant 0 : index
    %c0_221 = arith.constant 0 : index
    %433 = vector.load %arg16[%c1_219, %c0_220, %c0_221] : memref<2x1x32xf32, #tpu.memory_space<vmem>>, vector<1x1x32xf32>
    %434 = vector.shape_cast %433 : vector<1x1x32xf32> to vector<1x32xf32>
    %c1_222 = arith.constant 1 : index
    %c0_223 = arith.constant 0 : index
    %c0_224 = arith.constant 0 : index
    %435 = vector.load %arg17[%c1_222, %c0_223, %c0_224] : memref<2x32x32xf32, #tpu.memory_space<vmem>>, vector<1x32x32xf32>
    %436 = vector.shape_cast %435 : vector<1x32x32xf32> to vector<32x32xf32>
    %c1_225 = arith.constant 1 : index
    %c0_226 = arith.constant 0 : index
    %c0_227 = arith.constant 0 : index
    %437 = vector.load %arg18[%c1_225, %c0_226, %c0_227] : memref<2x1x32xf32, #tpu.memory_space<vmem>>, vector<1x1x32xf32>
    %438 = vector.shape_cast %437 : vector<1x1x32xf32> to vector<1x32xf32>
    %c1_228 = arith.constant 1 : index
    %c0_229 = arith.constant 0 : index
    %c0_230 = arith.constant 0 : index
    %439 = vector.load %arg19[%c1_228, %c0_229, %c0_230] : memref<2x32x32xf32, #tpu.memory_space<vmem>>, vector<1x32x32xf32>
    %440 = vector.shape_cast %439 : vector<1x32x32xf32> to vector<32x32xf32>
    %c1_231 = arith.constant 1 : index
    %c0_232 = arith.constant 0 : index
    %c0_233 = arith.constant 0 : index
    %441 = vector.load %arg20[%c1_231, %c0_232, %c0_233] : memref<2x1x32xf32, #tpu.memory_space<vmem>>, vector<1x1x32xf32>
    %442 = vector.shape_cast %441 : vector<1x1x32xf32> to vector<1x32xf32>
    %cst_234 = arith.constant dense<0.000000e+00> : vector<8x32xf32>
    %443 = tpu.matmul %426, %428, %cst_234 {dimension_numbers = #tpu.dot_dimension_numbers<[1], [0], [0], [1], [0, 0, 1, 1], [], []>} : vector<8x32xf32>, vector<32x32xf32>, vector<8x32xf32> -> vector<8x32xf32>
    %444 = vector.broadcast %430 : vector<1x32xf32> to vector<8x32xf32>
    %445 = arith.addf %443, %444 : vector<8x32xf32>
    %cst_235 = arith.constant dense<0.000000e+00> : vector<4x32xf32>
    %446 = tpu.matmul %3, %432, %cst_235 {dimension_numbers = #tpu.dot_dimension_numbers<[1], [0], [0], [1], [0, 0, 1, 1], [], []>} : vector<4x32xf32>, vector<32x32xf32>, vector<4x32xf32> -> vector<4x32xf32>
    %447 = vector.broadcast %434 : vector<1x32xf32> to vector<4x32xf32>
    %448 = arith.addf %446, %447 : vector<4x32xf32>
    %cst_236 = arith.constant dense<0.000000e+00> : vector<4x32xf32>
    %449 = tpu.matmul %3, %436, %cst_236 {dimension_numbers = #tpu.dot_dimension_numbers<[1], [0], [0], [1], [0, 0, 1, 1], [], []>} : vector<4x32xf32>, vector<32x32xf32>, vector<4x32xf32> -> vector<4x32xf32>
    %450 = vector.broadcast %438 : vector<1x32xf32> to vector<4x32xf32>
    %451 = arith.addf %449, %450 : vector<4x32xf32>
    %452 = vector.extract_strided_slice %445 {offsets = [0, 0], sizes = [8, 8], strides = [1, 1]} : vector<8x32xf32> to vector<8x8xf32>
    %453 = vector.extract_strided_slice %448 {offsets = [0, 0], sizes = [4, 8], strides = [1, 1]} : vector<4x32xf32> to vector<4x8xf32>
    %cst_237 = arith.constant dense<0.000000e+00> : vector<8x4xf32>
    %454 = tpu.matmul %452, %453, %cst_237 {dimension_numbers = #tpu.dot_dimension_numbers<[1], [1], [0], [0], [0, 0, 1, 0], [], []>} : vector<8x8xf32>, vector<4x8xf32>, vector<8x4xf32> -> vector<8x4xf32>
    %cst_238 = arith.constant 0.353553385 : f32
    %455 = vector.broadcast %cst_238 : f32 to vector<8x4xf32>
    %456 = arith.mulf %454, %455 : vector<8x4xf32>
    %cst_239 = arith.constant dense<0xFF800000> : vector<8xf32>
    %457 = vector.multi_reduction <maximumf>, %456, %cst_239 [1] : vector<8x4xf32> to vector<8xf32>
    %458 = vector.shape_cast %457 : vector<8xf32> to vector<8x1xf32>
    %459 = vector.broadcast %458 : vector<8x1xf32> to vector<8x4xf32>
    %460 = arith.subf %456, %459 : vector<8x4xf32>
    %461 = math.exp %460 : vector<8x4xf32>
    %cst_240 = arith.constant dense<0.000000e+00> : vector<8xf32>
    %462 = vector.multi_reduction <add>, %461, %cst_240 [1] : vector<8x4xf32> to vector<8xf32>
    %463 = vector.shape_cast %462 : vector<8xf32> to vector<8x1xf32>
    %464 = vector.broadcast %463 : vector<8x1xf32> to vector<8x4xf32>
    %465 = arith.divf %461, %464 : vector<8x4xf32>
    %466 = vector.extract_strided_slice %451 {offsets = [0, 0], sizes = [4, 8], strides = [1, 1]} : vector<4x32xf32> to vector<4x8xf32>
    %cst_241 = arith.constant dense<0.000000e+00> : vector<8x8xf32>
    %467 = tpu.matmul %465, %466, %cst_241 {dimension_numbers = #tpu.dot_dimension_numbers<[1], [0], [0], [1], [0, 0, 1, 1], [], []>} : vector<8x4xf32>, vector<4x8xf32>, vector<8x8xf32> -> vector<8x8xf32>
    %468 = vector.extract_strided_slice %445 {offsets = [0, 8], sizes = [8, 8], strides = [1, 1]} : vector<8x32xf32> to vector<8x8xf32>
    %469 = vector.extract_strided_slice %448 {offsets = [0, 8], sizes = [4, 8], strides = [1, 1]} : vector<4x32xf32> to vector<4x8xf32>
    %cst_242 = arith.constant dense<0.000000e+00> : vector<8x4xf32>
    %470 = tpu.matmul %468, %469, %cst_242 {dimension_numbers = #tpu.dot_dimension_numbers<[1], [1], [0], [0], [0, 0, 1, 0], [], []>} : vector<8x8xf32>, vector<4x8xf32>, vector<8x4xf32> -> vector<8x4xf32>
    %cst_243 = arith.constant 0.353553385 : f32
    %471 = vector.broadcast %cst_243 : f32 to vector<8x4xf32>
    %472 = arith.mulf %470, %471 : vector<8x4xf32>
    %cst_244 = arith.constant dense<0xFF800000> : vector<8xf32>
    %473 = vector.multi_reduction <maximumf>, %472, %cst_244 [1] : vector<8x4xf32> to vector<8xf32>
    %474 = vector.shape_cast %473 : vector<8xf32> to vector<8x1xf32>
    %475 = vector.broadcast %474 : vector<8x1xf32> to vector<8x4xf32>
    %476 = arith.subf %472, %475 : vector<8x4xf32>
    %477 = math.exp %476 : vector<8x4xf32>
    %cst_245 = arith.constant dense<0.000000e+00> : vector<8xf32>
    %478 = vector.multi_reduction <add>, %477, %cst_245 [1] : vector<8x4xf32> to vector<8xf32>
    %479 = vector.shape_cast %478 : vector<8xf32> to vector<8x1xf32>
    %480 = vector.broadcast %479 : vector<8x1xf32> to vector<8x4xf32>
    %481 = arith.divf %477, %480 : vector<8x4xf32>
    %482 = vector.extract_strided_slice %451 {offsets = [0, 8], sizes = [4, 8], strides = [1, 1]} : vector<4x32xf32> to vector<4x8xf32>
    %cst_246 = arith.constant dense<0.000000e+00> : vector<8x8xf32>
    %483 = tpu.matmul %481, %482, %cst_246 {dimension_numbers = #tpu.dot_dimension_numbers<[1], [0], [0], [1], [0, 0, 1, 1], [], []>} : vector<8x4xf32>, vector<4x8xf32>, vector<8x8xf32> -> vector<8x8xf32>
    %484 = vector.extract_strided_slice %445 {offsets = [0, 16], sizes = [8, 8], strides = [1, 1]} : vector<8x32xf32> to vector<8x8xf32>
    %485 = vector.extract_strided_slice %448 {offsets = [0, 16], sizes = [4, 8], strides = [1, 1]} : vector<4x32xf32> to vector<4x8xf32>
    %cst_247 = arith.constant dense<0.000000e+00> : vector<8x4xf32>
    %486 = tpu.matmul %484, %485, %cst_247 {dimension_numbers = #tpu.dot_dimension_numbers<[1], [1], [0], [0], [0, 0, 1, 0], [], []>} : vector<8x8xf32>, vector<4x8xf32>, vector<8x4xf32> -> vector<8x4xf32>
    %cst_248 = arith.constant 0.353553385 : f32
    %487 = vector.broadcast %cst_248 : f32 to vector<8x4xf32>
    %488 = arith.mulf %486, %487 : vector<8x4xf32>
    %cst_249 = arith.constant dense<0xFF800000> : vector<8xf32>
    %489 = vector.multi_reduction <maximumf>, %488, %cst_249 [1] : vector<8x4xf32> to vector<8xf32>
    %490 = vector.shape_cast %489 : vector<8xf32> to vector<8x1xf32>
    %491 = vector.broadcast %490 : vector<8x1xf32> to vector<8x4xf32>
    %492 = arith.subf %488, %491 : vector<8x4xf32>
    %493 = math.exp %492 : vector<8x4xf32>
    %cst_250 = arith.constant dense<0.000000e+00> : vector<8xf32>
    %494 = vector.multi_reduction <add>, %493, %cst_250 [1] : vector<8x4xf32> to vector<8xf32>
    %495 = vector.shape_cast %494 : vector<8xf32> to vector<8x1xf32>
    %496 = vector.broadcast %495 : vector<8x1xf32> to vector<8x4xf32>
    %497 = arith.divf %493, %496 : vector<8x4xf32>
    %498 = vector.extract_strided_slice %451 {offsets = [0, 16], sizes = [4, 8], strides = [1, 1]} : vector<4x32xf32> to vector<4x8xf32>
    %cst_251 = arith.constant dense<0.000000e+00> : vector<8x8xf32>
    %499 = tpu.matmul %497, %498, %cst_251 {dimension_numbers = #tpu.dot_dimension_numbers<[1], [0], [0], [1], [0, 0, 1, 1], [], []>} : vector<8x4xf32>, vector<4x8xf32>, vector<8x8xf32> -> vector<8x8xf32>
    %500 = vector.extract_strided_slice %445 {offsets = [0, 24], sizes = [8, 8], strides = [1, 1]} : vector<8x32xf32> to vector<8x8xf32>
    %501 = vector.extract_strided_slice %448 {offsets = [0, 24], sizes = [4, 8], strides = [1, 1]} : vector<4x32xf32> to vector<4x8xf32>
    %cst_252 = arith.constant dense<0.000000e+00> : vector<8x4xf32>
    %502 = tpu.matmul %500, %501, %cst_252 {dimension_numbers = #tpu.dot_dimension_numbers<[1], [1], [0], [0], [0, 0, 1, 0], [], []>} : vector<8x8xf32>, vector<4x8xf32>, vector<8x4xf32> -> vector<8x4xf32>
    %cst_253 = arith.constant 0.353553385 : f32
    %503 = vector.broadcast %cst_253 : f32 to vector<8x4xf32>
    %504 = arith.mulf %502, %503 : vector<8x4xf32>
    %cst_254 = arith.constant dense<0xFF800000> : vector<8xf32>
    %505 = vector.multi_reduction <maximumf>, %504, %cst_254 [1] : vector<8x4xf32> to vector<8xf32>
    %506 = vector.shape_cast %505 : vector<8xf32> to vector<8x1xf32>
    %507 = vector.broadcast %506 : vector<8x1xf32> to vector<8x4xf32>
    %508 = arith.subf %504, %507 : vector<8x4xf32>
    %509 = math.exp %508 : vector<8x4xf32>
    %cst_255 = arith.constant dense<0.000000e+00> : vector<8xf32>
    %510 = vector.multi_reduction <add>, %509, %cst_255 [1] : vector<8x4xf32> to vector<8xf32>
    %511 = vector.shape_cast %510 : vector<8xf32> to vector<8x1xf32>
    %512 = vector.broadcast %511 : vector<8x1xf32> to vector<8x4xf32>
    %513 = arith.divf %509, %512 : vector<8x4xf32>
    %514 = vector.extract_strided_slice %451 {offsets = [0, 24], sizes = [4, 8], strides = [1, 1]} : vector<4x32xf32> to vector<4x8xf32>
    %cst_256 = arith.constant dense<0.000000e+00> : vector<8x8xf32>
    %515 = tpu.matmul %513, %514, %cst_256 {dimension_numbers = #tpu.dot_dimension_numbers<[1], [0], [0], [1], [0, 0, 1, 1], [], []>} : vector<8x4xf32>, vector<4x8xf32>, vector<8x8xf32> -> vector<8x8xf32>
    %516 = tpu.concatenate %467, %483, %499, %515 in 1 : vector<8x8xf32>, vector<8x8xf32>, vector<8x8xf32>, vector<8x8xf32> -> vector<8x32xf32>
    %cst_257 = arith.constant dense<0.000000e+00> : vector<8x32xf32>
    %517 = tpu.matmul %516, %440, %cst_257 {dimension_numbers = #tpu.dot_dimension_numbers<[1], [0], [0], [1], [0, 0, 1, 1], [], []>} : vector<8x32xf32>, vector<32x32xf32>, vector<8x32xf32> -> vector<8x32xf32>
    %518 = vector.broadcast %442 : vector<1x32xf32> to vector<8x32xf32>
    %519 = arith.addf %517, %518 : vector<8x32xf32>
    %520 = arith.addf %426, %519 : vector<8x32xf32>
    %c1_258 = arith.constant 1 : index
    %c0_259 = arith.constant 0 : index
    %c0_260 = arith.constant 0 : index
    %521 = vector.load %arg21[%c1_258, %c0_259, %c0_260] : memref<2x1x32xf32, #tpu.memory_space<vmem>>, vector<1x1x32xf32>
    %522 = vector.shape_cast %521 : vector<1x1x32xf32> to vector<1x32xf32>
    %c1_261 = arith.constant 1 : index
    %c0_262 = arith.constant 0 : index
    %c0_263 = arith.constant 0 : index
    %523 = vector.load %arg22[%c1_261, %c0_262, %c0_263] : memref<2x1x32xf32, #tpu.memory_space<vmem>>, vector<1x1x32xf32>
    %524 = vector.shape_cast %523 : vector<1x1x32xf32> to vector<1x32xf32>
    %cst_264 = arith.constant dense<0.000000e+00> : vector<8xf32>
    %525 = vector.multi_reduction <add>, %520, %cst_264 [1] : vector<8x32xf32> to vector<8xf32>
    %526 = vector.shape_cast %525 : vector<8xf32> to vector<8x1xf32>
    %cst_265 = arith.constant 3.200000e+01 : f32
    %527 = vector.broadcast %cst_265 : f32 to vector<8x1xf32>
    %528 = arith.divf %526, %527 : vector<8x1xf32>
    %529 = vector.broadcast %528 : vector<8x1xf32> to vector<8x32xf32>
    %530 = arith.subf %520, %529 : vector<8x32xf32>
    %531 = arith.mulf %530, %530 : vector<8x32xf32>
    %cst_266 = arith.constant dense<0.000000e+00> : vector<8xf32>
    %532 = vector.multi_reduction <add>, %531, %cst_266 [1] : vector<8x32xf32> to vector<8xf32>
    %533 = vector.shape_cast %532 : vector<8xf32> to vector<8x1xf32>
    %cst_267 = arith.constant 3.200000e+01 : f32
    %534 = vector.broadcast %cst_267 : f32 to vector<8x1xf32>
    %535 = arith.divf %533, %534 : vector<8x1xf32>
    %536 = vector.broadcast %528 : vector<8x1xf32> to vector<8x32xf32>
    %537 = arith.subf %520, %536 : vector<8x32xf32>
    %cst_268 = arith.constant 9.99999974E-6 : f32
    %538 = vector.broadcast %cst_268 : f32 to vector<8x1xf32>
    %539 = arith.addf %535, %538 : vector<8x1xf32>
    %540 = math.rsqrt %539 : vector<8x1xf32>
    %541 = vector.broadcast %540 : vector<8x1xf32> to vector<8x32xf32>
    %542 = arith.mulf %537, %541 : vector<8x32xf32>
    %543 = vector.broadcast %522 : vector<1x32xf32> to vector<8x32xf32>
    %544 = arith.mulf %542, %543 : vector<8x32xf32>
    %545 = vector.broadcast %524 : vector<1x32xf32> to vector<8x32xf32>
    %546 = arith.addf %544, %545 : vector<8x32xf32>
    %c1_269 = arith.constant 1 : index
    %c0_270 = arith.constant 0 : index
    %c0_271 = arith.constant 0 : index
    %547 = vector.load %arg23[%c1_269, %c0_270, %c0_271] : memref<2x32x128xf32, #tpu.memory_space<vmem>>, vector<1x32x128xf32>
    %548 = vector.shape_cast %547 : vector<1x32x128xf32> to vector<32x128xf32>
    %c1_272 = arith.constant 1 : index
    %c0_273 = arith.constant 0 : index
    %c0_274 = arith.constant 0 : index
    %549 = vector.load %arg24[%c1_272, %c0_273, %c0_274] : memref<2x1x128xf32, #tpu.memory_space<vmem>>, vector<1x1x128xf32>
    %550 = vector.shape_cast %549 : vector<1x1x128xf32> to vector<1x128xf32>
    %c1_275 = arith.constant 1 : index
    %c0_276 = arith.constant 0 : index
    %c0_277 = arith.constant 0 : index
    %551 = vector.load %arg25[%c1_275, %c0_276, %c0_277] : memref<2x128x32xf32, #tpu.memory_space<vmem>>, vector<1x128x32xf32>
    %552 = vector.shape_cast %551 : vector<1x128x32xf32> to vector<128x32xf32>
    %c1_278 = arith.constant 1 : index
    %c0_279 = arith.constant 0 : index
    %c0_280 = arith.constant 0 : index
    %553 = vector.load %arg26[%c1_278, %c0_279, %c0_280] : memref<2x1x32xf32, #tpu.memory_space<vmem>>, vector<1x1x32xf32>
    %554 = vector.shape_cast %553 : vector<1x1x32xf32> to vector<1x32xf32>
    %cst_281 = arith.constant dense<0.000000e+00> : vector<8x128xf32>
    %555 = tpu.matmul %546, %548, %cst_281 {dimension_numbers = #tpu.dot_dimension_numbers<[1], [0], [0], [1], [0, 0, 1, 1], [], []>} : vector<8x32xf32>, vector<32x128xf32>, vector<8x128xf32> -> vector<8x128xf32>
    %556 = vector.broadcast %550 : vector<1x128xf32> to vector<8x128xf32>
    %557 = arith.addf %555, %556 : vector<8x128xf32>
    %cst_282 = arith.constant 0.000000e+00 : f32
    %558 = vector.broadcast %cst_282 : f32 to vector<8x128xf32>
    %559 = arith.maximumf %557, %558 : vector<8x128xf32>
    %cst_283 = arith.constant dense<0.000000e+00> : vector<8x32xf32>
    %560 = tpu.matmul %559, %552, %cst_283 {dimension_numbers = #tpu.dot_dimension_numbers<[1], [0], [0], [1], [0, 0, 1, 1], [], []>} : vector<8x128xf32>, vector<128x32xf32>, vector<8x32xf32> -> vector<8x32xf32>
    %561 = vector.broadcast %554 : vector<1x32xf32> to vector<8x32xf32>
    %562 = arith.addf %560, %561 : vector<8x32xf32>
    %563 = arith.addf %546, %562 : vector<8x32xf32>
    %c1_284 = arith.constant 1 : index
    %c0_285 = arith.constant 0 : index
    %c0_286 = arith.constant 0 : index
    %564 = vector.load %arg27[%c1_284, %c0_285, %c0_286] : memref<2x1x32xf32, #tpu.memory_space<vmem>>, vector<1x1x32xf32>
    %565 = vector.shape_cast %564 : vector<1x1x32xf32> to vector<1x32xf32>
    %c1_287 = arith.constant 1 : index
    %c0_288 = arith.constant 0 : index
    %c0_289 = arith.constant 0 : index
    %566 = vector.load %arg28[%c1_287, %c0_288, %c0_289] : memref<2x1x32xf32, #tpu.memory_space<vmem>>, vector<1x1x32xf32>
    %567 = vector.shape_cast %566 : vector<1x1x32xf32> to vector<1x32xf32>
    %cst_290 = arith.constant dense<0.000000e+00> : vector<8xf32>
    %568 = vector.multi_reduction <add>, %563, %cst_290 [1] : vector<8x32xf32> to vector<8xf32>
    %569 = vector.shape_cast %568 : vector<8xf32> to vector<8x1xf32>
    %cst_291 = arith.constant 3.200000e+01 : f32
    %570 = vector.broadcast %cst_291 : f32 to vector<8x1xf32>
    %571 = arith.divf %569, %570 : vector<8x1xf32>
    %572 = vector.broadcast %571 : vector<8x1xf32> to vector<8x32xf32>
    %573 = arith.subf %563, %572 : vector<8x32xf32>
    %574 = arith.mulf %573, %573 : vector<8x32xf32>
    %cst_292 = arith.constant dense<0.000000e+00> : vector<8xf32>
    %575 = vector.multi_reduction <add>, %574, %cst_292 [1] : vector<8x32xf32> to vector<8xf32>
    %576 = vector.shape_cast %575 : vector<8xf32> to vector<8x1xf32>
    %cst_293 = arith.constant 3.200000e+01 : f32
    %577 = vector.broadcast %cst_293 : f32 to vector<8x1xf32>
    %578 = arith.divf %576, %577 : vector<8x1xf32>
    %579 = vector.broadcast %571 : vector<8x1xf32> to vector<8x32xf32>
    %580 = arith.subf %563, %579 : vector<8x32xf32>
    %cst_294 = arith.constant 9.99999974E-6 : f32
    %581 = vector.broadcast %cst_294 : f32 to vector<8x1xf32>
    %582 = arith.addf %578, %581 : vector<8x1xf32>
    %583 = math.rsqrt %582 : vector<8x1xf32>
    %584 = vector.broadcast %583 : vector<8x1xf32> to vector<8x32xf32>
    %585 = arith.mulf %580, %584 : vector<8x32xf32>
    %586 = vector.broadcast %565 : vector<1x32xf32> to vector<8x32xf32>
    %587 = arith.mulf %585, %586 : vector<8x32xf32>
    %588 = vector.broadcast %567 : vector<1x32xf32> to vector<8x32xf32>
    %589 = arith.addf %587, %588 : vector<8x32xf32>
    %c0_295 = arith.constant 0 : index
    %c0_296 = arith.constant 0 : index
    %590 = vector.load %arg29[%c0_295, %c0_296] : memref<32x128xf32, #tpu.memory_space<vmem>>, vector<32x128xf32>
    %cst_297 = arith.constant dense<0.000000e+00> : vector<8x128xf32>
    %591 = tpu.matmul %589, %590, %cst_297 {dimension_numbers = #tpu.dot_dimension_numbers<[1], [0], [0], [1], [0, 0, 1, 1], [], []>} : vector<8x32xf32>, vector<32x128xf32>, vector<8x128xf32> -> vector<8x128xf32>
    %c0_298 = arith.constant 0 : index
    %c0_299 = arith.constant 0 : index
    %592 = vector.load %arg30[%c0_298, %c0_299] : memref<1x128xf32, #tpu.memory_space<vmem>>, vector<1x128xf32>
    %593 = vector.broadcast %592 : vector<1x128xf32> to vector<8x128xf32>
    %594 = arith.addf %591, %593 : vector<8x128xf32>
    %c0_300 = arith.constant 0 : index
    %c0_301 = arith.constant 0 : index
    %c0_302 = arith.constant 0 : index
    %595 = vector.load %arg31[%c0_300, %c0_301, %c0_302] : memref<1x8x128xf32, #tpu.memory_space<vmem>>, vector<1x8x128xf32>
    %596 = vector.shape_cast %595 : vector<1x8x128xf32> to vector<8x128xf32>
    %597 = vector.shape_cast %594 : vector<8x128xf32> to vector<1x8x128xf32>
    tpu.vector_store %arg31[%c0_300, %c0_301, %c0_302], %597 {strides = array<i32>} : memref<1x8x128xf32, #tpu.memory_space<vmem>>, vector<1x8x128xf32>,
    return
  }
  func.func @transform_0(%arg0: i32) -> (i32, i32, i32) {
    %c0_i32 = arith.constant 0 : i32
    %c0_i32_0 = arith.constant 0 : i32
    %c0_i32_1 = arith.constant 0 : i32
    return %arg0, %c0_i32, %c0_i32_0 : i32, i32, i32
  }
  func.func @transform_1(%arg0: i32) -> (i32, i32, i32) {
    %c0_i32 = arith.constant 0 : i32
    %c0_i32_0 = arith.constant 0 : i32
    %c0_i32_1 = arith.constant 0 : i32
    return %arg0, %c0_i32, %c0_i32_0 : i32, i32, i32
  }
  func.func @transform_2(%arg0: i32) -> (i32, i32, i32) {
    %c0_i32 = arith.constant 0 : i32
    %c0_i32_0 = arith.constant 0 : i32
    %c0_i32_1 = arith.constant 0 : i32
    %c0_i32_2 = arith.constant 0 : i32
    return %c0_i32, %c0_i32_0, %c0_i32_1 : i32, i32, i32
  }
  func.func @transform_3(%arg0: i32) -> (i32, i32, i32) {
    %c0_i32 = arith.constant 0 : i32
    %c0_i32_0 = arith.constant 0 : i32
    %c0_i32_1 = arith.constant 0 : i32
    %c0_i32_2 = arith.constant 0 : i32
    return %c0_i32, %c0_i32_0, %c0_i32_1 : i32, i32, i32
  }
  func.func @transform_4(%arg0: i32) -> (i32, i32, i32) {
    %c0_i32 = arith.constant 0 : i32
    %c0_i32_0 = arith.constant 0 : i32
    %c0_i32_1 = arith.constant 0 : i32
    %c0_i32_2 = arith.constant 0 : i32
    return %c0_i32, %c0_i32_0, %c0_i32_1 : i32, i32, i32
  }
  func.func @transform_5(%arg0: i32) -> (i32, i32, i32) {
    %c0_i32 = arith.constant 0 : i32
    %c0_i32_0 = arith.constant 0 : i32
    %c0_i32_1 = arith.constant 0 : i32
    %c0_i32_2 = arith.constant 0 : i32
    return %c0_i32, %c0_i32_0, %c0_i32_1 : i32, i32, i32
  }
  func.func @transform_6(%arg0: i32) -> (i32, i32, i32) {
    %c0_i32 = arith.constant 0 : i32
    %c0_i32_0 = arith.constant 0 : i32
    %c0_i32_1 = arith.constant 0 : i32
    %c0_i32_2 = arith.constant 0 : i32
    return %c0_i32, %c0_i32_0, %c0_i32_1 : i32, i32, i32
  }
  func.func @transform_7(%arg0: i32) -> (i32, i32, i32) {
    %c0_i32 = arith.constant 0 : i32
    %c0_i32_0 = arith.constant 0 : i32
    %c0_i32_1 = arith.constant 0 : i32
    %c0_i32_2 = arith.constant 0 : i32
    return %c0_i32, %c0_i32_0, %c0_i32_1 : i32, i32, i32
  }
  func.func @transform_8(%arg0: i32) -> (i32, i32, i32) {
    %c0_i32 = arith.constant 0 : i32
    %c0_i32_0 = arith.constant 0 : i32
    %c0_i32_1 = arith.constant 0 : i32
    %c0_i32_2 = arith.constant 0 : i32
    return %c0_i32, %c0_i32_0, %c0_i32_1 : i32, i32, i32
  }
  func.func @transform_9(%arg0: i32) -> (i32, i32, i32) {
    %c0_i32 = arith.constant 0 : i32
    %c0_i32_0 = arith.constant 0 : i32
    %c0_i32_1 = arith.constant 0 : i32
    %c0_i32_2 = arith.constant 0 : i32
    return %c0_i32, %c0_i32_0, %c0_i32_1 : i32, i32, i32
  }
  func.func @transform_10(%arg0: i32) -> (i32, i32, i32) {
    %c0_i32 = arith.constant 0 : i32
    %c0_i32_0 = arith.constant 0 : i32
    %c0_i32_1 = arith.constant 0 : i32
    %c0_i32_2 = arith.constant 0 : i32
    return %c0_i32, %c0_i32_0, %c0_i32_1 : i32, i32, i32
  }
  func.func @transform_11(%arg0: i32) -> (i32, i32, i32) {
    %c0_i32 = arith.constant 0 : i32
    %c0_i32_0 = arith.constant 0 : i32
    %c0_i32_1 = arith.constant 0 : i32
    %c0_i32_2 = arith.constant 0 : i32
    return %c0_i32, %c0_i32_0, %c0_i32_1 : i32, i32, i32
  }
  func.func @transform_12(%arg0: i32) -> (i32, i32, i32) {
    %c0_i32 = arith.constant 0 : i32
    %c0_i32_0 = arith.constant 0 : i32
    %c0_i32_1 = arith.constant 0 : i32
    %c0_i32_2 = arith.constant 0 : i32
    return %c0_i32, %c0_i32_0, %c0_i32_1 : i32, i32, i32
  }
  func.func @transform_13(%arg0: i32) -> (i32, i32, i32) {
    %c0_i32 = arith.constant 0 : i32
    %c0_i32_0 = arith.constant 0 : i32
    %c0_i32_1 = arith.constant 0 : i32
    %c0_i32_2 = arith.constant 0 : i32
    return %c0_i32, %c0_i32_0, %c0_i32_1 : i32, i32, i32
  }
  func.func @transform_14(%arg0: i32) -> (i32, i32, i32) {
    %c0_i32 = arith.constant 0 : i32
    %c0_i32_0 = arith.constant 0 : i32
    %c0_i32_1 = arith.constant 0 : i32
    %c0_i32_2 = arith.constant 0 : i32
    return %c0_i32, %c0_i32_0, %c0_i32_1 : i32, i32, i32
  }
  func.func @transform_15(%arg0: i32) -> (i32, i32, i32) {
    %c0_i32 = arith.constant 0 : i32
    %c0_i32_0 = arith.constant 0 : i32
    %c0_i32_1 = arith.constant 0 : i32
    %c0_i32_2 = arith.constant 0 : i32
    return %c0_i32, %c0_i32_0, %c0_i32_1 : i32, i32, i32
  }
  func.func @transform_16(%arg0: i32) -> (i32, i32, i32) {
    %c0_i32 = arith.constant 0 : i32
    %c0_i32_0 = arith.constant 0 : i32
    %c0_i32_1 = arith.constant 0 : i32
    %c0_i32_2 = arith.constant 0 : i32
    return %c0_i32, %c0_i32_0, %c0_i32_1 : i32, i32, i32
  }
  func.func @transform_17(%arg0: i32) -> (i32, i32, i32) {
    %c0_i32 = arith.constant 0 : i32
    %c0_i32_0 = arith.constant 0 : i32
    %c0_i32_1 = arith.constant 0 : i32
    %c0_i32_2 = arith.constant 0 : i32
    return %c0_i32, %c0_i32_0, %c0_i32_1 : i32, i32, i32
  }
  func.func @transform_18(%arg0: i32) -> (i32, i32, i32) {
    %c0_i32 = arith.constant 0 : i32
    %c0_i32_0 = arith.constant 0 : i32
    %c0_i32_1 = arith.constant 0 : i32
    %c0_i32_2 = arith.constant 0 : i32
    return %c0_i32, %c0_i32_0, %c0_i32_1 : i32, i32, i32
  }
  func.func @transform_19(%arg0: i32) -> (i32, i32, i32) {
    %c0_i32 = arith.constant 0 : i32
    %c0_i32_0 = arith.constant 0 : i32
    %c0_i32_1 = arith.constant 0 : i32
    %c0_i32_2 = arith.constant 0 : i32
    return %c0_i32, %c0_i32_0, %c0_i32_1 : i32, i32, i32
  }
  func.func @transform_20(%arg0: i32) -> (i32, i32, i32) {
    %c0_i32 = arith.constant 0 : i32
    %c0_i32_0 = arith.constant 0 : i32
    %c0_i32_1 = arith.constant 0 : i32
    %c0_i32_2 = arith.constant 0 : i32
    return %c0_i32, %c0_i32_0, %c0_i32_1 : i32, i32, i32
  }
  func.func @transform_21(%arg0: i32) -> (i32, i32, i32) {
    %c0_i32 = arith.constant 0 : i32
    %c0_i32_0 = arith.constant 0 : i32
    %c0_i32_1 = arith.constant 0 : i32
    %c0_i32_2 = arith.constant 0 : i32
    return %c0_i32, %c0_i32_0, %c0_i32_1 : i32, i32, i32
  }
  func.func @transform_22(%arg0: i32) -> (i32, i32, i32) {
    %c0_i32 = arith.constant 0 : i32
    %c0_i32_0 = arith.constant 0 : i32
    %c0_i32_1 = arith.constant 0 : i32
    %c0_i32_2 = arith.constant 0 : i32
    return %c0_i32, %c0_i32_0, %c0_i32_1 : i32, i32, i32
  }
  func.func @transform_23(%arg0: i32) -> (i32, i32, i32) {
    %c0_i32 = arith.constant 0 : i32
    %c0_i32_0 = arith.constant 0 : i32
    %c0_i32_1 = arith.constant 0 : i32
    %c0_i32_2 = arith.constant 0 : i32
    return %c0_i32, %c0_i32_0, %c0_i32_1 : i32, i32, i32
  }
  func.func @transform_24(%arg0: i32) -> (i32, i32, i32) {
    %c0_i32 = arith.constant 0 : i32
    %c0_i32_0 = arith.constant 0 : i32
    %c0_i32_1 = arith.constant 0 : i32
    %c0_i32_2 = arith.constant 0 : i32
    return %c0_i32, %c0_i32_0, %c0_i32_1 : i32, i32, i32
  }
  func.func @transform_25(%arg0: i32) -> (i32, i32, i32) {
    %c0_i32 = arith.constant 0 : i32
    %c0_i32_0 = arith.constant 0 : i32
    %c0_i32_1 = arith.constant 0 : i32
    %c0_i32_2 = arith.constant 0 : i32
    return %c0_i32, %c0_i32_0, %c0_i32_1 : i32, i32, i32
  }
  func.func @transform_26(%arg0: i32) -> (i32, i32, i32) {
    %c0_i32 = arith.constant 0 : i32
    %c0_i32_0 = arith.constant 0 : i32
    %c0_i32_1 = arith.constant 0 : i32
    %c0_i32_2 = arith.constant 0 : i32
    return %c0_i32, %c0_i32_0, %c0_i32_1 : i32, i32, i32
  }
  func.func @transform_27(%arg0: i32) -> (i32, i32, i32) {
    %c0_i32 = arith.constant 0 : i32
    %c0_i32_0 = arith.constant 0 : i32
    %c0_i32_1 = arith.constant 0 : i32
    %c0_i32_2 = arith.constant 0 : i32
    return %c0_i32, %c0_i32_0, %c0_i32_1 : i32, i32, i32
  }
  func.func @transform_28(%arg0: i32) -> (i32, i32) {
    %c0_i32 = arith.constant 0 : i32
    %c0_i32_0 = arith.constant 0 : i32
    %c0_i32_1 = arith.constant 0 : i32
    return %c0_i32, %c0_i32_0 : i32, i32
  }
  func.func @transform_29(%arg0: i32) -> (i32, i32) {
    %c0_i32 = arith.constant 0 : i32
    %c0_i32_0 = arith.constant 0 : i32
    %c0_i32_1 = arith.constant 0 : i32
    return %c0_i32, %c0_i32_0 : i32, i32
  }
  func.func @transform_30(%arg0: i32) -> (i32, i32, i32) {
    %c0_i32 = arith.constant 0 : i32
    %c0_i32_0 = arith.constant 0 : i32
    %c0_i32_1 = arith.constant 0 : i32
    return %arg0, %c0_i32, %c0_i32_0 : i32, i32, i32
  }
}

</mosaic_0001>

<bundles_post_ra>
// kernel: captioning_transformer_forward.2
= control target key start
LH: loop header
LB: loop body
LE: loop exit
PB: predicated region body
PF: predicated region fallthrough
CT: control target
= control target key end

     0   :  { %s2819_s0 = inlined_call_operand.vmem [shape: f32[2,4,256], index: 0, kind: input, shape index: {}]   ;;  %s2820_s1 = inlined_call_operand.vmem [shape: f32[256,32], index: 1, kind: input, shape index: {}]   ;;  %s2821_s2 = inlined_call_operand.vmem [shape: f32[1,32], index: 2, kind: input, shape index: {}]   ;;  %s2822_s3 = inlined_call_operand.vmem [shape: f32[1,4,32], index: 3, kind: input, shape index: {}]   ;;  %s2823_s4 = inlined_call_operand.vmem [shape: f32[2,32,32], index: 4, kind: input, shape index: {}]   ;;  %s2824_s5 = inlined_call_operand.vmem [shape: f32[2,1,32], index: 5, kind: input, shape index: {}]   ;;  %s2825_s6 = inlined_call_operand.vmem [shape: f32[2,32,32], index: 6, kind: input, shape index: {}]   ;;  %s2826_s7 = inlined_call_operand.vmem [shape: f32[2,1,32], index: 7, kind: input, shape index: {}]   ;;  %s2827_s8 = inlined_call_operand.vmem [shape: f32[2,32,32], index: 8, kind: input, shape index: {}]   ;;  %s2828_s9 = inlined_call_operand.vmem [shape: f32[2,1,32], index: 9, kind: input, shape index: {}]   ;;  %s2829_s10 = inlined_call_operand.vmem [shape: f32[2,32,32], index: 10, kind: input, shape index: {}]   ;;  %s2830_s11 = inlined_call_operand.vmem [shape: f32[2,1,32], index: 11, kind: input, shape index: {}]   ;;  %s2831_s12 = inlined_call_operand.vmem [shape: f32[2,1,32], index: 12, kind: input, shape index: {}]   ;;  %s2832_s13 = inlined_call_operand.vmem [shape: f32[2,1,32], index: 13, kind: input, shape index: {}]   ;;  %s2833_s14 = inlined_call_operand.vmem [shape: f32[2,32,128], index: 14, kind: input, shape index: {}]   ;;  %s2834_s15 = inlined_call_operand.vmem [shape: f32[2,1,128], index: 15, kind: input, shape index: {}]   ;;  %s2835_s16 = inlined_call_operand.vmem [shape: f32[2,128,32], index: 16, kind: input, shape index: {}]   ;;  %s2836_s17 = inlined_call_operand.vmem [shape: f32[2,1,32], index: 17, kind: input, shape index: {}]   ;;  %s2837_s18 = inlined_call_operand.vmem [shape: f32[2,1,32], index: 18, kind: input, shape index: {}]   ;;  %s2838_s19 = inlined_call_operand.vmem [shape: f32[2,1,32], index: 19, kind: input, shape index: {}]   ;;  %s2839_s20 = inlined_call_operand.vmem [shape: f32[2,4,32], index: 20, kind: output, shape index: {}]  }
   0x1   :  { %2848 = sst [smem:[#allocation3_spill]] %s2819_s0 }
   0x2   :  { %2849 = sst [smem:[#allocation4_spill]] %s2820_s1  ;;  %s2271_s1 = smov 0  }
   0x3   :  { %2850 = sst [smem:[#allocation5_spill]] %s2821_s2 }
   0x4   :  { %2851 = sst [smem:[#allocation6_spill]] %s2822_s3 }
   0x5   :  { %2852 = sst [smem:[#allocation7_spill]] %s2823_s4 }
   0x6 LB: > { %2853 = sst [smem:[#allocation2_spill]] %s2157_s1  ;;  %s1974_s22 = sadd.s32 4294967295, %s2157_s1   ;;  %s2157_s1 = sphi %s2271_s1, %s30_s1  }
   0x7   : > { %p1978_p0 = scmp.ge.s32.totalorder %s2157_s1, 1  ;;  %p562_p1 = scmp.lt.s32.totalorder %s2157_s1, 3 }
   0x9   : > { %p563_p2 = pnand %p1978_p0, %p562_p1 }
   0xa   : > { %s2854_s2 = sld [smem:[#allocation4_spill]] (!%p563_p2)  ;;  %p619_p3 = scmp.lt.s32.totalorder (!%p563_p2), %s1974_s22, 1 }
   0xb   : > { %566 = sbr.rel (%p563_p2) target bundleno = 4279 (0x10b7), region = 100  ;;  %s2855_s21 = sld [smem:[#allocation3_spill]] (!%p563_p2) }
   0xc   : > { %s2856_s29 = sld [smem:[#allocation7_spill]] (!%p563_p2)  ;;  %s2160_s4 = smov (!%p563_p2), 120  }
   0xd   : > { %s2858_s1 = sld [smem:[#allocation6_spill]] (!%p563_p2)  ;;  %s2843_s30 = smov (!%p563_p2), 16  }
   0xe   : > { %s2844_s0 = smov (!%p563_p2), 8   ;;  %s2859_s25 = smov (!%p563_p2), 112  }
   0xf   : > { %s2862_s3 = smov (!%p563_p2), 24  }
  0x10   : > { %v644_v0 = vld [vmem:[%s2854_s2 + $0x78] sm:$0xff]  ;;  %v643_v1 = vld [vmem:[%s2854_s2 + $0x70] sm:$0xff]  ;;  %v642_v4 = vld [vmem:[%s2854_s2 + $0x68] sm:$0xff]  ;;  %s2865_s22 = smov (!%p619_p3, %s1974_s22), 1  ;;  %vm736_vm0 = vcmask 261120   ;;  %vm863_vm1 = vcmask 1043456  }
  0x11   : > { %v660_v2 = vld [vmem:[%s2854_s2 + $0xf8] sm:$0xff]  ;;  %671 = vmatpush.msra.mxu0 %v644_v0  ;;  %v659_v3 = vld [vmem:[%s2854_s2 + $0xf0] sm:$0xff]  ;;  %v658_v5 = vld [vmem:[%s2854_s2 + $0xe8] sm:$0xff]  ;;  %s2072_s26 = sshll.u32 %s2865_s22, 3  ;;  %vm806_vm2 = vcmask 64512   ;;  %vm834_vm3 = vcmask 27648  }
  0x12   : > { %691 = vmatpush.msra.mxu1 %v660_v2  ;;  %v641_v6 = vld [vmem:[%s2854_s2 + $0x60] sm:$0xff]  ;;  %v640_v8 = vld [vmem:[%s2854_s2 + $0x58] sm:$0xff]  ;;  %s623_s23 = scalar_lea.vmem %s2855_s21, %s2072_s26  ;;  %v639_v10 = vld [vmem:[%s2854_s2 + $0x50] sm:$0xff]  ;;  %s2857_s26 = sld [smem:[#allocation5_spill]]  ;;  %vm859_vm8 = vcmask 31744  }
  0x13   : > { %672 = vmatpush.msra.mxu0 %v643_v1  ;;  %v657_v7 = vld [vmem:[%s2854_s2 + $0xe0] sm:$0xff]  ;;  %v656_v9 = vld [vmem:[%s2854_s2 + $0xd8] sm:$0xff]  ;;  %v655_v11 = vld [vmem:[%s2854_s2 + $0xd0] sm:$0xff]  ;;  %s1981_s27 = sshll.u32 %s2865_s22, 2 }
  0x14   : > { %692 = vmatpush.msra.mxu1 %v659_v3  ;;  %v638_v12 = vld [vmem:[%s2854_s2 + $0x48] sm:$0xff]  ;;  %v628_v14 = vld [vmem:[%s623_s23] sm:$0xff]  ;;  %v636_v17 = vld [vmem:[%s2854_s2 + $0x38] sm:$0xff]  ;;  %s2846_s23 = smov 112   ;;  %s627_s24 = scalar_lea.vmem %s2839_s20, %s1981_s27 }
  0x15   : > { %673 = vmatpush.msra.mxu0 %v642_v4  ;;  %v654_v13 = vld [vmem:[%s2854_s2 + $0xc8] sm:$0xff]  ;;  %v637_v15 = vld [vmem:[%s2854_s2 + $0x40] sm:$0xff]  ;;  %666 = vst [vmem:[#allocation1] ss:$2 sm:$0xff] %v628_v14  ;;  %v652_v18 = vld [vmem:[%s2854_s2 + $0xb8] sm:$0xff] }
  0x16   : > { %693 = vmatpush.msra.mxu1 %v658_v5  ;;  %v653_v16 = vld [vmem:[%s2854_s2 + $0xc0] sm:$0xff]  ;;  %v635_v19 = vld [vmem:[%s2854_s2 + $0x30] sm:$0xff]  ;;  %v634_v21 = vld [vmem:[%s2854_s2 + $0x28] sm:$0xff] }
  0x17   : > { %674 = vmatpush.msra.mxu0 %v641_v6  ;;  %v651_v20 = vld [vmem:[%s2854_s2 + $0xb0] sm:$0xff]  ;;  %v650_v22 = vld [vmem:[%s2854_s2 + $0xa8] sm:$0xff]  ;;  %v633_v23 = vld [vmem:[%s2854_s2 + $0x20] sm:$0xff] }
  0x18   : > { %694 = vmatpush.msra.mxu1 %v657_v7  ;;  %v649_v24 = vld [vmem:[%s2854_s2 + $0xa0] sm:$0xff]  ;;  %v632_v25 = vld [vmem:[%s2854_s2 + $0x18] sm:$0xff]  ;;  %v631_v27 = vld [vmem:[%s2854_s2 + $0x10] sm:$0xff] }
  0x19   : > { %675 = vmatpush.msra.mxu0 %v640_v8  ;;  %v648_v26 = vld [vmem:[%s2854_s2 + $0x98] sm:$0xff]  ;;  %v647_v28 = vld [vmem:[%s2854_s2 + $0x90] sm:$0xff]  ;;  %v630_v29 = vld [vmem:[%s2854_s2 + $0x8] sm:$0xff] }
  0x1a   : > { %695 = vmatpush.msra.mxu1 %v656_v9  ;;  %v646_v30 = vld [vmem:[%s2854_s2 + $0x88] sm:$0xff]  ;;  %v629_v31 = vld [vmem:[%s2854_s2] sm:$0xff]  ;;  %v716_v35 = vld [vmem:[%s2856_s29 + $0x18] sm:$0xff] }
  0x1b   : > { %676 = vmatpush.msra.mxu0 %v639_v10  ;;  %v645_v32 = vld [vmem:[%s2854_s2 + $0x80] sm:$0xff]  ;;  %v726_v36 = vld [vmem:[%s2827_s8 + $0x18] sm:$0xff]  ;;  %752 = vmatpush.msra.mxu3 %v716_v35  ;;  %v715_v37 = vld [vmem:[%s2856_s29 + $0x10] sm:$0xff] }
  0x1c   : > { %696 = vmatpush.msra.mxu1 %v655_v11  ;;  %v667_v33 = vld.sshfl [vmem:[#allocation1] sm:$0xff pattern:$0x75316420]  ;;  %v668_v34 = vld.sshfl [vmem:[#allocation1 + $0x8] sm:$0xff pattern:$0x75316420] }
  0x1d   : > { %677 = vmatpush.msra.mxu0 %v638_v12  ;;  %v725_v38 = vld [vmem:[%s2827_s8 + $0x10] sm:$0xff]  ;;  %753 = vmatpush.msra.mxu3 %v715_v37  ;;  %v714_v39 = vld [vmem:[%s2856_s29 + $0x8] sm:$0xff]  ;;  %v713_v41 = vld [vmem:[%s2856_s29] sm:$0xff] }
  0x1e   : > { %697 = vmatpush.msra.mxu1 %v654_v13  ;;  %v724_v40 = vld [vmem:[%s2827_s8 + $0x8] sm:$0xff]  ;;  %v723_v42 = vld [vmem:[%s2827_s8] sm:$0xff]  ;;  %v721_v43 = vld [vmem:[%s2825_s6 + $0x18] sm:$0xff] }
  0x1f   : > { %678 = vmatpush.msra.mxu0 %v637_v15  ;;  %754 = vmatpush.msra.mxu3 %v714_v39  ;;  %v720_v44 = vld [vmem:[%s2825_s6 + $0x10] sm:$0xff]  ;;  %v719_v45 = vld [vmem:[%s2825_s6 + $0x8] sm:$0xff]  ;;  %v718_v46 = vld [vmem:[%s2825_s6] sm:$0xff] }
  0x20   : > { %698 = vmatpush.msra.mxu1 %v653_v16  ;;  %v2088_v47 = vld [vmem:[%s2857_s26] ss:$0 sm:$0xff]  ;;  %s2161_s26 = smov 104  }
  0x21   : > { %679 = vmatpush.msra.mxu0 %v636_v17  ;;  %755 = vmatpush.msra.mxu3 %v713_v41  ;;  %v711_v51 = vld [vmem:[%s2858_s1] sm:$0xf]  ;;  %s2845_s1 = smov 24  }
  0x22   : > { %699 = vmatpush.msra.mxu1 %v652_v18  ;;  %v2089_v54 = vld [vmem:[%s2828_s9] ss:$0 sm:$0xff] }
  0x23   : > { %680 = vmatpush.msra.mxu0 %v635_v19  ;;  %775 = vmatpush.msrb.mxu3 %v721_v43  ;;  %v2090_v57 = vld [vmem:[%s2824_s5] ss:$0 sm:$0xff] }
  0x24   : > { %700 = vmatpush.msra.mxu1 %v651_v20  ;;  %v2091_v60 = vld [vmem:[%s2826_s7] ss:$0 sm:$0xff] }
  0x25   : > { %681 = vmatpush.msra.mxu0 %v634_v21  ;;  %776 = vmatpush.msrb.mxu3 %v720_v44 }
  0x26   : > { %701 = vmatpush.msra.mxu1 %v650_v22 }
  0x27   : > { %682 = vmatpush.msra.mxu0 %v633_v23  ;;  %777 = vmatpush.msrb.mxu3 %v719_v45 }
  0x28   : > { %702 = vmatpush.msra.mxu1 %v649_v24 }
  0x29   : > { %683 = vmatpush.msra.mxu0 %v632_v25  ;;  %778 = vmatpush.msrb.mxu3 %v718_v46 }
  0x2a   : > { %703 = vmatpush.msra.mxu1 %v648_v26 }
  0x2b   : > { %684 = vmatpush.msra.mxu0 %v631_v27 }
  0x2c   : > { %704 = vmatpush.msra.mxu1 %v647_v28 }
  0x2d   : > { %685 = vmatpush.msra.mxu0 %v630_v29 }
  0x2e   : > { %705 = vmatpush.msra.mxu1 %v646_v30 }
  0x2f   : > { %686 = vmatpush.msra.mxu0 %v629_v31 }
  0x30   : > { %706 = vmatpush.msra.mxu1 %v645_v32  ;;  %687 = vmatmul.f32.vlgmr.msra.gmra.mxu0 %v667_v33 }
  0x31   : > { %707 = vmatmul.f32.vlgmr.msra.gmra.mxu1 %v668_v34  ;;  %798 = vmatpush.msrb.mxu0 %v726_v36 }
  0x33   : > { %799 = vmatpush.msrb.mxu0 %v725_v38 }
  0x35   : > { %800 = vmatpush.msrb.mxu0 %v724_v40 }
  0x37   : > { %801 = vmatpush.msrb.mxu0 %v723_v42 }
  0xad   : > { %v688_v48 = vpop.f32.mrf.mxu0 }
  0xae   : > { %v708_v49 = vpop.f32.mrf.mxu1  ;;  %v689_v50 = vadd.f32 %v2088_v47, %v688_v48 }
  0xb0   : > { %v709_v52 = vadd.f32 %v708_v49, %v689_v50 }
  0xb2   : > { %v2423_v53 = vadd.f32 %v711_v51, %v709_v52 }
  0xb4   : > { %1982 = vmatmul.msk.f32.vlgmr.msra.gmra.mxu3 %vm736_vm0, %v2423_v53  ;;  %1984 = vmatmul.msk.f32.vlgmr.msrb.gmra.mxu0 %vm736_vm0, %v2423_v53 }
  0xbc   : > { %1983 = vmatmul.msk.f32.vlgmr.msrb.gmra.mxu3 %vm736_vm0, %v2423_v53 }
 0x131   : > { %v803_v55 = vpop.f32.mrf.mxu0 }
 0x132   : > { %v2434_v56 = vadd.f32 %v2089_v54, %v803_v55 }
 0x134   : > { %1987 = vmatpush.msk.msra.mxu2 %vm863_vm1, %v2434_v56 }
 0x137   : > { %v757_v58 = vpop.f32.mrf.mxu3 }
 0x138   : > { %v758_v59 = vadd.f32 %v2090_v57, %v757_v58 }
 0x13a   : > { %967 = vrot.lane.b32.xlu2 %v758_v59, %s2846_s23 }
 0x13f   : > { %v780_v61 = vpop.f32.mrf.mxu3 }
 0x140   : > { %v781_v62 = vadd.f32 %v2091_v60, %v780_v61 }
 0x142   : > { %969 = vrot.lane.b32.xlu1 %v781_v62, %s2846_s23  ;;  %889 = vrot.lane.b32.xlu0 %v781_v62, %s2160_s4 }
 0x143   : > { %1985 = vmatpush.xpose.msk.msra.mxu3 %vm806_vm2, %v781_v62  ;;  %1047 = vrot.lane.b32.xlu2 %v758_v59, %s2161_s26 }
 0x146   : > { %1986 = vmatmul.msk.f32.vlgmr.msra.gmra.mxu3 %vm806_vm2, %v758_v59 }
 0x14a   : > { %1049 = vrot.lane.b32.xlu1 %v781_v62, %s2161_s26  ;;  %887 = vrot.lane.b32.xlu0 %v758_v59, %s2160_s4 }
 0x194   : > { %v968_v1 = vpop.permute.xlu2 %967 }
 0x19d   : > { %v1048_v4 = vpop.permute.xlu2 %1047 }
 0x1b4   : > { %v970_v63 = vpop.permute.xlu1 %969  ;;  %v890_v0 = vpop.permute.xlu0 %889 }
 0x1b5   : > { %1989 = vmatpush.xpose.msk.msrb.mxu3 %vm806_vm2, %v890_v0 }
 0x1b9   : > { %1993 = vmatpush.xpose.msk.msra.mxu3 %vm806_vm2, %v970_v63 }
 0x1bc   : > { %v1050_v2 = vpop.permute.xlu1 %1049  ;;  %v888_v3 = vpop.permute.xlu0 %887 }
 0x1bd   : > { %1990 = vmatmul.msk.f32.vlgmr.msrb.gmra.mxu3 %vm806_vm2, %v888_v3  ;;  %1997 = vmatpush.xpose.msk.msrb.mxu1 %vm806_vm2, %v1050_v2 }
 0x1c0   : > { %1998 = vmatmul.msk.f32.vlgmr.msrb.gmra.mxu1 %vm806_vm2, %v1048_v4 }
 0x1c5   : > { %1994 = vmatmul.msk.f32.vlgmr.msra.gmra.mxu3 %vm806_vm2, %v968_v1 }
 0x1c9   : > { %v830_v5 = vpop.f32.mrf.mxu3 }
 0x1ca   : > { %v833_v6 = vmul.f32 0.35355338, %v830_v5 }
 0x1cc   : > { %v835_v7 = vsel %vm834_vm3, %v833_v6, -inf }
 0x1cd   : > { %836 = vmax.xlane.f32.xlu0 %v835_v7 }
 0x23d   : > { %v1072_v8 = vpop.f32.mrf.mxu1 }
 0x23e   : > { %v1075_v9 = vmul.f32 0.35355338, %v1072_v8 }
 0x240   : > { %v837_v10 = vpop.xlane.xlu0 %836  ;;  %v912_v11 = vpop.f32.mrf.mxu3  ;;  %v1076_v12 = vsel %vm834_vm3, %v1075_v9, -inf }
 0x241   : > { %v838_v13 = vsub.f32 %v833_v6, %v837_v10  ;;  %v915_v14 = vmul.f32 0.35355338, %v912_v11  ;;  %1077 = vmax.xlane.f32.xlu2 %v1076_v12 }
 0x243   : > { %v839_v15 = vmul.f32 1.442695, %v838_v13  ;;  %v916_v16 = vsel %vm834_vm3, %v915_v14, -inf }
 0x244   : > { %917 = vmax.xlane.f32.xlu1 %v916_v16 }
 0x245   : > { %2109 = vpow2.f32 %v839_v15 }
 0x248   : > { %v992_v17 = vpop.f32.mrf.mxu3 }
 0x249   : > { %v995_v18 = vmul.f32 0.35355338, %v992_v17 }
 0x24b   : > { %v2110_v19 = vpop.eup %2109  ;;  %v996_v20 = vsel %vm834_vm3, %v995_v18, -inf }
 0x24c   : > { %997 = vmax.xlane.f32.xlu2 %v996_v20  ;;  %v841_v21 = vsel %vm834_vm3, %v2110_v19, 0.0 }
 0x24d   : > { %842 = vadd.xlane.f32.xlu0 %v841_v21 }
 0x2b4   : > { %v1078_v22 = vpop.xlane.xlu2 %1077 }
 0x2b5   : > { %v1079_v23 = vsub.f32 %v1075_v9, %v1078_v22 }
 0x2b7   : > { %v1080_v24 = vmul.f32 1.442695, %v1079_v23  ;;  %v918_v25 = vpop.xlane.xlu1 %917 }
 0x2b8   : > { %v919_v26 = vsub.f32 %v915_v14, %v918_v25 }
 0x2b9   : > { %2111 = vpow2.f32 %v1080_v24 }
 0x2ba   : > { %v920_v27 = vmul.f32 1.442695, %v919_v26 }
 0x2bc   : > { %2113 = vpow2.f32 %v920_v27 }
 0x2bf   : > { %v2463_v28 = vpop.eup %2111  ;;  %v998_v29 = vpop.xlane.xlu2 %997 }
 0x2c0   : > { %v999_v30 = vsub.f32 %v995_v18, %v998_v29  ;;  %v843_v31 = vpop.xlane.xlu0 %842  ;;  %v1082_v32 = vsel %vm834_vm3, %v2463_v28, 0.0 }
 0x2c1   : > { %2115 = vrcp.f32 %v843_v31  ;;  %1083 = vadd.xlane.f32.xlu2 %v1082_v32  ;;  %v855_v40 = vand.u32 2147483648, %v843_v31  ;;  %v853_v43 = vand.u32 2147483647, %v843_v31  ;;  %vm849_vm5 = vweird.f32 %v843_v31  ;;  %v728_v32 = vld [vmem:[%s2829_s10] sm:$0xff] }
 0x2c2   : > { %v2467_v33 = vpop.eup %2113  ;;  %v1000_v34 = vmul.f32 1.442695, %v999_v30  ;;  %v731_v30 = vld [vmem:[%s2829_s10 + $0x18] sm:$0xff] }
 0x2c3   : > { %v922_v35 = vsel %vm834_vm3, %v2467_v33, 0.0  ;;  %v856_v45 = vor.u32 1.1754944e-38, %v855_v40  ;;  %vm854_vm7 = vcmp.eq.f32.partialorder %v853_v43, 8.507059e+37  ;;  %1162 = vmatpush.msrb.mxu3 %v731_v30 }
 0x2c4   : > { %2117 = vpow2.f32 %v1000_v34  ;;  %923 = vadd.xlane.f32.xlu1 %v922_v35 }
 0x2c7   : > { %v2116_v36 = vpop.eup %2115 }
 0x2c8   : > { %v845_v37 = vmul.f32 %v2116_v36, %v843_v31  ;;  %vm850_vm4 = vweird.f32 %v2116_v36  ;;  %v729_v31 = vld [vmem:[%s2829_s10 + $0x8] sm:$0xff] }
 0x2c9   : > { %vm851_vm6 = vmor %vm849_vm5, %vm850_vm4 }
 0x2ca   : > { %v2471_v38 = vpop.eup %2117  ;;  %v846_v39 = vsub.f32 1.0, %v845_v37 }
 0x2cb   : > { %v1002_v41 = vsel %vm834_vm3, %v2471_v38, 0.0 }
 0x2cc   : > { %v847_v42 = vmul.f32 %v2116_v36, %v846_v39  ;;  %1003 = vadd.xlane.f32.xlu0 %v1002_v41  ;;  %v2092_v39 = vld [vmem:[%s2830_s11] ss:$0 sm:$0xff] }
 0x2ce   : > { %v848_v44 = vadd.f32 %v2116_v36, %v847_v42 }
 0x2d0   : > { %v852_v46 = vsel %vm851_vm6, %v2116_v36, %v848_v44  ;;  %v2165_v44 = vmov 32.0  }
 0x2d1   : > { %v857_v47 = vsel %vm854_vm7, %v856_v45, %v852_v46 }
 0x2d2   : > { %v858_v48 = vmul.f32 %v2110_v19, %v857_v47 }
 0x2d4   : > { %1988 = vmatmul.msk.f32.vlgmr.msra.gmra.mxu2 %vm859_vm8, %v858_v48 }
 0x2d9   : > { %1100 = vrot.lane.b32.xlu2 %v2434_v56, %s2161_s26 }
 0x2dd   : > { %940 = vrot.lane.b32.xlu1 %v2434_v56, %s2160_s4 }
 0x2e0   : > { %1020 = vrot.lane.b32.xlu0 %v2434_v56, %s2846_s23 }
 0x334   : > { %v1084_v49 = vpop.xlane.xlu2 %1083 }
 0x335   : > { %2119 = vrcp.f32 %v1084_v49  ;;  %vm1090_vm4 = vweird.f32 %v1084_v49  ;;  %v1096_v11 = vand.u32 2147483648, %v1084_v49  ;;  %v1094_v13 = vand.u32 2147483647, %v1084_v49 }
 0x337   : > { %v924_v50 = vpop.xlane.xlu1 %923  ;;  %v1097_v21 = vor.u32 1.1754944e-38, %v1096_v11 }
 0x338   : > { %2121 = vrcp.f32 %v924_v50  ;;  %v936_v63 = vand.u32 2147483648, %v924_v50  ;;  %vm930_vm10 = vweird.f32 %v924_v50  ;;  %v934_v0 = vand.u32 2147483647, %v924_v50 }
 0x33a   : > { %v937_v4 = vor.u32 1.1754944e-38, %v936_v63  ;;  %vm935_vm12 = vcmp.eq.f32.partialorder %v934_v0, 8.507059e+37  ;;  %v1229_v63 = vld [vmem:[%s2835_s16 + $0x68] sm:$0xff] }
 0x33b   : > { %v2120_v51 = vpop.eup %2119 }
 0x33c   : > { %v1086_v57 = vmul.f32 %v2120_v51, %v1084_v49  ;;  %vm1091_vm14 = vweird.f32 %v2120_v51  ;;  %v1101_v19 = vpop.permute.xlu2 %1100 }
 0x33d   : > { %vm1092_vm7 = vmor %vm1090_vm4, %vm1091_vm14 }
 0x33e   : > { %v2122_v52 = vpop.eup %2121  ;;  %v1087_v60 = vsub.f32 1.0, %v1086_v57  ;;  %v1214_v57 = vld [vmem:[%s2833_s14 + $0x18] sm:$0xff] }
 0x33f   : > { %v926_v54 = vmul.f32 %v2122_v52, %v924_v50  ;;  %v1004_v55 = vpop.xlane.xlu0 %1003  ;;  %vm931_vm9 = vweird.f32 %v2122_v52 }
 0x340   : > { %2123 = vrcp.f32 %v1004_v55  ;;  %vm932_vm11 = vmor %vm930_vm10, %vm931_vm9  ;;  %v1088_v1 = vmul.f32 %v2120_v51, %v1087_v60  ;;  %v1016_v5 = vand.u32 2147483648, %v1004_v55  ;;  %v1014_v7 = vand.u32 2147483647, %v1004_v55  ;;  %v1211_v60 = vld [vmem:[%s2833_s14] sm:$0xff] }
 0x341   : > { %v927_v58 = vsub.f32 1.0, %v926_v54  ;;  %vm1010_vm15 = vweird.f32 %v1004_v55  ;;  %vm1095_vm9 = vcmp.eq.f32.partialorder %v1094_v13, 8.507059e+37  ;;  %vm1140_vm10 = vcmask 130048  }
 0x342   : > { %v1089_v9 = vadd.f32 %v2120_v51, %v1088_v1  ;;  %v1017_v12 = vor.u32 1.1754944e-38, %v1016_v5  ;;  %vm1015_vm6 = vcmp.eq.f32.partialorder %v1014_v7, 8.507059e+37  ;;  %2125 = vrcp.f32 %v2165_v44  ;;  %v1228_v1 = vld [vmem:[%s2835_s16 + $0x60] sm:$0xff]  ;;  %v1225_v5 = vld [vmem:[%s2835_s16 + $0x48] sm:$0xff]  ;;  %v2005_v44 = vld [vmem:[%s2856_s29 + $0x30] sm:$0xff] }
 0x343   : > { %v928_v59 = vmul.f32 %v2122_v52, %v927_v58  ;;  %v1213_v58 = vld [vmem:[%s2833_s14 + $0x10] sm:$0xff] }
 0x344   : > { %v1093_v18 = vsel %vm1092_vm7, %v2120_v51, %v1089_v9 }
 0x345   : > { %v929_v61 = vadd.f32 %v2122_v52, %v928_v59  ;;  %v1098_v23 = vsel %vm1095_vm9, %v1097_v21, %v1093_v18  ;;  %v1212_v59 = vld [vmem:[%s2833_s14 + $0x8] sm:$0xff]  ;;  %v2093_v18 = vld [vmem:[%s2831_s12] ss:$0 sm:$0xff] }
 0x346   : > { %v2124_v62 = vpop.eup %2123  ;;  %v1099_v24 = vmul.f32 %v2463_v28, %v1098_v23  ;;  %v730_v28 = vld [vmem:[%s2829_s10 + $0x10] sm:$0xff]  ;;  %v2094_v21 = vld [vmem:[%s2832_s13] ss:$0 sm:$0xff] }
 0x347   : > { %v1006_v56 = vmul.f32 %v2124_v62, %v1004_v55  ;;  %v933_v3 = vsel %vm932_vm11, %v2122_v52, %v929_v61  ;;  %vm1011_vm13 = vweird.f32 %v2124_v62  ;;  %1163 = vmatpush.msrb.mxu3 %v730_v28  ;;  %vm1142_vm11 = vcmask 195584   ;;  %v1231_v61 = vld [vmem:[%s2835_s16 + $0x78] sm:$0xff] }
 0x348   : > { %v938_v8 = vsel %vm935_vm12, %v937_v4, %v933_v3  ;;  %vm1012_vm5 = vmor %vm1010_vm15, %vm1011_vm13  ;;  %vm1173_vm12 = vcmask 257024   ;;  %v2126_v45 = vpop.eup %2125  ;;  %1263 = vmatpush.msra.mxu1 %v1231_v61  ;;  %v1227_v3 = vld [vmem:[%s2835_s16 + $0x58] sm:$0xff]  ;;  %v1226_v4 = vld [vmem:[%s2835_s16 + $0x50] sm:$0xff] }
 0x349   : > { %v1007_v2 = vsub.f32 1.0, %v1006_v56  ;;  %v939_v16 = vmul.f32 %v2467_v33, %v938_v8  ;;  %1164 = vmatpush.msrb.mxu3 %v729_v31  ;;  %v1178_v46 = vmul.f32 32.0, %v2126_v45  ;;  %vm1182_vm13 = vweird.f32 %v2126_v45  ;;  %v1223_v8 = vld [vmem:[%s2835_s16 + $0x38] sm:$0xff]  ;;  %v2096_v31 = vld [vmem:[%s2836_s17] ss:$0 sm:$0xff] }
 0x34b   : > { %v1008_v6 = vmul.f32 %v2124_v62, %v1007_v2  ;;  %1165 = vmatpush.msrb.mxu3 %v728_v32  ;;  %v1179_v47 = vsub.f32 1.0, %v1178_v46  ;;  %v2015_v46 = vld [vmem:[%s2827_s8 + $0x30] sm:$0xff] }
 0x34d   : > { %v1009_v10 = vadd.f32 %v2124_v62, %v1008_v6  ;;  %v1180_v48 = vmul.f32 %v2126_v45, %v1179_v47  ;;  %v1224_v6 = vld [vmem:[%s2835_s16 + $0x40] sm:$0xff]  ;;  %v2004_v47 = vld [vmem:[%s2856_s29 + $0x28] sm:$0xff] }
 0x34f   : > { %v1013_v14 = vsel %vm1012_vm5, %v2124_v62, %v1009_v10  ;;  %v941_v15 = vpop.permute.xlu1 %940  ;;  %v1181_v49 = vadd.f32 %v2126_v45, %v1180_v48  ;;  %v1230_v62 = vld [vmem:[%s2835_s16 + $0x70] sm:$0xff]  ;;  %v2009_v48 = vld [vmem:[%s2825_s6 + $0x28] sm:$0xff] }
 0x350   : > { %v1018_v17 = vsel %vm1015_vm6, %v1017_v12, %v1013_v14  ;;  %1991 = vmatpush.msk.msrb.mxu2 %vm863_vm1, %v941_v15  ;;  %1264 = vmatpush.msra.mxu1 %v1230_v62  ;;  %v1222_v10 = vld [vmem:[%s2835_s16 + $0x30] sm:$0xff]  ;;  %v1221_v12 = vld [vmem:[%s2835_s16 + $0x28] sm:$0xff]  ;;  %v1220_v14 = vld [vmem:[%s2835_s16 + $0x20] sm:$0xff] }
 0x351   : > { %1992 = vmatmul.msk.f32.vlgmr.msrb.gmra.mxu2 %vm859_vm8, %v939_v16  ;;  %v1019_v20 = vmul.f32 %v2471_v38, %v1018_v17  ;;  %v2515_v50 = vsel %vm1182_vm13, %v2126_v45, %v1181_v49  ;;  %v1219_v16 = vld [vmem:[%s2835_s16 + $0x18] sm:$0xff]  ;;  %v2010_v45 = vld [vmem:[%s2825_s6 + $0x30] sm:$0xff]  ;;  %v2014_v49 = vld [vmem:[%s2827_s8 + $0x28] sm:$0xff] }
 0x352   : > { %1999 = vmatpush.msk.msra.mxu2 %vm863_vm1, %v1101_v19  ;;  %v1021_v22 = vpop.permute.xlu0 %1020  ;;  %1265 = vmatpush.msra.mxu1 %v1229_v63 }
 0x353   : > { %1995 = vmatpush.msk.msra.mxu0 %vm863_vm1, %v1021_v22 }
 0x354   : > { %1996 = vmatmul.msk.f32.vlgmr.msra.gmra.mxu0 %vm859_vm8, %v1019_v20  ;;  %1266 = vmatpush.msra.mxu1 %v1228_v1 }
 0x355   : > { %1251 = vmatpush.msrb.mxu0 %v1214_v57 }
 0x356   : > { %1267 = vmatpush.msra.mxu1 %v1227_v3 }
 0x357   : > { %v884_v25 = vpop.f32.mrf.mxu2  ;;  %1252 = vmatpush.msrb.mxu0 %v1213_v58 }
 0x358   : > { %1268 = vmatpush.msra.mxu1 %v1226_v4 }
 0x359   : > { %2000 = vmatmul.msk.f32.vlgmr.msra.gmra.mxu2 %vm859_vm8, %v1099_v24  ;;  %1253 = vmatpush.msrb.mxu0 %v1212_v59  ;;  %v1218_v24 = vld [vmem:[%s2835_s16 + $0x10] sm:$0xff] }
 0x35a   : > { %1269 = vmatpush.msra.mxu1 %v1225_v5  ;;  %v2099_v5 = vld [vmem:[%s2828_s9 + $0x1] ss:$0 sm:$0xff] }
 0x35b   : > { %1254 = vmatpush.msrb.mxu0 %v1211_v60 }
 0x35c   : > { %1270 = vmatpush.msra.mxu1 %v1224_v6 }
 0x35e   : > { %1271 = vmatpush.msra.mxu1 %v1223_v8  ;;  %v2100_v8 = vld [vmem:[%s2824_s5 + $0x1] ss:$0 sm:$0xff] }
 0x360   : > { %1272 = vmatpush.msra.mxu1 %v1222_v10 }
 0x362   : > { %1273 = vmatpush.msra.mxu1 %v1221_v12 }
 0x364   : > { %1274 = vmatpush.msra.mxu1 %v1220_v14 }
 0x366   : > { %1275 = vmatpush.msra.mxu1 %v1219_v16 }
 0x368   : > { %1276 = vmatpush.msra.mxu1 %v1218_v24 }
 0x3d1   : > { %v1044_v26 = vpop.f32.mrf.mxu0 }
 0x3d2   : > { %1132 = vrot.lane.b32.xlu0 %v1044_v26, %s2843_s30  ;;  %v1216_v26 = vld [vmem:[%s2835_s16] sm:$0xff] }
 0x3d4   : > { %v964_v27 = vpop.f32.mrf.mxu2 }
 0x3d5   : > { %1128 = vrot.lane.b32.xlu1 %v964_v27, %s2844_s0  ;;  %v2095_v27 = vld [vmem:[%s2834_s15] ss:$0 sm:$0xff] }
 0x3dc   : > { %v1124_v29 = vpop.f32.mrf.mxu2 }
 0x3dd   : > { %1136 = vrot.lane.b32.xlu2 %v1124_v29, %s2845_s1 }
 0x437   : > { %v1137_v36 = vpop.permute.xlu2 %1136 }
 0x444   : > { %v1133_v34 = vpop.permute.xlu0 %1132 }
 0x447   : > { %v1129_v33 = vpop.permute.xlu1 %1128 }
 0x448   : > { %v1139_v35 = vsel %vm806_vm2, %v884_v25, %v1129_v33  ;;  %v1217_v25 = vld [vmem:[%s2835_s16 + $0x8] sm:$0xff] }
 0x449   : > { %v1141_v37 = vsel %vm1140_vm10, %v1139_v35, %v1133_v34  ;;  %1277 = vmatpush.msra.mxu1 %v1217_v25 }
 0x44a   : > { %v1143_v38 = vsel %vm1142_vm11, %v1141_v37, %v1137_v36 }
 0x44b   : > { %2001 = vmatmul.msk.f32.vlgmr.msrb.gmra.mxu3 %vm736_vm0, %v1143_v38  ;;  %1278 = vmatpush.msra.mxu1 %v1216_v26 }
 0x4ce   : > { %v1167_v40 = vpop.f32.mrf.mxu3 }
 0x4cf   : > { %v1168_v41 = vadd.f32 %v2092_v39, %v1167_v40 }
 0x4d1   : > { %v1170_v42 = vadd.f32 %v1168_v41, %v2423_v53  ;;  %v2006_v41 = vld [vmem:[%s2856_s29 + $0x38] sm:$0xff] }
 0x4d2   : > { %1362 = vmatpush.msrb.mxu2 %v2006_v41 }
 0x4d3   : > { %v1174_v43 = vsel %vm1173_vm12, %v1170_v42, 0.0 }
 0x4d4   : > { %1175 = vadd.xlane.f32.xlu1 %v1174_v43  ;;  %v2016_v43 = vld [vmem:[%s2827_s8 + $0x38] sm:$0xff]  ;;  %1363 = vmatpush.msrb.mxu2 %v2005_v44 }
 0x4d5   : > { %1408 = vmatpush.msra.mxu0 %v2016_v43 }
 0x4d6   : > { %1364 = vmatpush.msrb.mxu2 %v2004_v47 }
 0x4d7   : > { %1409 = vmatpush.msra.mxu0 %v2015_v46 }
 0x4d9   : > { %1410 = vmatpush.msra.mxu0 %v2014_v49 }
 0x547   : > { %v1176_v51 = vpop.xlane.xlu1 %1175 }
 0x548   : > { %v1184_v52 = vmul.f32 %v2515_v50, %v1176_v51  ;;  %v2003_v51 = vld [vmem:[%s2856_s29 + $0x20] sm:$0xff] }
 0x549   : > { %1365 = vmatpush.msrb.mxu2 %v2003_v51 }
 0x54a   : > { %v1185_v54 = vsub.f32 %v1170_v42, %v1184_v52  ;;  %v2011_v42 = vld [vmem:[%s2825_s6 + $0x38] sm:$0xff]  ;;  %v2008_v52 = vld [vmem:[%s2825_s6 + $0x20] sm:$0xff] }
 0x54b   : > { %1385 = vmatpush.msra.mxu3 %v2011_v42 }
 0x54c   : > { %v1186_v55 = vmul.f32 %v1185_v54, %v1185_v54 }
 0x54d   : > { %1386 = vmatpush.msra.mxu3 %v2010_v45 }
 0x54e   : > { %v1187_v53 = vsel %vm1173_vm12, %v1186_v55, 0.0 }
 0x54f   : > { %1188 = vadd.xlane.f32.xlu0 %v1187_v53  ;;  %1387 = vmatpush.msra.mxu3 %v2009_v48 }
 0x551   : > { %1388 = vmatpush.msra.mxu3 %v2008_v52 }
 0x5c2   : > { %v1189_v0 = vpop.xlane.xlu0 %1188 }
 0x5c3   : > { %v1190_v56 = vmul.f32 %v1189_v0, %v2515_v50  ;;  %v2097_v0 = vld [vmem:[%s2837_s18] ss:$0 sm:$0xff] }
 0x5c5   : > { %v1191_v2 = vadd.f32 1e-05, %v1190_v56 }
 0x5c7   : > { %2127 = vrsqrt.f32 %v1191_v2  ;;  %vm1198_vm15 = vweird.f32 %v1191_v2 }
 0x5cd   : > { %v2128_v7 = vpop.eup %2127 }
 0x5ce   : > { %v1193_v9 = vmul.f32 %v2128_v7, %v1191_v2  ;;  %vm1199_vm14 = vweird.f32 %v2128_v7  ;;  %v2098_v2 = vld [vmem:[%s2838_s19] ss:$0 sm:$0xff] }
 0x5cf   : > { %vm1200_vm4 = vmor %vm1198_vm15, %vm1199_vm14 }
 0x5d0   : > { %v1194_v11 = vmul.f32 %v2128_v7, %v1193_v9  ;;  %v2101_v9 = vld [vmem:[%s2826_s7 + $0x1] ss:$0 sm:$0xff] }
 0x5d2   : > { %v1195_v13 = vmul.f32 0.5, %v1194_v11 }
 0x5d4   : > { %v1196_v15 = vsub.f32 1.5, %v1195_v13 }
 0x5d6   : > { %v1197_v17 = vmul.f32 %v2128_v7, %v1196_v15 }
 0x5d8   : > { %v1201_v19 = vsel %vm1200_vm4, %v2128_v7, %v1197_v17 }
 0x5d9   : > { %v1202_v20 = vmul.f32 %v1201_v19, %v1185_v54  ;;  %v2013_v54 = vld [vmem:[%s2827_s8 + $0x20] sm:$0xff] }
 0x5da   : > { %1411 = vmatpush.msra.mxu0 %v2013_v54 }
 0x5db   : > { %v1206_v22 = vmul.f32 %v2093_v18, %v1202_v20 }
 0x5dd   : > { %v1210_v23 = vadd.f32 %v2094_v21, %v1206_v22 }
 0x5df   : > { %2002 = vmatmul.msk.f32.vlgmr.msrb.gmra.mxu0 %vm736_vm0, %v1210_v23 }
 0x65c   : > { %v1256_v29 = vpop.f32.mrf.mxu0 }
 0x65d   : > { %v1257_v30 = vadd.f32 %v2095_v27, %v1256_v29 }
 0x65f   : > { %v1259_v28 = vmax.f32 %v1257_v30, 0.0 }
 0x661   : > { %1279 = vmatmul.f32.vlgmr.msra.gmra.mxu1 %v1259_v28 }
 0x6de   : > { %v1280_v32 = vpop.f32.mrf.mxu1 }
 0x6df   : > { %v1281_v33 = vadd.f32 %v2096_v31, %v1280_v32 }
 0x6e1   : > { %v1283_v34 = vadd.f32 %v1281_v33, %v1210_v23 }
 0x6e3   : > { %v1286_v35 = vsel %vm1173_vm12, %v1283_v34, 0.0 }
 0x6e4   : > { %1287 = vadd.xlane.f32.xlu2 %v1286_v35 }
 0x757   : > { %v1288_v36 = vpop.xlane.xlu2 %1287 }
 0x758   : > { %v1289_v37 = vmul.f32 %v1288_v36, %v2515_v50 }
 0x75a   : > { %v1290_v38 = vsub.f32 %v1283_v34, %v1289_v37 }
 0x75c   : > { %v1291_v39 = vmul.f32 %v1290_v38, %v1290_v38 }
 0x75e   : > { %v1292_v40 = vsel %vm1173_vm12, %v1291_v39, 0.0 }
 0x75f   : > { %1293 = vadd.xlane.f32.xlu1 %v1292_v40 }
 0x7d2   : > { %v1294_v55 = vpop.xlane.xlu1 %1293 }
 0x7d3   : > { %v1295_v53 = vmul.f32 %v1294_v55, %v2515_v50 }
 0x7d5   : > { %v1296_v57 = vadd.f32 1e-05, %v1295_v53 }
 0x7d7   : > { %2129 = vrsqrt.f32 %v1296_v57  ;;  %vm1303_vm6 = vweird.f32 %v1296_v57 }
 0x7dd   : > { %v2130_v58 = vpop.eup %2129 }
 0x7de   : > { %v1298_v59 = vmul.f32 %v2130_v58, %v1296_v57  ;;  %vm1304_vm5 = vweird.f32 %v2130_v58 }
 0x7df   : > { %vm1305_vm7 = vmor %vm1303_vm6, %vm1304_vm5 }
 0x7e0   : > { %v1299_v60 = vmul.f32 %v2130_v58, %v1298_v59 }
 0x7e2   : > { %v1300_v61 = vmul.f32 0.5, %v1299_v60 }
 0x7e4   : > { %v1301_v62 = vsub.f32 1.5, %v1300_v61 }
 0x7e6   : > { %v1302_v63 = vmul.f32 %v2130_v58, %v1301_v62 }
 0x7e8   : > { %v1306_v56 = vsel %vm1305_vm7, %v2130_v58, %v1302_v63 }
 0x7e9   : > { %v1307_v1 = vmul.f32 %v1306_v56, %v1290_v38 }
 0x7eb   : > { %v1311_v3 = vmul.f32 %v2097_v0, %v1307_v1 }
 0x7ed   : > { %v2639_v4 = vadd.f32 %v2098_v2, %v1311_v3 }
 0x7ef   : > { %2023 = vmatmul.msk.f32.vlgmr.msrb.gmra.mxu2 %vm736_vm0, %v2639_v4  ;;  %2024 = vmatmul.msk.f32.vlgmr.msra.gmra.mxu3 %vm736_vm0, %v2639_v4 }
 0x7f0   : > { %2025 = vmatmul.msk.f32.vlgmr.msra.gmra.mxu0 %vm736_vm0, %v2639_v4 }
 0x86d   : > { %v1413_v6 = vpop.f32.mrf.mxu0 }
 0x86e   : > { %v2650_v7 = vadd.f32 %v2099_v5, %v1413_v6 }
 0x870   : > { %2028 = vmatpush.msk.msrb.mxu3 %vm863_vm1, %v2650_v7 }
 0x872   : > { %v1367_v10 = vpop.f32.mrf.mxu2  ;;  %v1390_v11 = vpop.f32.mrf.mxu3 }
 0x873   : > { %v1368_v12 = vadd.f32 %v2100_v8, %v1367_v10  ;;  %v1391_v13 = vadd.f32 %v2101_v9, %v1390_v11 }
 0x875   : > { %1495 = vrot.lane.b32.xlu0 %v1391_v13, %s2160_s4  ;;  %2026 = vmatpush.xpose.msk.msra.mxu2 %vm806_vm2, %v1391_v13 }
 0x876   : > { %1493 = vrot.lane.b32.xlu2 %v1368_v12, %s2160_s4 }
 0x878   : > { %2027 = vmatmul.msk.f32.vlgmr.msra.gmra.mxu2 %vm806_vm2, %v1368_v12 }
 0x87e   : > { %1546 = vrot.lane.b32.xlu2 %v2650_v7, %s2160_s4  ;;  %s2860_s4 = smov 8  }
 0x886   : > { %1653 = vrot.lane.b32.xlu2 %v1368_v12, %s2161_s26 }
 0x88e   : > { %1575 = vrot.lane.b32.xlu2 %v1391_v13, %s2859_s25 }
 0x896   : > { %1573 = vrot.lane.b32.xlu2 %v1368_v12, %s2859_s25 }
 0x8d0   : > { %v1494_v14 = vpop.permute.xlu2 %1493 }
 0x8d8   : > { %v1547_v15 = vpop.permute.xlu2 %1546 }
 0x8d9   : > { %2032 = vmatpush.msk.msrb.mxu2 %vm863_vm1, %v1547_v15 }
 0x8e0   : > { %v2670_v16 = vpop.permute.xlu2 %1653 }
 0x8e7   : > { %v1496_v17 = vpop.permute.xlu0 %1495 }
 0x8e8   : > { %v1576_v18 = vpop.permute.xlu2 %1575  ;;  %2030 = vmatpush.xpose.msk.msrb.mxu0 %vm806_vm2, %v1496_v17 }
 0x8e9   : > { %2034 = vmatpush.xpose.msk.msra.mxu3 %vm806_vm2, %v1576_v18 }
 0x8eb   : > { %2031 = vmatmul.msk.f32.vlgmr.msrb.gmra.mxu0 %vm806_vm2, %v1494_v14 }
 0x8f0   : > { %v1574_v62 = vpop.permute.xlu2 %1573 }
 0x8fb   : > { %v1439_v22 = vpop.f32.mrf.mxu2 }
 0x8fc   : > { %v1442_v23 = vmul.f32 0.35355338, %v1439_v22 }
 0x8fe   : > { %v1443_v24 = vsel %vm834_vm3, %v1442_v23, -inf }
 0x968   : > { %v1518_v19 = vpop.f32.mrf.mxu0 }
 0x969   : > { %v1521_v20 = vmul.f32 0.35355338, %v1518_v19 }
 0x96b   : > { %v1522_v21 = vsel %vm834_vm3, %v1521_v20, -inf }
 0x96c   : > { %1523 = vmax.xlane.f32.xlu1 %v1522_v21 }
 0x974   : > { %1444 = vmax.xlane.f32.xlu1 %v1443_v24 }
 0x9df   : > { %v1524_v25 = vpop.xlane.xlu1 %1523 }
 0x9e0   : > { %v1525_v26 = vsub.f32 %v1521_v20, %v1524_v25 }
 0x9e2   : > { %v1526_v27 = vmul.f32 1.442695, %v1525_v26 }
 0x9e4   : > { %2131 = vpow2.f32 %v1526_v27 }
 0x9e7   : > { %v1445_v29 = vpop.xlane.xlu1 %1444 }
 0x9e8   : > { %v1446_v30 = vsub.f32 %v1442_v23, %v1445_v29 }
 0x9ea   : > { %v2132_v28 = vpop.eup %2131  ;;  %v1447_v31 = vmul.f32 1.442695, %v1446_v30 }
 0x9eb   : > { %v1528_v32 = vsel %vm834_vm3, %v2132_v28, 0.0 }
 0x9ec   : > { %2133 = vpow2.f32 %v1447_v31  ;;  %1529 = vadd.xlane.f32.xlu0 %v1528_v32 }
 0x9f2   : > { %v2134_v33 = vpop.eup %2133 }
 0x9f3   : > { %v1449_v34 = vsel %vm834_vm3, %v2134_v33, 0.0 }
 0x9f4   : > { %1450 = vadd.xlane.f32.xlu1 %v1449_v34 }
 0xa0d   : > { %1655 = vrot.lane.b32.xlu1 %v1391_v13, %s2161_s26 }
 0xa5f   : > { %v1530_v35 = vpop.xlane.xlu0 %1529 }
 0xa60   : > { %2135 = vrcp.f32 %v1530_v35  ;;  %v1542_v40 = vand.u32 2147483648, %v1530_v35  ;;  %v1540_v42 = vand.u32 2147483647, %v1530_v35  ;;  %vm1536_vm13 = vweird.f32 %v1530_v35 }
 0xa62   : > { %v1543_v45 = vor.u32 1.1754944e-38, %v1542_v40  ;;  %vm1541_vm15 = vcmp.eq.f32.partialorder %v1540_v42, 8.507059e+37 }
 0xa66   : > { %v2136_v36 = vpop.eup %2135 }
 0xa67   : > { %v1532_v37 = vmul.f32 %v2136_v36, %v1530_v35  ;;  %v1451_v38 = vpop.xlane.xlu1 %1450  ;;  %vm1537_vm9 = vweird.f32 %v2136_v36 }
 0xa68   : > { %2137 = vrcp.f32 %v1451_v38  ;;  %vm1538_vm14 = vmor %vm1536_vm13, %vm1537_vm9  ;;  %v1463_v52 = vand.u32 2147483648, %v1451_v38  ;;  %v1461_v55 = vand.u32 2147483647, %v1451_v38  ;;  %vm1457_vm5 = vweird.f32 %v1451_v38 }
 0xa69   : > { %v1533_v39 = vsub.f32 1.0, %v1532_v37 }
 0xa6a   : > { %v1464_v57 = vor.u32 1.1754944e-38, %v1463_v52  ;;  %vm1462_vm7 = vcmp.eq.f32.partialorder %v1461_v55, 8.507059e+37 }
 0xa6b   : > { %v1534_v41 = vmul.f32 %v2136_v36, %v1533_v39 }
 0xa6d   : > { %v1535_v43 = vadd.f32 %v2136_v36, %v1534_v41 }
 0xa6e   : > { %v2138_v44 = vpop.eup %2137 }
 0xa6f   : > { %v1539_v46 = vsel %vm1538_vm14, %v2136_v36, %v1535_v43  ;;  %v1453_v47 = vmul.f32 %v2138_v44, %v1451_v38  ;;  %vm1458_vm4 = vweird.f32 %v2138_v44 }
 0xa70   : > { %v1544_v48 = vsel %vm1541_vm15, %v1543_v45, %v1539_v46  ;;  %vm1459_vm6 = vmor %vm1457_vm5, %vm1458_vm4  ;;  %v2021_v45 = vld [vmem:[%s2829_s10 + $0x38] sm:$0xff]  ;;  %v2020_v46 = vld [vmem:[%s2829_s10 + $0x30] sm:$0xff] }
 0xa71   : > { %v1454_v49 = vsub.f32 1.0, %v1453_v47  ;;  %v1545_v51 = vmul.f32 %v2132_v28, %v1544_v48  ;;  %v2019_v47 = vld [vmem:[%s2829_s10 + $0x28] sm:$0xff]  ;;  %v2018_v48 = vld [vmem:[%s2829_s10 + $0x20] sm:$0xff] }
 0xa73   : > { %v1455_v54 = vmul.f32 %v2138_v44, %v1454_v49  ;;  %2033 = vmatmul.msk.f32.vlgmr.msrb.gmra.mxu2 %vm859_vm8, %v1545_v51 }
 0xa75   : > { %v1456_v53 = vadd.f32 %v2138_v44, %v1455_v54 }
 0xa77   : > { %v1460_v58 = vsel %vm1459_vm6, %v2138_v44, %v1456_v53 }
 0xa78   : > { %v1465_v59 = vsel %vm1462_vm7, %v1464_v57, %v1460_v58  ;;  %v2102_v57 = vld [vmem:[%s2830_s11 + $0x1] ss:$0 sm:$0xff] }
 0xa79   : > { %v1466_v60 = vmul.f32 %v2134_v33, %v1465_v59 }
 0xa7b   : > { %2029 = vmatmul.msk.f32.vlgmr.msrb.gmra.mxu3 %vm859_vm8, %v1466_v60 }
 0xa7f   : > { %v1656_v61 = vpop.permute.xlu1 %1655 }
 0xa80   : > { %2038 = vmatpush.xpose.msk.msra.mxu2 %vm806_vm2, %v1656_v61 }
 0xa83   : > { %2035 = vmatmul.msk.f32.vlgmr.msra.gmra.mxu3 %vm806_vm2, %v1574_v62  ;;  %2039 = vmatmul.msk.f32.vlgmr.msra.gmra.mxu2 %vm806_vm2, %v2670_v16 }
 0xaf6   : > { %v1570_v63 = vpop.f32.mrf.mxu2 }
 0xafe   : > { %v2686_v0 = vpop.f32.mrf.mxu3 }
 0xb06   : > { %v1598_v56 = vpop.f32.mrf.mxu3  ;;  %v1678_v1 = vpop.f32.mrf.mxu2 }
 0xb07   : > { %v1601_v2 = vmul.f32 0.35355338, %v1598_v56  ;;  %v1681_v3 = vmul.f32 0.35355338, %v1678_v1 }
 0xb09   : > { %v1602_v5 = vsel %vm834_vm3, %v1601_v2, -inf  ;;  %v1682_v6 = vsel %vm834_vm3, %v1681_v3, -inf }
 0xb0a   : > { %1603 = vmax.xlane.f32.xlu2 %v1602_v5  ;;  %1683 = vmax.xlane.f32.xlu1 %v1682_v6  ;;  %v2045_v5 = vld [vmem:[%s2833_s14 + $0x20] sm:$0xff]  ;;  %v2065_v6 = vld [vmem:[%s2835_s16 + $0xf8] sm:$0xff] }
 0xb0b   : > { %1865 = vmatpush.msrb.mxu2 %v2065_v6 }
 0xb23   : > { %1626 = vrot.lane.b32.xlu1 %v2650_v7, %s2859_s25 }
 0xb7d   : > { %v1604_v8 = vpop.xlane.xlu2 %1603  ;;  %v1684_v9 = vpop.xlane.xlu1 %1683 }
 0xb7e   : > { %v1605_v10 = vsub.f32 %v1601_v2, %v1604_v8  ;;  %v1685_v12 = vsub.f32 %v1681_v3, %v1684_v9  ;;  %v2048_v2 = vld [vmem:[%s2833_s14 + $0x38] sm:$0xff]  ;;  %v2046_v3 = vld [vmem:[%s2833_s14 + $0x28] sm:$0xff]  ;;  %v2064_v8 = vld [vmem:[%s2835_s16 + $0xf0] sm:$0xff] }
 0xb7f   : > { %1853 = vmatpush.msrb.mxu1 %v2048_v2  ;;  %v2063_v9 = vld [vmem:[%s2835_s16 + $0xe8] sm:$0xff]  ;;  %1866 = vmatpush.msrb.mxu2 %v2064_v8 }
 0xb80   : > { %v1606_v11 = vmul.f32 1.442695, %v1605_v10  ;;  %v1686_v13 = vmul.f32 1.442695, %v1685_v12  ;;  %v2062_v12 = vld [vmem:[%s2835_s16 + $0xe0] sm:$0xff] }
 0xb81   : > { %1867 = vmatpush.msrb.mxu2 %v2063_v9 }
 0xb82   : > { %2139 = vpow2.f32 %v1606_v11 }
 0xb83   : > { %2141 = vpow2.f32 %v1686_v13  ;;  %1868 = vmatpush.msrb.mxu2 %v2062_v12 }
 0xb88   : > { %v2140_v14 = vpop.eup %2139 }
 0xb89   : > { %v1608_v15 = vsel %vm834_vm3, %v2140_v14, 0.0  ;;  %v2142_v16 = vpop.eup %2141 }
 0xb8a   : > { %1609 = vadd.xlane.f32.xlu0 %v1608_v15  ;;  %v1688_v17 = vsel %vm834_vm3, %v2142_v16, 0.0  ;;  %v2060_v15 = vld [vmem:[%s2835_s16 + $0xd0] sm:$0xff] }
 0xb92   : > { %1689 = vadd.xlane.f32.xlu0 %v1688_v17  ;;  %v2058_v17 = vld [vmem:[%s2835_s16 + $0xc0] sm:$0xff] }
 0xb95   : > { %v1627_v18 = vpop.permute.xlu1 %1626 }
 0xb96   : > { %2036 = vmatpush.msk.msra.mxu0 %vm863_vm1, %v1627_v18 }
 0xb98   : > { %1766 = vmatpush.msrb.mxu0 %v2021_v45 }
 0xb9a   : > { %1767 = vmatpush.msrb.mxu0 %v2020_v46 }
 0xb9c   : > { %1768 = vmatpush.msrb.mxu0 %v2019_v47 }
 0xb9e   : > { %1769 = vmatpush.msrb.mxu0 %v2018_v48 }
 0xba6   : > { %1706 = vrot.lane.b32.xlu0 %v2650_v7, %s2161_s26  ;;  %s2861_s26 = smov 16  }
 0xbae   : > { %1734 = vrot.lane.b32.xlu0 %v1570_v63, %s2860_s4 }
 0xbfd   : > { %v1610_v19 = vpop.xlane.xlu0 %1609 }
 0xbfe   : > { %2143 = vrcp.f32 %v1610_v19  ;;  %v1622_v24 = vand.u32 2147483648, %v1610_v19  ;;  %v1620_v26 = vand.u32 2147483647, %v1610_v19  ;;  %vm1616_vm3 = vweird.f32 %v1610_v19 }
 0xc00   : > { %v1623_v30 = vor.u32 1.1754944e-38, %v1622_v24  ;;  %vm1621_vm14 = vcmp.eq.f32.partialorder %v1620_v26, 8.507059e+37 }
 0xc04   : > { %v2144_v20 = vpop.eup %2143 }
 0xc05   : > { %v1612_v21 = vmul.f32 %v2144_v20, %v1610_v19  ;;  %v1690_v22 = vpop.xlane.xlu0 %1689  ;;  %vm1617_vm9 = vweird.f32 %v2144_v20  ;;  %v2057_v19 = vld [vmem:[%s2835_s16 + $0xb8] sm:$0xff] }
 0xc06   : > { %2145 = vrcp.f32 %v1690_v22  ;;  %vm1618_vm13 = vmor %vm1616_vm3, %vm1617_vm9  ;;  %v1702_v34 = vand.u32 2147483648, %v1690_v22  ;;  %v1700_v36 = vand.u32 2147483647, %v1690_v22  ;;  %vm1696_vm4 = vweird.f32 %v1690_v22 }
 0xc07   : > { %v1613_v23 = vsub.f32 1.0, %v1612_v21  ;;  %v2056_v21 = vld [vmem:[%s2835_s16 + $0xb0] sm:$0xff] }
 0xc08   : > { %v1703_v38 = vor.u32 1.1754944e-38, %v1702_v34  ;;  %vm1701_vm6 = vcmp.eq.f32.partialorder %v1700_v36, 8.507059e+37  ;;  %v2052_v34 = vld [vmem:[%s2835_s16 + $0x90] sm:$0xff]  ;;  %v2050_v36 = vld [vmem:[%s2835_s16 + $0x80] sm:$0xff] }
 0xc09   : > { %v1614_v25 = vmul.f32 %v2144_v20, %v1613_v23  ;;  %v2055_v23 = vld [vmem:[%s2835_s16 + $0xa8] sm:$0xff] }
 0xc0b   : > { %v1615_v27 = vadd.f32 %v2144_v20, %v1614_v25  ;;  %v2054_v25 = vld [vmem:[%s2835_s16 + $0xa0] sm:$0xff] }
 0xc0c   : > { %v2146_v29 = vpop.eup %2145 }
 0xc0d   : > { %v1619_v28 = vsel %vm1618_vm13, %v2144_v20, %v1615_v27  ;;  %v1692_v7 = vmul.f32 %v2146_v29, %v1690_v22  ;;  %vm1697_vm15 = vweird.f32 %v2146_v29  ;;  %v2053_v27 = vld [vmem:[%s2835_s16 + $0x98] sm:$0xff] }
 0xc0e   : > { %v1624_v31 = vsel %vm1621_vm14, %v1623_v30, %v1619_v28  ;;  %vm1698_vm5 = vmor %vm1696_vm4, %vm1697_vm15  ;;  %v2103_v30 = vld [vmem:[%s2831_s12 + $0x1] ss:$0 sm:$0xff] }
 0xc0f   : > { %v1693_v32 = vsub.f32 1.0, %v1692_v7  ;;  %v1625_v33 = vmul.f32 %v2140_v14, %v1624_v31  ;;  %v2061_v14 = vld [vmem:[%s2835_s16 + $0xd8] sm:$0xff]  ;;  %v2104_v31 = vld [vmem:[%s2832_s13 + $0x1] ss:$0 sm:$0xff] }
 0xc10   : > { %1869 = vmatpush.msrb.mxu2 %v2061_v14 }
 0xc11   : > { %v1694_v35 = vmul.f32 %v2146_v29, %v1693_v32  ;;  %2037 = vmatmul.msk.f32.vlgmr.msra.gmra.mxu0 %vm859_vm8, %v1625_v33 }
 0xc12   : > { %1870 = vmatpush.msrb.mxu2 %v2060_v15 }
 0xc13   : > { %v1695_v37 = vadd.f32 %v2146_v29, %v1694_v35  ;;  %v2051_v35 = vld [vmem:[%s2835_s16 + $0x88] sm:$0xff] }
 0xc15   : > { %v1699_v39 = vsel %vm1698_vm5, %v2146_v29, %v1695_v37  ;;  %v2105_v37 = vld [vmem:[%s2834_s15 + $0x1] ss:$0 sm:$0xff] }
 0xc16   : > { %v1704_v40 = vsel %vm1701_vm6, %v1703_v38, %v1699_v39 }
 0xc17   : > { %v1705_v41 = vmul.f32 %v2142_v16, %v1704_v40  ;;  %v2059_v16 = vld [vmem:[%s2835_s16 + $0xc8] sm:$0xff] }
 0xc18   : > { %v1707_v42 = vpop.permute.xlu0 %1706  ;;  %1871 = vmatpush.msrb.mxu2 %v2059_v16 }
 0xc19   : > { %2040 = vmatpush.msk.msrb.mxu3 %vm863_vm1, %v1707_v42 }
 0xc1a   : > { %2041 = vmatmul.msk.f32.vlgmr.msrb.gmra.mxu3 %vm859_vm8, %v1705_v41  ;;  %1872 = vmatpush.msrb.mxu2 %v2058_v17  ;;  %v2106_v41 = vld [vmem:[%s2836_s17 + $0x1] ss:$0 sm:$0xff] }
 0xc1c   : > { %1873 = vmatpush.msrb.mxu2 %v2057_v19 }
 0xc1e   : > { %1874 = vmatpush.msrb.mxu2 %v2056_v21 }
 0xc20   : > { %v1735_v49 = vpop.permute.xlu0 %1734  ;;  %1875 = vmatpush.msrb.mxu2 %v2055_v23 }
 0xc21   : > { %v1745_v52 = vsel %vm806_vm2, %v2686_v0, %v1735_v49 }
 0xc22   : > { %1876 = vmatpush.msrb.mxu2 %v2054_v25 }
 0xc24   : > { %1877 = vmatpush.msrb.mxu2 %v2053_v27 }
 0xc26   : > { %1878 = vmatpush.msrb.mxu2 %v2052_v34 }
 0xc28   : > { %1879 = vmatpush.msrb.mxu2 %v2051_v35 }
 0xc2a   : > { %1880 = vmatpush.msrb.mxu2 %v2050_v36 }
 0xc8e   : > { %v1650_v43 = vpop.f32.mrf.mxu0 }
 0xc8f   : > { %1738 = vrot.lane.b32.xlu2 %v1650_v43, %s2861_s26 }
 0xc9d   : > { %v1730_v44 = vpop.f32.mrf.mxu3 }
 0xc9e   : > { %1742 = vrot.lane.b32.xlu0 %v1730_v44, %s2862_s3 }
 0xce9   : > { %v1739_v51 = vpop.permute.xlu2 %1738 }
 0xcea   : > { %v1746_v54 = vsel %vm1140_vm10, %v1745_v52, %v1739_v51 }
 0xd10   : > { %v1743_v55 = vpop.permute.xlu0 %1742 }
 0xd11   : > { %v1747_v53 = vsel %vm1142_vm11, %v1746_v54, %v1743_v55 }
 0xd12   : > { %2042 = vmatmul.msk.f32.vlgmr.msrb.gmra.mxu0 %vm736_vm0, %v1747_v53 }
 0xd8f   : > { %v1771_v58 = vpop.f32.mrf.mxu0 }
 0xd90   : > { %v1772_v59 = vadd.f32 %v2102_v57, %v1771_v58 }
 0xd92   : > { %v1774_v60 = vadd.f32 %v1772_v59, %v2639_v4  ;;  %v2047_v4 = vld [vmem:[%s2833_s14 + $0x30] sm:$0xff] }
 0xd93   : > { %1854 = vmatpush.msrb.mxu1 %v2047_v4 }
 0xd94   : > { %v1779_v61 = vsel %vm1173_vm12, %v1774_v60, 0.0 }
 0xd95   : > { %1780 = vadd.xlane.f32.xlu0 %v1779_v61  ;;  %1855 = vmatpush.msrb.mxu1 %v2046_v3 }
 0xd97   : > { %1856 = vmatpush.msrb.mxu1 %v2045_v5 }
 0xe08   : > { %v1781_v62 = vpop.xlane.xlu0 %1780 }
 0xe09   : > { %v1782_v63 = vmul.f32 %v1781_v62, %v2515_v50  ;;  %v2107_v62 = vld [vmem:[%s2837_s18 + $0x1] ss:$0 sm:$0xff] }
 0xe0b   : > { %v1783_v0 = vsub.f32 %v1774_v60, %v1782_v63 }
 0xe0d   : > { %v1784_v56 = vmul.f32 %v1783_v0, %v1783_v0 }
 0xe0f   : > { %v1785_v1 = vsel %vm1173_vm12, %v1784_v56, 0.0 }
 0xe10   : > { %1786 = vadd.xlane.f32.xlu1 %v1785_v1 }
 0xe83   : > { %v1787_v10 = vpop.xlane.xlu1 %1786 }
 0xe84   : > { %v1788_v11 = vmul.f32 %v1787_v10, %v2515_v50 }
 0xe86   : > { %v1789_v13 = vadd.f32 1e-05, %v1788_v11 }
 0xe88   : > { %2147 = vrsqrt.f32 %v1789_v13  ;;  %vm1796_vm2 = vweird.f32 %v1789_v13 }
 0xe8e   : > { %v2148_v18 = vpop.eup %2147 }
 0xe8f   : > { %v1791_v20 = vmul.f32 %v2148_v18, %v1789_v13  ;;  %vm1797_vm1 = vweird.f32 %v2148_v18 }
 0xe90   : > { %vm1798_vm8 = vmor %vm1796_vm2, %vm1797_vm1 }
 0xe91   : > { %v1792_v22 = vmul.f32 %v2148_v18, %v1791_v20 }
 0xe93   : > { %v1793_v24 = vmul.f32 0.5, %v1792_v22 }
 0xe95   : > { %v1794_v26 = vsub.f32 1.5, %v1793_v24 }
 0xe97   : > { %v1795_v29 = vmul.f32 %v2148_v18, %v1794_v26 }
 0xe99   : > { %v1799_v28 = vsel %vm1798_vm8, %v2148_v18, %v1795_v29 }
 0xe9a   : > { %v1800_v7 = vmul.f32 %v1799_v28, %v1783_v0 }
 0xe9c   : > { %v1804_v32 = vmul.f32 %v2103_v30, %v1800_v7 }
 0xe9e   : > { %v1808_v33 = vadd.f32 %v2104_v31, %v1804_v32 }
 0xea0   : > { %2067 = vmatmul.msk.f32.vlgmr.msrb.gmra.mxu1 %vm736_vm0, %v1808_v33 }
 0xf1d   : > { %v1858_v38 = vpop.f32.mrf.mxu1 }
 0xf1e   : > { %v1859_v39 = vadd.f32 %v2105_v37, %v1858_v38 }
 0xf20   : > { %v1861_v40 = vmax.f32 %v1859_v39, 0.0 }
 0xf22   : > { %1881 = vmatmul.f32.vlgmr.msrb.gmra.mxu2 %v1861_v40 }
 0xfa5   : > { %v1882_v42 = vpop.f32.mrf.mxu2 }
 0xfa6   : > { %v1883_v43 = vadd.f32 %v2106_v41, %v1882_v42 }
 0xfa8   : > { %v1885_v44 = vadd.f32 %v1883_v43, %v1808_v33 }
 0xfaa   : > { %v1890_v45 = vsel %vm1173_vm12, %v1885_v44, 0.0 }
 0xfab   : > { %1891 = vadd.xlane.f32.xlu2 %v1890_v45 }
0x101e   : > { %v1892_v46 = vpop.xlane.xlu2 %1891 }
0x101f   : > { %v1893_v47 = vmul.f32 %v1892_v46, %v2515_v50 }
0x1021   : > { %v1894_v48 = vsub.f32 %v1885_v44, %v1893_v47 }
0x1023   : > { %v1895_v49 = vmul.f32 %v1894_v48, %v1894_v48 }
0x1025   : > { %v1896_v51 = vsel %vm1173_vm12, %v1895_v49, 0.0 }
0x1026   : > { %1897 = vadd.xlane.f32.xlu0 %v1896_v51 }
0x1099   : > { %v1898_v52 = vpop.xlane.xlu0 %1897 }
0x109a   : > { %v1899_v54 = vmul.f32 %v1898_v52, %v2515_v50  ;;  %v2108_v50 = vld [vmem:[%s2838_s19 + $0x1] ss:$0 sm:$0xff] }
0x109c   : > { %v1900_v55 = vadd.f32 1e-05, %v1899_v54 }
0x109e   : > { %2149 = vrsqrt.f32 %v1900_v55  ;;  %vm1907_vm10 = vweird.f32 %v1900_v55 }
0x10a4   : > { %v2150_v53 = vpop.eup %2149 }
0x10a5   : > { %v1902_v57 = vmul.f32 %v2150_v53, %v1900_v55  ;;  %vm1908_vm0 = vweird.f32 %v2150_v53 }
0x10a6   : > { %vm1909_vm11 = vmor %vm1907_vm10, %vm1908_vm0 }
0x10a7   : > { %v1903_v58 = vmul.f32 %v2150_v53, %v1902_v57 }
0x10a9   : > { %v1904_v59 = vmul.f32 0.5, %v1903_v58 }
0x10ab   : > { %v1905_v60 = vsub.f32 1.5, %v1904_v59 }
0x10ad   : > { %v1906_v61 = vmul.f32 %v2150_v53, %v1905_v60 }
0x10af   : > { %v1910_v63 = vsel %vm1909_vm11, %v2150_v53, %v1906_v61 }
0x10b0   : > { %v1911_v0 = vmul.f32 %v1910_v63, %v1894_v48 }
0x10b2   : > { %v1915_v56 = vmul.f32 %v2107_v62, %v1911_v0 }
0x10b4   : > { %v1919_v1 = vadd.f32 %v2108_v50, %v1915_v56 }
0x10b6   : > { %1920 = vst.msk [vmem:[%s627_s24] sm:$0xf] %vm1173_vm12, %v1919_v1 }
0x10b7 PF: > { %s2863_s30 = sld [smem:[#allocation2_spill]] }
0x10bd   : > { %s30_s1 = sadd.s32 1, %s2863_s30  }
0x10be   : > { %p27_p4 = scmp.ge.s32.totalorder %s30_s1, 4  }
0x10c0   :  { %29 = sbr.rel (!%p27_p4) target bundleno = 6 (0x6), region = 146 }

// kernel: captioning_transformer_forward.3
= control target key start
LH: loop header
LB: loop body
LE: loop exit
PB: predicated region body
PF: predicated region fallthrough
CT: control target
= control target key end

     0   :  { %s4113_s6 = smov 1   ;;  %s4114_s10 = smov 2   ;;  %s4920_s0 = inlined_call_operand.smem [shape: u32[31], index: -1, kind: input, shape index: {}] }
   0x1   :  { %s4167_s5 = sld [smem:[%s4920_s0]]   ;;  %s4115_s14 = smov 3  }
   0x2   :  { %s4172_s9 = sld [smem:[%s4920_s0 + %s4113_s6]]   ;;  %s4116_s18 = smov 4  }
   0x3   :  { %s4177_s13 = sld [smem:[%s4920_s0 + %s4114_s10]]   ;;  %s4117_s22 = smov 5  }
   0x4   :  { %s4182_s17 = sld [smem:[%s4920_s0 + %s4115_s14]]   ;;  %s4118_s26 = smov 6  }
   0x5   :  { %s4187_s21 = sld [smem:[%s4920_s0 + %s4116_s18]]   ;;  %s4119_s30 = smov 7  }
   0x6   :  { %s4192_s25 = sld [smem:[%s4920_s0 + %s4117_s22]]   ;;  %s4120_s4 = smov 8  }
   0x7   :  { %4966 = sst [smem:[#allocation19_spill]] %s4167_s5  ;;  %s4121_s10 = smov 9  }
   0x8   :  { %4967 = sst [smem:[#allocation20_spill]] %s4172_s9  ;;  %s4122_s15 = smov 10  }
   0x9   :  { %4968 = sst [smem:[#allocation21_spill]] %s4177_s13  ;;  %s4123_s20 = smov 11  }
   0xa   :  { %s4197_s29 = sld [smem:[%s4920_s0 + %s4118_s26]]   ;;  %s4124_s26 = smov 12  }
   0xb   :  { %s4202_s3 = sld [smem:[%s4920_s0 + %s4119_s30]]   ;;  %s4125_s1 = smov 13  }
   0xc   :  { %s4207_s8 = sld [smem:[%s4920_s0 + %s4120_s4]]   ;;  %s4126_s7 = smov 14  }
   0xd   :  { %s4212_s14 = sld [smem:[%s4920_s0 + %s4121_s10]]   ;;  %s4128_s22 = smov 16  }
   0xe   :  { %s4217_s19 = sld [smem:[%s4920_s0 + %s4122_s15]]   ;;  %s4127_s15 = smov 15  }
   0xf   :  { %s4222_s24 = sld [smem:[%s4920_s0 + %s4123_s20]]   ;;  %s4129_s28 = smov 17  }
  0x10   :  { %s4227_s30 = sld [smem:[%s4920_s0 + %s4124_s26]]  }
  0x11   :  { %4969 = sst [smem:[#allocation22_spill]] %s4202_s3 }
  0x12   :  { %s4232_s6 = sld [smem:[%s4920_s0 + %s4125_s1]]  }
  0x13   :  { %s4237_s12 = sld [smem:[%s4920_s0 + %s4126_s7]]   ;;  %s4130_s7 = smov 18  }
  0x14   :  { %4970 = sst [smem:[#allocation23_spill]] %s4217_s19 }
  0x15   :  { %4971 = sst [smem:[#allocation24_spill]] %s4222_s24 }
  0x16   :  { %4972 = sst [smem:[#allocation25_spill]] %s4227_s30 }
  0x17   :  { %s4242_s20 = sld [smem:[%s4920_s0 + %s4127_s15]]   ;;  %s4131_s15 = smov 19  }
  0x18   :  { %4973 = sst [smem:[#allocation26_spill]] %s4232_s6 }
  0x19   :  { %s4247_s27 = sld [smem:[%s4920_s0 + %s4128_s22]]   ;;  %s4132_s22 = smov 20  }
  0x1a   :  { %s4252_s4 = sld [smem:[%s4920_s0 + %s4129_s28]]   ;;  %s4133_s28 = smov 21  }
  0x1b   :  { %s4257_s6 = sld [smem:[%s4920_s0 + %s4130_s7]]   ;;  %s4134_s7 = smov 22  }
  0x1d   :  { %4974 = sst [smem:[#allocation27_spill]] %s4242_s20 }
  0x1e   :  { %s4262_s20 = sld [smem:[%s4920_s0 + %s4131_s15]]   ;;  %s4135_s15 = smov 23  }
  0x1f   :  { %4975 = sst [smem:[#allocation28_spill]] %s4247_s27 }
  0x20   :  { %4976 = sst [smem:[#allocation29_spill]] %s4252_s4 }
  0x21   :  { %4977 = sst [smem:[#allocation30_spill]] %s4257_s6 }
  0x22   :  { %s4267_s27 = sld [smem:[%s4920_s0 + %s4132_s22]]   ;;  %s4136_s22 = smov 24  }
  0x23   :  { %s4272_s4 = sld [smem:[%s4920_s0 + %s4133_s28]]   ;;  %s4137_s28 = smov 25  }
  0x24   :  { %4978 = sst [smem:[#allocation31_spill]] %s4262_s20 }
  0x25   :  { %s4277_s6 = sld [smem:[%s4920_s0 + %s4134_s7]]   ;;  %s4138_s7 = smov 26  }
  0x26   :  { %s4282_s20 = sld [smem:[%s4920_s0 + %s4135_s15]]   ;;  %s4139_s15 = smov 27  }
  0x27   :  { %s4292_s24 = sld [smem:[%s4920_s0 + %s4137_s28]]   ;;  %s4141_s28 = smov 29  }
  0x28   :  { %4979 = sst [smem:[#allocation32_spill]] %s4267_s27 }
  0x29   :  { %4980 = sst [smem:[#allocation33_spill]] %s4272_s4 }
  0x2a   :  { %s4287_s27 = sld [smem:[%s4920_s0 + %s4136_s22]]   ;;  %s4140_s22 = smov 28  }
  0x2b   :  { %4981 = sst [smem:[#allocation34_spill]] %s4277_s6 }
  0x2c   :  { %4982 = sst [smem:[#allocation35_spill]] %s4282_s20 }
  0x2d   :  { %s4297_s6 = sld [smem:[%s4920_s0 + %s4138_s7]]   ;;  %s4142_s7 = smov 30  }
  0x2e   :  { %s4302_s19 = sld [smem:[%s4920_s0 + %s4139_s15]]  }
  0x2f   :  { %s4312_s30 = sld [smem:[%s4920_s0 + %s4141_s28]]  }
  0x30   :  { %4983 = sst [smem:[#allocation36_spill]] %s4287_s27 }
  0x31   :  { %s4307_s27 = sld [smem:[%s4920_s0 + %s4140_s22]]  }
  0x32   :  { %s4317_s9 = sld [smem:[%s4920_s0 + %s4142_s7]]  }
  0x33   :  { %4984 = sst [smem:[#allocation37_spill]] %s4297_s6 }
  0x38   :  { %4985 = sst [smem:[#allocation38_spill]] %s4317_s9 }
  0x39   :  { %66 = vsyncpa [#allocation3], 0 }
  0x3a   :  { %67 = vsyncpa [#allocation6], 0 }
  0x3b   :  { %68 = vsyncpa [#allocation9], 0 }
  0x3c   :  { %69 = vsyncpa [#allocation12], 0 }
  0x3d   :  { %70 = vsyncpa [#allocation4], 0 }
  0x3e   :  { %72 = vsyncpa [#allocation4 + $0x1], 0  ;;  %s4319_s15 = smov 0   ;;  %s4321_s16 = smov 0  }
  0x3f   :  { %s4323_s18 = smov 0   ;;  %s4325_s22 = smov 0  }
  0x40 LB: > { %s4986_s3 = sld [smem:[#allocation22_spill]]  ;;  %s4340_s0 = sadd.s32 4294967295, %s4111_s22   ;;  %s4099_s15 = sphi %s4319_s15, %s5039_s15   ;;  %s4111_s22 = sphi %s4325_s22, %s5038_s22   ;;  %s4107_s18 = sphi %s4323_s18, %s5041_s18   ;;  %s4103_s16 = sphi %s4321_s16, %s5040_s16  }
  0x41   : > { %s4987_s13 = sld [smem:[#allocation21_spill]]  ;;  %s3440_s23 = sadd.s32 4294967294, %s4111_s22  }
  0x42   : > { %s4988_s6 = sld [smem:[#allocation37_spill]]  ;;  %s4344_s26 = sadd.s32 1, %s4111_s22  }
  0x43   : > { %s4989_s4 = sld [smem:[#allocation33_spill]]  ;;  %s725_s28 = sadd.s32 1, %s4107_s18 }
  0x44   : > { %s4990_s20 = sld [smem:[#allocation35_spill]]  ;;  %s722_s1 = ssub.s32 %s4111_s22, %s4344_s26 }
  0x45   : > { %4991 = sst [smem:[#allocation39_spill]] %s4099_s15  ;;  %p735_p0 = scmp.ne.s32.totalorder %s4107_s18, %s4103_s16 }
  0x46   : > { %4992 = sst [smem:[#allocation40_spill]] %s4103_s16  ;;  %p723_p1 = scmp.eq.s32.totalorder %s722_s1, 0 }
  0x47   : > { %4993 = sst [smem:[#allocation41_spill]] %s4107_s18  ;;  %p736_p2 = scmp.eq.s32.totalorder %s4340_s0, 1 }
  0x48   : > { %4994 = sst [smem:[#allocation42_spill]] %s4111_s22  ;;  %p741_p3 = scmp.ne.s32.totalorder %s4103_s16, %s4099_s15 }
  0x49   : > { %4995 = sst [smem:[#allocation43_spill]] %s4344_s26  ;;  %p742_p4 = scmp.eq.s32.totalorder %s3440_s23, 1 }
  0x4a   : > { %s4355_s2 = scalar_select %p723_p1, %s4107_s18, %s725_s28  }
  0x4b   : > { %p4357_p5 = por %p736_p2, %p735_p0  ;;  %p4361_p6 = por %p742_p4, %p741_p3 }
  0x4c   : > { %4996 = sst [smem:[#allocation44_spill]] %s4355_s2  ;;  %p3441_p7 = scmp.ge.s32.totalorder %s4111_s22, 1 }
  0x4d   : > { %s4997_s7 = scalar_select %p4357_p5, 1, 0 }
  0x4e   : > { %s4999_s10 = scalar_select %p4361_p6, 1, 0 }
  0x4f   : > { %4998 = sst [smem:[#allocation45_spill]] %s4997_s7  ;;  %p749_p8 = scmp.lt.s32.totalorder %s4111_s22, 3 }
  0x50   : > { %5000 = sst [smem:[#allocation46_spill]] %s4999_s10  ;;  %p3650_p9 = scmp.eq.s32.totalorder %s4340_s0, 0 }
  0x51   : > { %p4368_p10 = pnand %p3441_p7, %p749_p8  ;;  %s834_s1 = sshll.u32 %s4990_s20, 4  ;;  %s835_s1 = int_to_ptr.hbm [resolvable:$true] %s834_s1 }
  0x52   : > { %s865_s23 = sshll.u32 %s4988_s6, 4  ;;  %s4143_s2 = smov [#allocation5]   ;;  %s4382_s23 = int_to_ptr.hbm [resolvable:$true] %s865_s23 }
  0x53   : > { %p3627_p11 = pneg %p4368_p10  ;;  %s836_s18 = sshll.u32 %s4143_s2, 4  ;;  %s837_s18 = int_to_ptr.vmem [resolvable:$true] %s836_s18 }
  0x54   : > { %s3853_s26 = sshra.s32 %s835_s1, 4  ;;  %s3860_s22 = scalar_lea.hbm %s4990_s20, 2  ;;  %s3854_s26 = int_to_ptr.hbm [resolvable:$true] %s3853_s26 }
  0x55   : > { %p4378_p12 = pnand %p3650_p9, %p3627_p11  ;;  %s3855_s10 = scalar_lea.hbm %s3854_s26, 2 }
  0x56   : > { %p3856_p13 = scmp.ne.s32.totalorder %s3854_s26, %s3855_s10  ;;  %p3861_p3 = scmp.lt.s32.totalorder %s3854_s26, %s4990_s20 }
  0x57   : > { %p4386_p0 = pneg %p4378_p12  ;;  %p3862_p4 = scmp.lt.s32.totalorder %s3860_s22, %s3855_s10 }
  0x59   : > { %p3858_p1 = pnand %p4386_p0, %p3856_p13  ;;  %p3863_p7 = por %p3862_p4, %p3861_p3 }
  0x5b   : > { %p3859_p2 = pneg %p3858_p1 }
  0x5d   : > { %p3864_p8 = pnand %p3863_p7, %p3859_p2 }
  0x5f   : > { %3867 = shalt.err (!%p3864_p8)
}
  0x60   : > { %s4144_s2 = smov 16   ;;  %s4145_s7 = smov 1  }
  0x61   : > { %3633 = dma.hbm_to_vmem [thread:$0]  (!%p4378_p12), %s835_s1, 32, %s837_s18, [#allocation6], %s4144_s2, %s4144_s2, %s4145_s7  }
  0x62   : > { %s4146_s9 = smov [#allocation8]   ;;  %s817_s26 = sshll.u32 %s4989_s4, 4  ;;  %s4400_s26 = int_to_ptr.hbm [resolvable:$true] %s817_s26 }
  0x63   : > { %s867_s16 = sshll.u32 %s4146_s9, 4  ;;  %s3883_s22 = sshra.s32 %s4382_s23, 4  ;;  %s868_s16 = int_to_ptr.vmem [resolvable:$true] %s867_s16  ;;  %s3884_s22 = int_to_ptr.hbm [resolvable:$true] %s3883_s22 }
  0x64   : > { %s3885_s10 = scalar_lea.hbm %s3884_s22, 2  ;;  %s3890_s20 = scalar_lea.hbm %s4988_s6, 2 }
  0x65   : > { %p3886_p11 = scmp.ne.s32.totalorder %s3884_s22, %s3885_s10  ;;  %p3891_p2 = scmp.lt.s32.totalorder %s3884_s22, %s4988_s6 }
  0x66   : > { %p3892_p3 = scmp.lt.s32.totalorder %s3890_s20, %s3885_s10 }
  0x67   : > { %p3888_p13 = pnand %p3886_p11, %p4386_p0 }
  0x68   : > { %p3893_p4 = por %p3892_p3, %p3891_p2 }
  0x69   : > { %p3889_p1 = pneg %p3888_p13 }
  0x6b   : > { %p3894_p7 = pnand %p3893_p4, %p3889_p1 }
  0x6d   : > { %3897 = shalt.err (!%p3894_p7)
}
  0x6e   : > { %3639 = dma.hbm_to_vmem [thread:$0]  (!%p4378_p12), %s4382_s23, 32, %s868_s16, [#allocation9], %s4144_s2, %s4144_s2, %s4145_s7  }
  0x6f   : > { %s851_s9 = sshll.u32 %s4292_s24, 4  ;;  %s4147_s18 = smov [#allocation2]   ;;  %s4414_s9 = int_to_ptr.hbm [resolvable:$true] %s851_s9 }
  0x70   : > { %s819_s1 = sshll.u32 %s4147_s18, 4  ;;  %s3913_s20 = sshra.s32 %s4400_s26, 4  ;;  %s820_s1 = int_to_ptr.vmem [resolvable:$true] %s819_s1  ;;  %s3914_s20 = int_to_ptr.hbm [resolvable:$true] %s3913_s20 }
  0x71   : > { %s3915_s22 = scalar_lea.hbm %s3914_s20, 2  ;;  %s3920_s10 = scalar_lea.hbm %s4989_s4, 2 }
  0x72   : > { %p3916_p8 = scmp.ne.s32.totalorder %s3914_s20, %s3915_s22  ;;  %p3921_p1 = scmp.lt.s32.totalorder %s3914_s20, %s4989_s4 }
  0x73   : > { %p3922_p2 = scmp.lt.s32.totalorder %s3920_s10, %s3915_s22 }
  0x74   : > { %p3918_p11 = pnand %p3916_p8, %p4386_p0 }
  0x75   : > { %p3923_p3 = por %p3922_p2, %p3921_p1 }
  0x76   : > { %p3919_p13 = pneg %p3918_p11 }
  0x78   : > { %p3924_p4 = pnand %p3923_p3, %p3919_p13 }
  0x7a   : > { %3927 = shalt.err (!%p3924_p4)
}
  0x7b   : > { %3630 = dma.hbm_to_vmem [thread:$0]  (!%p4378_p12), %s4400_s26, 32, %s820_s1, [#allocation3], %s4144_s2, %s4144_s2, %s4145_s7  }
  0x7c   : > { %s4148_s16 = smov [#allocation7]   ;;  %s879_s18 = sshll.u32 %s4302_s19, 4  ;;  %s4428_s18 = int_to_ptr.hbm [resolvable:$true] %s879_s18 }
  0x7d   : > { %s853_s23 = sshll.u32 %s4148_s16, 4  ;;  %s3943_s20 = sshra.s32 %s4414_s9, 4  ;;  %s854_s23 = int_to_ptr.vmem [resolvable:$true] %s853_s23  ;;  %s3944_s20 = int_to_ptr.hbm [resolvable:$true] %s3943_s20 }
  0x7e   : > { %s3945_s22 = scalar_lea.hbm %s3944_s20, 2  ;;  %s3950_s10 = scalar_lea.hbm %s4292_s24, 2 }
  0x7f   : > { %p3946_p7 = scmp.ne.s32.totalorder %s3944_s20, %s3945_s22  ;;  %p3951_p13 = scmp.lt.s32.totalorder %s3944_s20, %s4292_s24 }
  0x80   : > { %p3952_p1 = scmp.lt.s32.totalorder %s3950_s10, %s3945_s22 }
  0x81   : > { %p3948_p8 = pnand %p3946_p7, %p4386_p0 }
  0x82   : > { %p3953_p2 = por %p3952_p1, %p3951_p13 }
  0x83   : > { %p3949_p11 = pneg %p3948_p8 }
  0x85   : > { %p3954_p3 = pnand %p3953_p2, %p3949_p11 }
  0x87   : > { %3957 = shalt.err (!%p3954_p3)
}
  0x88   : > { %3636 = dma.hbm_to_vmem [thread:$0]  (!%p4378_p12), %s4414_s9, 32, %s854_s23, [#allocation6], %s4144_s2, %s4144_s2, %s4145_s7  }
  0x89   : > { %s897_s26 = sshll.u32 %s4312_s30, 4  ;;  %s4149_s1 = smov [#allocation10]   ;;  %s4442_s26 = int_to_ptr.hbm [resolvable:$true] %s897_s26 }
  0x8a   : > { %s881_s16 = sshll.u32 %s4149_s1, 4  ;;  %s3973_s20 = sshra.s32 %s4428_s18, 4  ;;  %s882_s16 = int_to_ptr.vmem [resolvable:$true] %s881_s16  ;;  %s3974_s20 = int_to_ptr.hbm [resolvable:$true] %s3973_s20 }
  0x8b   : > { %s3975_s22 = scalar_lea.hbm %s3974_s20, 2  ;;  %s3980_s10 = scalar_lea.hbm %s4302_s19, 2 }
  0x8c   : > { %p3976_p4 = scmp.ne.s32.totalorder %s3974_s20, %s3975_s22  ;;  %p3981_p11 = scmp.lt.s32.totalorder %s3974_s20, %s4302_s19 }
  0x8d   : > { %p3982_p13 = scmp.lt.s32.totalorder %s3980_s10, %s3975_s22 }
  0x8e   : > { %p3978_p7 = pnand %p3976_p4, %p4386_p0 }
  0x8f   : > { %p3983_p1 = por %p3982_p13, %p3981_p11 }
  0x90   : > { %p3979_p8 = pneg %p3978_p7 }
  0x92   : > { %p3984_p2 = pnand %p3983_p1, %p3979_p8 }
  0x94   : > { %3987 = shalt.err (!%p3984_p2)
}
  0x95   : > { %3642 = dma.hbm_to_vmem [thread:$0]  (!%p4378_p12), %s4428_s18, 32, %s882_s16, [#allocation9], %s4144_s2, %s4144_s2, %s4145_s7  }
  0x96   : > { %s4150_s9 = smov [#allocation11]   ;;  %s4003_s1 = sshra.s32 %s4442_s26, 4  ;;  %s4004_s1 = int_to_ptr.hbm [resolvable:$true] %s4003_s1 }
  0x97   : > { %s899_s23 = sshll.u32 %s4150_s9, 4  ;;  %s4005_s20 = scalar_lea.hbm %s4004_s1, 1  ;;  %s900_s23 = int_to_ptr.vmem [resolvable:$true] %s899_s23 }
  0x98   : > { %p4006_p3 = scmp.ne.s32.totalorder %s4004_s1, %s4005_s20  ;;  %s4010_s22 = scalar_lea.hbm %s4312_s30, 1 }
  0x99   : > { %p4011_p8 = scmp.lt.s32.totalorder %s4004_s1, %s4312_s30  ;;  %p4012_p11 = scmp.lt.s32.totalorder %s4010_s22, %s4005_s20 }
  0x9a   : > { %p4008_p4 = pnand %p4006_p3, %p4386_p0 }
  0x9b   : > { %p4013_p13 = por %p4012_p11, %p4011_p8 }
  0x9c   : > { %p4009_p7 = pneg %p4008_p4 }
  0x9e   : > { %p4014_p1 = pnand %p4013_p13, %p4009_p7 }
  0xa0   : > { %4017 = shalt.err (!%p4014_p1)
}
  0xa1   : > { %3645 = dma.hbm_to_vmem [thread:$0]  (!%p4378_p12), %s4442_s26, 16, %s900_s23, [#allocation12]  }
  0xa2   : > { %926 = sbr.rel (%p4368_p10) target bundleno = 7436 (0x1d0c), region = 140 }
  0xa7   : > { %4078 = dma.done.wait (%p3650_p9), [#allocation3], 32  }
  0xa8   : > { %4080 = vsyncadd (%p3650_p9), [#allocation3], 4294967264 }
  0xa9   : > { %4082 = dma.done.wait (%p3650_p9), [#allocation6], 64  }
  0xaa   : > { %4084 = vsyncadd (%p3650_p9), [#allocation6], 4294967232 }
  0xab   : > { %4086 = dma.done.wait (%p3650_p9), [#allocation9], 64  }
  0xac   : > { %4088 = vsyncadd (%p3650_p9), [#allocation9], 4294967232 }
  0xad   : > { %4090 = dma.done.wait (%p3650_p9), [#allocation12], 16  }
  0xae   : > { %4092 = vsyncadd (%p3650_p9), [#allocation12], 4294967280  ;;  %s5004_s5 = sld [smem:[#allocation19_spill]]  ;;  %p1033_p10 = scmp.lt.s32.totalorder %s4340_s0, 1  ;;  %v1051_v0 = vld [vmem:[%s4187_s21 + $0x18] sm:$0xff]  ;;  %v1050_v1 = vld [vmem:[%s4187_s21 + $0x10] sm:$0xff]  ;;  %v1136_v26 = vlaneseq }
  0xaf   : > { %1105 = vmatpush.msra.mxu3 %v1051_v0  ;;  %v1046_v2 = vld [vmem:[%s4987_s13 + $0x18] sm:$0xff]  ;;  %v1049_v3 = vld [vmem:[%s4187_s21 + $0x8] sm:$0xff]  ;;  %v1048_v4 = vld [vmem:[%s4187_s21] sm:$0xff]  ;;  %vm1066_vm0 = vcmask 261120   ;;  %vm1142_vm1 = vcmask 64512   ;;  %s4948_s28 = smov 112  }
  0xb0   : > { %s4483_s15 = scalar_select %p1033_p10, %s4340_s0, 1  ;;  %1082 = vmatpush.msra.mxu0 %v1046_v2  ;;  %v1045_v5 = vld [vmem:[%s4987_s13 + $0x10] sm:$0xff]  ;;  %v1044_v7 = vld [vmem:[%s4987_s13 + $0x8] sm:$0xff]  ;;  %v1056_v8 = vld [vmem:[%s4197_s29 + $0x18] sm:$0xff]  ;;  %v1137_v27 = vshrl.u32 %v1136_v26, 7  ;;  %v1139_v28 = vand.u32 127, %v1136_v26 }
  0xb1   : > { %1106 = vmatpush.msra.mxu3 %v1050_v1  ;;  %v1055_v9 = vld [vmem:[%s4197_s29 + $0x10] sm:$0xff]  ;;  %v1043_v10 = vld [vmem:[%s4987_s13] sm:$0xff]  ;;  %1128 = vmatpush.msra.mxu2 %v1056_v8  ;;  %v1054_v11 = vld [vmem:[%s4197_s29 + $0x8] sm:$0xff]  ;;  %s4952_s2 = smov 120   ;;  %s4950_s18 = smov 104  }
  0xb2   : > { %s3457_s7 = sshll.u32 %s4483_s15, 3  ;;  %1083 = vmatpush.msra.mxu0 %v1045_v5  ;;  %v1053_v12 = vld [vmem:[%s4197_s29] sm:$0xff]  ;;  %vm1140_vm2 = vcmp.ge.s32.totalorder %v1137_v27, %v1139_v28  ;;  %v4154_v30 = vmov -1e+30   ;;  %s4944_s26 = smov 16  }
  0xb3   : > { %1107 = vmatpush.msra.mxu3 %v1049_v3  ;;  %1129 = vmatpush.msra.mxu2 %v1055_v9  ;;  %v3741_v13 = vld [vmem:[%s4192_s25] ss:$0 sm:$0xff]  ;;  %v4531_v31 = vsel %vm1140_vm2, 0.0, %v4154_v30  ;;  %s4954_s16 = smov 8   ;;  %s4946_s10 = smov 24  }
  0xb4   : > { %s1036_s11 = scalar_lea.vmem %s5004_s5, %s3457_s7  ;;  %1084 = vmatpush.msra.mxu0 %v1044_v7  ;;  %v3742_v14 = vld [vmem:[%s4182_s17] ss:$0 sm:$0xff]  ;;  %s5005_s9 = sld [smem:[#allocation20_spill]] }
  0xb5   : > { %v4493_v6 = vld [vmem:[%s1036_s11] sm:$0xff]  ;;  %1108 = vmatpush.msra.mxu3 %v1048_v4  ;;  %1130 = vmatpush.msra.mxu2 %v1054_v11  ;;  %s5006_s23 = sld [smem:[#allocation25_spill]]  ;;  %s3458_s1 = sshll.u32 %s4483_s15, 2 }
  0xb6   : > { %3460 = vmatmul.msk.f32.vlgmr.msra.gmra.mxu3 %vm1066_vm0, %v4493_v6  ;;  %1085 = vmatpush.msra.mxu0 %v1043_v10  ;;  %v3743_v19 = vld [vmem:[%s4986_s3] ss:$0 sm:$0xff]  ;;  %s5007_s22 = sld [smem:[#allocation23_spill]] }
  0xb7   : > { %3459 = vmatmul.msk.f32.vlgmr.msra.gmra.mxu0 %vm1066_vm0, %v4493_v6  ;;  %1131 = vmatpush.msra.mxu2 %v1053_v12  ;;  %s5009_s15 = sld [smem:[#allocation24_spill]] }
  0xb8   : > { %3461 = vmatmul.msk.f32.vlgmr.msra.gmra.mxu2 %vm1066_vm0, %v4493_v6 }
  0xba   : > { %s4583_s20 = scalar_lea.vmem %s5005_s9, %s3458_s1  ;;  %s5011_s9 = sld [smem:[#allocation27_spill]] }
  0xbb   : > { %s5012_s1 = sld [smem:[#allocation26_spill]] }
  0xbc   : > { %s5008_s7 = smov %s5007_s22 }
  0xbd   : > { %s5010_s11 = smov %s5009_s15 }
 0x134   : > { %v1087_v16 = vpop.f32.mrf.mxu0 }
 0x135   : > { %v1088_v18 = vadd.f32 %v3742_v14, %v1087_v16 }
 0x139   : > { %v1110_v15 = vpop.f32.mrf.mxu3 }
 0x13a   : > { %v4509_v17 = vadd.f32 %v3741_v13, %v1110_v15 }
 0x13b   : > { %v1133_v20 = vpop.f32.mrf.mxu2 }
 0x13c   : > { %1301 = vrot.lane.b32.xlu2 %v4509_v17, %s4948_s28  ;;  %1220 = vrot.lane.b32.xlu0 %v4509_v17, %s4952_s2  ;;  %v4522_v21 = vadd.f32 %v3743_v19, %v1133_v20 }
 0x13d   : > { %3462 = vmatpush.xpose.msk.msrb.mxu3 %vm1142_vm1, %v4509_v17 }
 0x140   : > { %3463 = vmatmul.msk.f32.vlgmr.msrb.gmra.mxu3 %vm1142_vm1, %v1088_v18 }
 0x141   : > { %1213 = vmatpush.msra.mxu3 %v4522_v21 }
 0x144   : > { %1299 = vrot.lane.b32.xlu2 %v1088_v18, %s4948_s28  ;;  %1218 = vrot.lane.b32.xlu0 %v1088_v18, %s4952_s2 }
 0x14c   : > { %1379 = vrot.lane.b32.xlu2 %v1088_v18, %s4950_s18  ;;  %1273 = vrot.lane.b32.xlu0 %v4522_v21, %s4952_s2 }
 0x196   : > { %v1302_v22 = vpop.permute.xlu2 %1301 }
 0x197   : > { %3468 = vmatpush.xpose.msk.msrb.mxu2 %vm1142_vm1, %v1302_v22 }
 0x19e   : > { %v1300_v23 = vpop.permute.xlu2 %1299 }
 0x19f   : > { %3469 = vmatmul.msk.f32.vlgmr.msrb.gmra.mxu2 %vm1142_vm1, %v1300_v23 }
 0x1a6   : > { %v4540_v49 = vpop.permute.xlu2 %1379 }
 0x1ae   : > { %v1221_v24 = vpop.permute.xlu0 %1220 }
 0x1af   : > { %3465 = vmatpush.xpose.msk.msrb.mxu0 %vm1142_vm1, %v1221_v24 }
 0x1b6   : > { %v1219_v25 = vpop.permute.xlu0 %1218 }
 0x1b7   : > { %3466 = vmatmul.msk.f32.vlgmr.msrb.gmra.mxu0 %vm1142_vm1, %v1219_v25 }
 0x1be   : > { %v1274_v35 = vpop.permute.xlu0 %1273 }
 0x1bf   : > { %1294 = vmatpush.msra.mxu0 %v1274_v35 }
 0x1c3   : > { %v1166_v29 = vpop.f32.mrf.mxu3 }
 0x1c4   : > { %v1169_v32 = vmul.f32 0.35355338, %v1166_v29 }
 0x1c6   : > { %v1170_v33 = vadd.f32 %v1169_v32, %v4531_v31 }
 0x1c8   : > { %v1171_v34 = vsel %vm1142_vm1, %v1170_v33, -inf }
 0x1c9   : > { %1172 = vmax.xlane.f32.xlu0 %v1171_v34 }
 0x222   : > { %v1324_v36 = vpop.f32.mrf.mxu2 }
 0x223   : > { %v1327_v37 = vmul.f32 0.35355338, %v1324_v36 }
 0x225   : > { %v1328_v38 = vadd.f32 %v1327_v37, %v4531_v31 }
 0x227   : > { %v1329_v39 = vsel %vm1142_vm1, %v1328_v38, -inf }
 0x228   : > { %1330 = vmax.xlane.f32.xlu2 %v1329_v39 }
 0x234   : > { %v1243_v40 = vpop.f32.mrf.mxu0 }
 0x235   : > { %v1246_v41 = vmul.f32 0.35355338, %v1243_v40 }
 0x237   : > { %v1247_v42 = vadd.f32 %v1246_v41, %v4531_v31 }
 0x239   : > { %v1248_v43 = vsel %vm1142_vm1, %v1247_v42, -inf }
 0x23a   : > { %1249 = vmax.xlane.f32.xlu1 %v1248_v43 }
 0x23c   : > { %v1173_v44 = vpop.xlane.xlu0 %1172 }
 0x23d   : > { %v1174_v45 = vsub.f32 %v1170_v33, %v1173_v44 }
 0x23f   : > { %v1175_v46 = vmul.f32 1.442695, %v1174_v45 }
 0x241   : > { %3774 = vpow2.f32 %v1175_v46 }
 0x247   : > { %v3775_v47 = vpop.eup %3774 }
 0x248   : > { %v1177_v48 = vsel %vm1142_vm1, %v3775_v47, 0.0 }
 0x249   : > { %1178 = vadd.xlane.f32.xlu2 %v1177_v48 }
 0x29b   : > { %v1331_v50 = vpop.xlane.xlu2 %1330 }
 0x29c   : > { %v1332_v51 = vsub.f32 %v1328_v38, %v1331_v50 }
 0x29e   : > { %v1333_v52 = vmul.f32 1.442695, %v1332_v51 }
 0x2a0   : > { %3776 = vpow2.f32 %v1333_v52 }
 0x2a6   : > { %v3777_v53 = vpop.eup %3776 }
 0x2a7   : > { %v1335_v54 = vsel %vm1142_vm1, %v3777_v53, 0.0 }
 0x2a8   : > { %1336 = vadd.xlane.f32.xlu0 %v1335_v54 }
 0x2ad   : > { %v1250_v55 = vpop.xlane.xlu1 %1249 }
 0x2ae   : > { %v1251_v56 = vsub.f32 %v1247_v42, %v1250_v55 }
 0x2b0   : > { %v1252_v57 = vmul.f32 1.442695, %v1251_v56 }
 0x2b2   : > { %3778 = vpow2.f32 %v1252_v57 }
 0x2b8   : > { %v3779_v58 = vpop.eup %3778 }
 0x2b9   : > { %v1254_v59 = vsel %vm1142_vm1, %v3779_v58, 0.0 }
 0x2ba   : > { %1255 = vadd.xlane.f32.xlu1 %v1254_v59 }
 0x2bc   : > { %v1179_v60 = vpop.xlane.xlu2 %1178  ;;  %1353 = vrot.lane.b32.xlu0 %v4522_v21, %s4948_s28 }
 0x2bd   : > { %3780 = vrcp.f32 %v1179_v60  ;;  %v1191_v0 = vand.u32 2147483648, %v1179_v60  ;;  %v1189_v2 = vand.u32 2147483647, %v1179_v60  ;;  %vm1185_vm4 = vweird.f32 %v1179_v60 }
 0x2bf   : > { %v1192_v4 = vor.u32 1.1754944e-38, %v1191_v0  ;;  %vm1190_vm6 = vcmp.eq.f32.partialorder %v1189_v2, 8.507059e+37 }
 0x2c3   : > { %v3781_v61 = vpop.eup %3780 }
 0x2c4   : > { %v1181_v62 = vmul.f32 %v3781_v61, %v1179_v60  ;;  %vm1186_vm3 = vweird.f32 %v3781_v61 }
 0x2c5   : > { %vm1187_vm5 = vmor %vm1185_vm4, %vm1186_vm3 }
 0x2c6   : > { %v1182_v63 = vsub.f32 1.0, %v1181_v62  ;;  %v1060_v62 = vld [vmem:[%s4207_s8 + $0x10] sm:$0xff] }
 0x2c8   : > { %v1183_v1 = vmul.f32 %v3781_v61, %v1182_v63  ;;  %v1059_v63 = vld [vmem:[%s4207_s8 + $0x8] sm:$0xff] }
 0x2ca   : > { %v1184_v3 = vadd.f32 %v3781_v61, %v1183_v1  ;;  %v1058_v1 = vld [vmem:[%s4207_s8] sm:$0xff] }
 0x2cc   : > { %v1188_v5 = vsel %vm1187_vm5, %v3781_v61, %v1184_v3  ;;  %v1061_v61 = vld [vmem:[%s4207_s8 + $0x18] sm:$0xff]  ;;  %vm1472_vm5 = vcmask 130048  }
 0x2cd   : > { %v1193_v7 = vsel %vm1190_vm6, %v1192_v4, %v1188_v5  ;;  %1494 = vmatpush.msra.mxu2 %v1061_v61  ;;  %vm1474_vm6 = vcmask 195584  }
 0x2ce   : > { %v1194_v8 = vmul.f32 %v3775_v47, %v1193_v7 }
 0x2cf   : > { %1495 = vmatpush.msra.mxu2 %v1060_v62 }
 0x2d0   : > { %3464 = vmatmul.msk.f32.vlgmr.msra.gmra.mxu3 %vm1142_vm1, %v1194_v8 }
 0x2d1   : > { %1496 = vmatpush.msra.mxu2 %v1059_v63 }
 0x2d3   : > { %1381 = vrot.lane.b32.xlu1 %v4509_v17, %s4950_s18  ;;  %1497 = vmatpush.msra.mxu2 %v1058_v1 }
 0x31b   : > { %v1337_v9 = vpop.xlane.xlu0 %1336 }
 0x31c   : > { %3782 = vrcp.f32 %v1337_v9  ;;  %v1349_v13 = vand.u32 2147483648, %v1337_v9  ;;  %v1347_v15 = vand.u32 2147483647, %v1337_v9  ;;  %vm1343_vm8 = vweird.f32 %v1337_v9 }
 0x31e   : > { %v1350_v18 = vor.u32 1.1754944e-38, %v1349_v13  ;;  %vm1348_vm10 = vcmp.eq.f32.partialorder %v1347_v15, 8.507059e+37 }
 0x322   : > { %v3783_v10 = vpop.eup %3782 }
 0x323   : > { %v1339_v11 = vmul.f32 %v3783_v10, %v1337_v9  ;;  %vm1344_vm7 = vweird.f32 %v3783_v10  ;;  %v3744_v9 = vld [vmem:[%s4212_s14] ss:$0 sm:$0xff] }
 0x324   : > { %vm1345_vm9 = vmor %vm1343_vm8, %vm1344_vm7 }
 0x325   : > { %v1340_v12 = vsub.f32 1.0, %v1339_v11 }
 0x327   : > { %v1341_v14 = vmul.f32 %v3783_v10, %v1340_v12 }
 0x329   : > { %v1342_v16 = vadd.f32 %v3783_v10, %v1341_v14  ;;  %v4158_v14 = vmov 32.0  }
 0x32b   : > { %v1346_v19 = vsel %vm1345_vm9, %v3783_v10, %v1342_v16 }
 0x32c   : > { %v1351_v20 = vsel %vm1348_vm10, %v1350_v18, %v1346_v19 }
 0x32d   : > { %v1256_v22 = vpop.xlane.xlu1 %1255  ;;  %v1352_v23 = vmul.f32 %v3777_v53, %v1351_v20 }
 0x32e   : > { %3784 = vrcp.f32 %v1256_v22  ;;  %v1354_v17 = vpop.permute.xlu0 %1353  ;;  %v1268_v27 = vand.u32 2147483648, %v1256_v22  ;;  %v1266_v29 = vand.u32 2147483647, %v1256_v22  ;;  %vm1262_vm12 = vweird.f32 %v1256_v22 }
 0x32f   : > { %1374 = vmatpush.msrb.mxu3 %v1354_v17 }
 0x330   : > { %3470 = vmatmul.msk.f32.vlgmr.msrb.gmra.mxu3 %vm1142_vm1, %v1352_v23  ;;  %v1269_v32 = vor.u32 1.1754944e-38, %v1268_v27  ;;  %vm1267_vm14 = vcmp.eq.f32.partialorder %v1266_v29, 8.507059e+37  ;;  %v1549_v27 = vld [vmem:[%s4237_s12 + $0x10] sm:$0xff]  ;;  %v1547_v29 = vld [vmem:[%s4237_s12] sm:$0xff] }
 0x334   : > { %v3785_v24 = vpop.eup %3784 }
 0x335   : > { %v1258_v25 = vmul.f32 %v3785_v24, %v1256_v22  ;;  %vm1263_vm11 = vweird.f32 %v3785_v24 }
 0x336   : > { %vm1264_vm13 = vmor %vm1262_vm12, %vm1263_vm11  ;;  %vm1664_vm11 = vcmask 31744   ;;  %vm1692_vm12 = vcmask 1043456  }
 0x337   : > { %v1259_v26 = vsub.f32 1.0, %v1258_v25 }
 0x339   : > { %v1260_v28 = vmul.f32 %v3785_v24, %v1259_v26  ;;  %v1550_v26 = vld [vmem:[%s4237_s12 + $0x18] sm:$0xff] }
 0x33b   : > { %v1261_v30 = vadd.f32 %v3785_v24, %v1260_v28  ;;  %v1548_v28 = vld [vmem:[%s4237_s12 + $0x8] sm:$0xff] }
 0x33d   : > { %v1265_v33 = vsel %vm1264_vm13, %v3785_v24, %v1261_v30  ;;  %v4587_v30 = vld [vmem:[%s4583_s20] sm:$0xf] }
 0x33e   : > { %v1270_v34 = vsel %vm1267_vm14, %v1269_v32, %v1265_v33  ;;  %v1545_v32 = vld [vmem:[%s5006_s23 + $0x18] sm:$0xff]  ;;  %v1544_v33 = vld [vmem:[%s5006_s23 + $0x10] sm:$0xff] }
 0x33f   : > { %v1271_v35 = vmul.f32 %v3779_v58, %v1270_v34  ;;  %1580 = vmatpush.msra.mxu3 %v1545_v32  ;;  %v1543_v34 = vld [vmem:[%s5006_s23 + $0x8] sm:$0xff] }
 0x341   : > { %3467 = vmatmul.msk.f32.vlgmr.msra.gmra.mxu0 %vm1142_vm1, %v1271_v35  ;;  %1581 = vmatpush.msra.mxu3 %v1544_v33  ;;  %v1542_v35 = vld [vmem:[%s5006_s23] sm:$0xff] }
 0x343   : > { %1582 = vmatpush.msra.mxu3 %v1543_v34 }
 0x345   : > { %v1382_v36 = vpop.permute.xlu1 %1381  ;;  %1583 = vmatpush.msra.mxu3 %v1542_v35 }
 0x346   : > { %3471 = vmatpush.xpose.msk.msrb.mxu0 %vm1142_vm1, %v1382_v36 }
 0x349   : > { %3472 = vmatmul.msk.f32.vlgmr.msrb.gmra.mxu0 %vm1142_vm1, %v4540_v49 }
 0x34a   : > { %1606 = vmatpush.msra.mxu0 %v1550_v26 }
 0x34c   : > { %1607 = vmatpush.msra.mxu0 %v1549_v27 }
 0x34e   : > { %1608 = vmatpush.msra.mxu0 %v1548_v28 }
 0x350   : > { %1609 = vmatpush.msra.mxu0 %v1547_v29 }
 0x351   : > { %3476 = vmatmul.msk.f32.vlgmr.msra.gmra.mxu0 %vm1066_vm0, %v4587_v30 }
 0x353   : > { %v1215_v37 = vpop.f32.mrf.mxu3 }
 0x3b3   : > { %v1376_v38 = vpop.f32.mrf.mxu3 }
 0x3b4   : > { %1464 = vrot.lane.b32.xlu0 %v1376_v38, %s4944_s26 }
 0x3be   : > { %v1296_v39 = vpop.f32.mrf.mxu0 }
 0x3c6   : > { %v1404_v40 = vpop.f32.mrf.mxu0 }
 0x3c7   : > { %v1407_v41 = vmul.f32 0.35355338, %v1404_v40 }
 0x3c9   : > { %v1408_v42 = vadd.f32 %v1407_v41, %v4531_v31 }
 0x3cb   : > { %v1409_v43 = vsel %vm1142_vm1, %v1408_v42, -inf }
 0x3cc   : > { %1410 = vmax.xlane.f32.xlu1 %v1409_v43 }
 0x3e5   : > { %1460 = vrot.lane.b32.xlu1 %v1296_v39, %s4954_s16 }
 0x426   : > { %v1465_v2 = vpop.permute.xlu0 %1464 }
 0x43f   : > { %v1411_v44 = vpop.xlane.xlu1 %1410 }
 0x440   : > { %v1412_v45 = vsub.f32 %v1408_v42, %v1411_v44 }
 0x442   : > { %v1413_v46 = vmul.f32 1.442695, %v1412_v45  ;;  %v3745_v45 = vld [vmem:[%s5007_s22] ss:$0 sm:$0xff]  ;;  %s5013_s22 = sld [smem:[#allocation28_spill]] }
 0x444   : > { %3786 = vpow2.f32 %v1413_v46 }
 0x448   : > { %s5014_s26 = smov %s5013_s22  ;;  %v1555_v1 = vld [vmem:[%s5013_s22 + $0x18] sm:$0xff]  ;;  %s5017_s22 = sld [smem:[#allocation30_spill]] }
 0x44a   : > { %v3787_v47 = vpop.eup %3786 }
 0x44b   : > { %v1415_v48 = vsel %vm1142_vm1, %v3787_v47, 0.0 }
 0x44c   : > { %1416 = vadd.xlane.f32.xlu2 %v1415_v48  ;;  %v3746_v48 = vld [vmem:[%s5009_s15] ss:$0 sm:$0xff]  ;;  %s5015_s15 = sld [smem:[#allocation29_spill]] }
 0x457   : > { %v1461_v3 = vpop.permute.xlu1 %1460 }
 0x458   : > { %v1471_v4 = vsel %vm1142_vm1, %v1215_v37, %v1461_v3  ;;  %v1553_v3 = vld [vmem:[%s5014_s26 + $0x8] sm:$0xff] }
 0x459   : > { %v1473_v5 = vsel %vm1472_vm5, %v1471_v4, %v1465_v2  ;;  %v1554_v2 = vld [vmem:[%s5014_s26 + $0x10] sm:$0xff]  ;;  %v1552_v4 = vld [vmem:[%s5014_s26] sm:$0xff] }
 0x464   : > { %1433 = vrot.lane.b32.xlu2 %v4522_v21, %s4950_s18 }
 0x4bf   : > { %v1417_v49 = vpop.xlane.xlu2 %1416 }
 0x4c0   : > { %3788 = vrcp.f32 %v1417_v49  ;;  %v1429_v54 = vand.u32 2147483648, %v1417_v49  ;;  %v1427_v56 = vand.u32 2147483647, %v1417_v49  ;;  %vm1423_vm2 = vweird.f32 %v1417_v49 }
 0x4c1   : > { %3790 = vrcp.f32 %v4158_v14 }
 0x4c2   : > { %v1430_v58 = vor.u32 1.1754944e-38, %v1429_v54  ;;  %vm1428_vm4 = vcmp.eq.f32.partialorder %v1427_v56, 8.507059e+37  ;;  %v3748_v54 = vld [vmem:[%s5012_s1] ss:$0 sm:$0xff] }
 0x4c6   : > { %v3789_v50 = vpop.eup %3788 }
 0x4c7   : > { %v1419_v51 = vmul.f32 %v3789_v50, %v1417_v49  ;;  %v1434_v52 = vpop.permute.xlu2 %1433  ;;  %vm1424_vm15 = vweird.f32 %v3789_v50  ;;  %v3791_v15 = vpop.eup %3790 }
 0x4c8   : > { %1454 = vmatpush.msra.mxu1 %v1434_v52  ;;  %vm1425_vm3 = vmor %vm1423_vm2, %vm1424_vm15  ;;  %v1509_v16 = vmul.f32 32.0, %v3791_v15  ;;  %vm1513_vm7 = vweird.f32 %v3791_v15  ;;  %v1611_v52 = vpop.f32.mrf.mxu0 }
 0x4c9   : > { %v1420_v53 = vsub.f32 1.0, %v1419_v51  ;;  %v3747_v51 = vld [vmem:[%s5011_s9] ss:$0 sm:$0xff] }
 0x4ca   : > { %v1510_v18 = vsub.f32 1.0, %v1509_v16  ;;  %1629 = vmatpush.msrb.mxu1 %v1555_v1 }
 0x4cb   : > { %v1421_v55 = vmul.f32 %v3789_v50, %v1420_v53  ;;  %v1612_v53 = vadd.f32 %v3747_v51, %v1611_v52 }
 0x4cc   : > { %v1511_v19 = vmul.f32 %v3791_v15, %v1510_v18  ;;  %1630 = vmatpush.msrb.mxu1 %v1554_v2 }
 0x4cd   : > { %v1422_v57 = vadd.f32 %v3789_v50, %v1421_v55  ;;  %3478 = vmatpush.xpose.msk.msrb.mxu2 %vm1142_vm1, %v1612_v53 }
 0x4ce   : > { %v1512_v20 = vadd.f32 %v3791_v15, %v1511_v19  ;;  %1631 = vmatpush.msrb.mxu1 %v1553_v3 }
 0x4cf   : > { %v1426_v21 = vsel %vm1425_vm3, %v3789_v50, %v1422_v57 }
 0x4d0   : > { %v1431_v59 = vsel %vm1428_vm4, %v1430_v58, %v1426_v21  ;;  %v4574_v22 = vsel %vm1513_vm7, %v3791_v15, %v1512_v20  ;;  %1632 = vmatpush.msrb.mxu1 %v1552_v4 }
 0x4d1   : > { %v1432_v60 = vmul.f32 %v3787_v47, %v1431_v59 }
 0x4d3   : > { %3473 = vmatmul.msk.f32.vlgmr.msra.gmra.mxu1 %vm1142_vm1, %v1432_v60 }
 0x4db   : > { %3477 = vmatmul.msk.f32.vlgmr.msrb.gmra.mxu1 %vm1066_vm0, %v4587_v30 }
 0x550   : > { %v1456_v0 = vpop.f32.mrf.mxu1 }
 0x551   : > { %1468 = vrot.lane.b32.xlu0 %v1456_v0, %s4946_s10  ;;  %s5016_s10 = smov %s5015_s15 }
 0x559   : > { %1798 = vrot.lane.b32.xlu0 %v1612_v53, %s4948_s28 }
 0x561   : > { %1718 = vrot.lane.b32.xlu0 %v1612_v53, %s4952_s2 }
 0x5c3   : > { %v1469_v7 = vpop.permute.xlu0 %1468 }
 0x5c4   : > { %v1475_v8 = vsel %vm1474_vm6, %v1473_v5, %v1469_v7 }
 0x5c5   : > { %3474 = vmatmul.msk.f32.vlgmr.msra.gmra.mxu2 %vm1066_vm0, %v1475_v8 }
 0x5cb   : > { %v1799_v57 = vpop.permute.xlu0 %1798 }
 0x5cc   : > { %3486 = vmatpush.xpose.msk.msra.mxu2 %vm1142_vm1, %v1799_v57 }
 0x5d3   : > { %v1719_v58 = vpop.permute.xlu0 %1718 }
 0x5d4   : > { %3482 = vmatpush.xpose.msk.msrb.mxu0 %vm1142_vm1, %v1719_v58 }
 0x648   : > { %v1499_v10 = vpop.f32.mrf.mxu2 }
 0x649   : > { %v1500_v11 = vadd.f32 %v3744_v9, %v1499_v10 }
 0x64b   : > { %v1502_v12 = vadd.f32 %v1500_v11, %v4493_v6 }
 0x64d   : > { %v1505_v13 = vsel %vm1066_vm0, %v1502_v12, 0.0 }
 0x64e   : > { %1506 = vadd.xlane.f32.xlu2 %v1505_v13 }
 0x6c1   : > { %v1507_v6 = vpop.xlane.xlu2 %1506 }
 0x6c2   : > { %v1515_v23 = vmul.f32 %v4574_v22, %v1507_v6  ;;  %v3749_v6 = vld [vmem:[%s5015_s15] ss:$0 sm:$0xff]  ;;  %s5019_s15 = smov 24  }
 0x6c4   : > { %v1516_v17 = vsub.f32 %v1502_v12, %v1515_v23  ;;  %v1634_v23 = vpop.f32.mrf.mxu1 }
 0x6c6   : > { %v1517_v24 = vmul.f32 %v1516_v17, %v1516_v17 }
 0x6c8   : > { %v1518_v25 = vsel %vm1066_vm0, %v1517_v24, 0.0 }
 0x6c9   : > { %1519 = vadd.xlane.f32.xlu1 %v1518_v25 }
 0x73c   : > { %v1520_v36 = vpop.xlane.xlu1 %1519 }
 0x73d   : > { %v1521_v37 = vmul.f32 %v1520_v36, %v4574_v22 }
 0x73f   : > { %v1522_v38 = vadd.f32 1e-05, %v1521_v37 }
 0x741   : > { %3792 = vrsqrt.f32 %v1522_v38  ;;  %vm1529_vm9 = vweird.f32 %v1522_v38 }
 0x747   : > { %v3793_v39 = vpop.eup %3792 }
 0x748   : > { %v1524_v40 = vmul.f32 %v3793_v39, %v1522_v38  ;;  %vm1530_vm8 = vweird.f32 %v3793_v39 }
 0x749   : > { %vm1531_vm10 = vmor %vm1529_vm9, %vm1530_vm8 }
 0x74a   : > { %v1525_v41 = vmul.f32 %v3793_v39, %v1524_v40 }
 0x74c   : > { %v1526_v42 = vmul.f32 0.5, %v1525_v41 }
 0x74e   : > { %v1527_v43 = vsub.f32 1.5, %v1526_v42 }
 0x750   : > { %v1528_v44 = vmul.f32 %v3793_v39, %v1527_v43 }
 0x752   : > { %v1532_v46 = vsel %vm1531_vm10, %v3793_v39, %v1528_v44 }
 0x753   : > { %v1533_v47 = vmul.f32 %v1532_v46, %v1516_v17  ;;  %v1635_v17 = vadd.f32 %v3749_v6, %v1634_v23 }
 0x755   : > { %v1537_v49 = vmul.f32 %v3745_v45, %v1533_v47  ;;  %3480 = vmatpush.msk.msrb.mxu3 %vm1692_vm12, %v1635_v17 }
 0x757   : > { %v4598_v50 = vadd.f32 %v3746_v48, %v1537_v49 }
 0x759   : > { %3475 = vmatmul.msk.f32.vlgmr.msra.gmra.mxu3 %vm1066_vm0, %v4598_v50 }
 0x7dc   : > { %v1585_v55 = vpop.f32.mrf.mxu3 }
 0x7dd   : > { %v1586_v56 = vadd.f32 %v3748_v54, %v1585_v55 }
 0x7df   : > { %1876 = vrot.lane.b32.xlu2 %v1586_v56, %s4950_s18  ;;  %1796 = vrot.lane.b32.xlu0 %v1586_v56, %s4948_s28 }
 0x7e0   : > { %3479 = vmatmul.msk.f32.vlgmr.msrb.gmra.mxu2 %vm1142_vm1, %v1586_v56 }
 0x7e7   : > { %1716 = vrot.lane.b32.xlu0 %v1586_v56, %s4952_s2 }
 0x7ef   : > { %1878 = vrot.lane.b32.xlu0 %v1612_v53, %s4950_s18 }
 0x839   : > { %v1877_v62 = vpop.permute.xlu2 %1876 }
 0x851   : > { %v1797_v21 = vpop.permute.xlu0 %1796 }
 0x852   : > { %3487 = vmatmul.msk.f32.vlgmr.msra.gmra.mxu2 %vm1142_vm1, %v1797_v21 }
 0x859   : > { %v1717_v59 = vpop.permute.xlu0 %1716 }
 0x85a   : > { %3483 = vmatmul.msk.f32.vlgmr.msrb.gmra.mxu0 %vm1142_vm1, %v1717_v59 }
 0x861   : > { %v1879_v60 = vpop.permute.xlu0 %1878 }
 0x862   : > { %3490 = vmatpush.xpose.msk.msra.mxu0 %vm1142_vm1, %v1879_v60 }
 0x863   : > { %v1660_v61 = vpop.f32.mrf.mxu2 }
 0x864   : > { %v1663_v63 = vmul.f32 0.35355338, %v1660_v61 }
 0x865   : > { %3491 = vmatmul.msk.f32.vlgmr.msra.gmra.mxu0 %vm1142_vm1, %v1877_v62 }
 0x866   : > { %v1665_v0 = vsel %vm1664_vm11, %v1663_v63, -inf }
 0x867   : > { %1666 = vmax.xlane.f32.xlu0 %v1665_v0 }
 0x87b   : > { %1769 = vrot.lane.b32.xlu0 %v1635_v17, %s4952_s2  ;;  %s5021_s2 = sld [smem:[#allocation31_spill]] }
 0x8d5   : > { %v1821_v10 = vpop.f32.mrf.mxu2 }
 0x8d6   : > { %v1824_v13 = vmul.f32 0.35355338, %v1821_v10 }
 0x8d7   : > { %v1741_v5 = vpop.f32.mrf.mxu0 }
 0x8d8   : > { %v1744_v7 = vmul.f32 0.35355338, %v1741_v5  ;;  %v1825_v14 = vsel %vm1664_vm11, %v1824_v13, -inf }
 0x8da   : > { %v1667_v8 = vpop.xlane.xlu0 %1666  ;;  %v1745_v9 = vsel %vm1664_vm11, %v1744_v7, -inf }
 0x8db   : > { %v1668_v11 = vsub.f32 %v1663_v63, %v1667_v8  ;;  %1746 = vmax.xlane.f32.xlu1 %v1745_v9 }
 0x8dd   : > { %v1669_v12 = vmul.f32 1.442695, %v1668_v11 }
 0x8df   : > { %3794 = vpow2.f32 %v1669_v12 }
 0x8e2   : > { %v1901_v15 = vpop.f32.mrf.mxu0 }
 0x8e3   : > { %1826 = vmax.xlane.f32.xlu1 %v1825_v14  ;;  %v1904_v18 = vmul.f32 0.35355338, %v1901_v15 }
 0x8e5   : > { %v3795_v16 = vpop.eup %3794  ;;  %v1905_v20 = vsel %vm1664_vm11, %v1904_v18, -inf }
 0x8e6   : > { %v1671_v19 = vsel %vm1664_vm11, %v3795_v16, 0.0 }
 0x8e7   : > { %1672 = vadd.xlane.f32.xlu2 %v1671_v19 }
 0x8eb   : > { %1906 = vmax.xlane.f32.xlu1 %v1905_v20 }
 0x8ed   : > { %v1770_v53 = vpop.permute.xlu0 %1769 }
 0x8ee   : > { %3484 = vmatpush.msk.msra.mxu1 %vm1692_vm12, %v1770_v53 }
 0x8ff   : > { %1929 = vrot.lane.b32.xlu2 %v1635_v17, %s4950_s18  ;;  %s5020_s18 = smov 16  }
 0x94e   : > { %v1747_v24 = vpop.xlane.xlu1 %1746 }
 0x94f   : > { %v1748_v25 = vsub.f32 %v1744_v7, %v1747_v24 }
 0x951   : > { %v1749_v26 = vmul.f32 1.442695, %v1748_v25 }
 0x953   : > { %3796 = vpow2.f32 %v1749_v26 }
 0x956   : > { %v1827_v27 = vpop.xlane.xlu1 %1826 }
 0x957   : > { %v1828_v28 = vsub.f32 %v1824_v13, %v1827_v27 }
 0x959   : > { %v3797_v29 = vpop.eup %3796  ;;  %v1829_v30 = vmul.f32 1.442695, %v1828_v28 }
 0x95a   : > { %v1673_v32 = vpop.xlane.xlu2 %1672  ;;  %v1751_v33 = vsel %vm1664_vm11, %v3797_v29, 0.0 }
 0x95b   : > { %3798 = vpow2.f32 %v1829_v30  ;;  %1752 = vadd.xlane.f32.xlu1 %v1751_v33  ;;  %v1685_v42 = vand.u32 2147483648, %v1673_v32  ;;  %v1683_v44 = vand.u32 2147483647, %v1673_v32  ;;  %vm1679_vm14 = vweird.f32 %v1673_v32 }
 0x95c   : > { %3800 = vrcp.f32 %v1673_v32 }
 0x95d   : > { %v1686_v47 = vor.u32 1.1754944e-38, %v1685_v42  ;;  %vm1684_vm2 = vcmp.eq.f32.partialorder %v1683_v44, 8.507059e+37  ;;  %v3750_v44 = vld [vmem:[%s5021_s2] ss:$0 sm:$0xff] }
 0x95e   : > { %v1907_v34 = vpop.xlane.xlu1 %1906 }
 0x95f   : > { %v1908_v35 = vsub.f32 %v1904_v18, %v1907_v34  ;;  %v1560_v34 = vld [vmem:[%s5017_s22 + $0x18] sm:$0xff] }
 0x960   : > { %1989 = vmatpush.msrb.mxu2 %v1560_v34 }
 0x961   : > { %v4634_v36 = vpop.eup %3798  ;;  %v1909_v37 = vmul.f32 1.442695, %v1908_v35 }
 0x962   : > { %v3801_v38 = vpop.eup %3800  ;;  %v1831_v39 = vsel %vm1664_vm11, %v4634_v36, 0.0  ;;  %v1930_v54 = vpop.permute.xlu2 %1929 }
 0x963   : > { %v1675_v40 = vmul.f32 %v3801_v38, %v1673_v32  ;;  %3802 = vpow2.f32 %v1909_v37  ;;  %1832 = vadd.xlane.f32.xlu1 %v1831_v39  ;;  %vm1680_vm13 = vweird.f32 %v3801_v38  ;;  %3492 = vmatpush.msk.msrb.mxu1 %vm1692_vm12, %v1930_v54 }
 0x964   : > { %vm1681_vm15 = vmor %vm1679_vm14, %vm1680_vm13 }
 0x965   : > { %v1676_v41 = vsub.f32 1.0, %v1675_v40 }
 0x967   : > { %v1677_v43 = vmul.f32 %v3801_v38, %v1676_v41 }
 0x969   : > { %v4638_v45 = vpop.eup %3802  ;;  %v1678_v46 = vadd.f32 %v3801_v38, %v1677_v43 }
 0x96a   : > { %v1911_v48 = vsel %vm1664_vm11, %v4638_v45, 0.0 }
 0x96b   : > { %v1682_v49 = vsel %vm1681_vm15, %v3801_v38, %v1678_v46  ;;  %1912 = vadd.xlane.f32.xlu1 %v1911_v48 }
 0x96c   : > { %v1687_v51 = vsel %vm1684_vm2, %v1686_v47, %v1682_v49 }
 0x96d   : > { %v1688_v52 = vmul.f32 %v3795_v16, %v1687_v51 }
 0x96f   : > { %3481 = vmatmul.msk.f32.vlgmr.msrb.gmra.mxu3 %vm1664_vm11, %v1688_v52 }
 0x984   : > { %1849 = vrot.lane.b32.xlu1 %v1635_v17, %s4948_s28  ;;  %s5018_s28 = smov %s5017_s22  ;;  %s5024_s22 = sld [smem:[#allocation36_spill]] }
 0x985   : > { %v1559_v35 = vld [vmem:[%s5018_s28 + $0x10] sm:$0xff]  ;;  %v1557_v37 = vld [vmem:[%s5018_s28] sm:$0xff] }
 0x986   : > { %1990 = vmatpush.msrb.mxu2 %v1559_v35 }
 0x98a   : > { %s5025_s5 = smov %s5024_s22 }
 0x9ce   : > { %v1753_v55 = vpop.xlane.xlu1 %1752 }
 0x9cf   : > { %3804 = vrcp.f32 %v1753_v55  ;;  %v1765_v59 = vand.u32 2147483648, %v1753_v55  ;;  %v1763_v61 = vand.u32 2147483647, %v1753_v55  ;;  %vm1759_vm4 = vweird.f32 %v1753_v55 }
 0x9d1   : > { %v1766_v0 = vor.u32 1.1754944e-38, %v1765_v59  ;;  %vm1764_vm8 = vcmp.eq.f32.partialorder %v1763_v61, 8.507059e+37  ;;  %v2048_v59 = vld [vmem:[%s5025_s5 + $0x68] sm:$0xff] }
 0x9d5   : > { %v3805_v56 = vpop.eup %3804 }
 0x9d6   : > { %v1755_v57 = vmul.f32 %v3805_v56, %v1753_v55  ;;  %v1833_v58 = vpop.xlane.xlu1 %1832  ;;  %vm1760_vm3 = vweird.f32 %v3805_v56 }
 0x9d7   : > { %3806 = vrcp.f32 %v1833_v58  ;;  %vm1761_vm7 = vmor %vm1759_vm4, %vm1760_vm3  ;;  %v1845_v18 = vand.u32 2147483648, %v1833_v58  ;;  %vm1839_vm15 = vweird.f32 %v1833_v58  ;;  %v1843_v20 = vand.u32 2147483647, %v1833_v58 }
 0x9d8   : > { %v1756_v21 = vsub.f32 1.0, %v1755_v57 }
 0x9d9   : > { %v1846_v25 = vor.u32 1.1754944e-38, %v1845_v18  ;;  %vm1844_vm4 = vcmp.eq.f32.partialorder %v1843_v20, 8.507059e+37  ;;  %v3752_v20 = vld [vmem:[#allocation2] ss:$0 sm:$0xff] }
 0x9da   : > { %v1757_v60 = vmul.f32 %v3805_v56, %v1756_v21  ;;  %v2049_v21 = vld [vmem:[%s5025_s5 + $0x70] sm:$0xff] }
 0x9dc   : > { %v1758_v62 = vadd.f32 %v3805_v56, %v1757_v60 }
 0x9dd   : > { %v3807_v63 = vpop.eup %3806 }
 0x9de   : > { %v1762_v1 = vsel %vm1761_vm7, %v3805_v56, %v1758_v62  ;;  %v1913_v2 = vpop.xlane.xlu1 %1912  ;;  %v1835_v4 = vmul.f32 %v3807_v63, %v1833_v58  ;;  %vm1840_vm10 = vweird.f32 %v3807_v63  ;;  %v2050_v58 = vld [vmem:[%s5024_s22 + $0x78] sm:$0xff]  ;;  %v2047_v62 = vld [vmem:[%s5025_s5 + $0x60] sm:$0xff]  ;;  %s5028_s22 = smov 120  }
 0x9df   : > { %v1767_v3 = vsel %vm1764_vm8, %v1766_v0, %v1762_v1  ;;  %3808 = vrcp.f32 %v1913_v2  ;;  %v1925_v12 = vand.u32 2147483648, %v1913_v2  ;;  %v1923_v14 = vand.u32 2147483647, %v1913_v2  ;;  %vm1841_vm3 = vmor %vm1839_vm15, %vm1840_vm10  ;;  %2082 = vmatpush.msrb.mxu0 %v2050_v58  ;;  %v2046_v0 = vld [vmem:[%s5025_s5 + $0x58] sm:$0xff]  ;;  %v2045_v1 = vld [vmem:[%s5025_s5 + $0x50] sm:$0xff] }
 0x9e0   : > { %v1768_v5 = vmul.f32 %v3797_v29, %v1767_v3  ;;  %v1836_v7 = vsub.f32 1.0, %v1835_v4  ;;  %vm1919_vm13 = vweird.f32 %v1913_v2  ;;  %v2043_v3 = vld [vmem:[%s5025_s5 + $0x40] sm:$0xff] }
 0x9e1   : > { %v1926_v19 = vor.u32 1.1754944e-38, %v1925_v12  ;;  %vm1924_vm2 = vcmp.eq.f32.partialorder %v1923_v14, 8.507059e+37  ;;  %2083 = vmatpush.msrb.mxu0 %v2049_v21  ;;  %v2039_v12 = vld [vmem:[%s5025_s5 + $0x20] sm:$0xff]  ;;  %v2038_v14 = vld [vmem:[%s5025_s5 + $0x18] sm:$0xff] }
 0x9e2   : > { %3485 = vmatmul.msk.f32.vlgmr.msra.gmra.mxu1 %vm1664_vm11, %v1768_v5  ;;  %v1837_v10 = vmul.f32 %v3807_v63, %v1836_v7  ;;  %v2042_v5 = vld [vmem:[%s5025_s5 + $0x38] sm:$0xff] }
 0x9e3   : > { %2084 = vmatpush.msrb.mxu0 %v2048_v59 }
 0x9e4   : > { %v1838_v15 = vadd.f32 %v3807_v63, %v1837_v10  ;;  %v2040_v10 = vld [vmem:[%s5025_s5 + $0x28] sm:$0xff] }
 0x9e5   : > { %v3809_v8 = vpop.eup %3808  ;;  %2085 = vmatpush.msrb.mxu0 %v2047_v62 }
 0x9e6   : > { %v1915_v9 = vmul.f32 %v3809_v8, %v1913_v2  ;;  %vm1920_vm9 = vweird.f32 %v3809_v8  ;;  %v1842_v17 = vsel %vm1841_vm3, %v3807_v63, %v1838_v15  ;;  %v2044_v2 = vld [vmem:[%s5025_s5 + $0x48] sm:$0xff] }
 0x9e7   : > { %vm1921_vm14 = vmor %vm1919_vm13, %vm1920_vm9  ;;  %v1847_v26 = vsel %vm1844_vm4, %v1846_v25, %v1842_v17  ;;  %2086 = vmatpush.msrb.mxu0 %v2046_v0  ;;  %v2037_v17 = vld [vmem:[%s5025_s5 + $0x10] sm:$0xff]  ;;  %v2035_v25 = vld [vmem:[%s5025_s5] sm:$0xff] }
 0x9e8   : > { %v1916_v11 = vsub.f32 1.0, %v1915_v9  ;;  %v1848_v28 = vmul.f32 %v4634_v36, %v1847_v26  ;;  %v1558_v36 = vld [vmem:[%s5018_s28 + $0x8] sm:$0xff]  ;;  %v3753_v26 = vld [vmem:[#allocation5] ss:$0 sm:$0xff] }
 0x9e9   : > { %1991 = vmatpush.msrb.mxu2 %v1558_v36  ;;  %2087 = vmatpush.msrb.mxu0 %v2045_v1  ;;  %v3756_v0 = vld [vmem:[#allocation10] ss:$0 sm:$0xff] }
 0x9ea   : > { %v1917_v13 = vmul.f32 %v3809_v8, %v1916_v11 }
 0x9eb   : > { %1992 = vmatpush.msrb.mxu2 %v1557_v37  ;;  %2088 = vmatpush.msrb.mxu0 %v2044_v2 }
 0x9ec   : > { %v1918_v16 = vadd.f32 %v3809_v8, %v1917_v13 }
 0x9ed   : > { %2089 = vmatpush.msrb.mxu0 %v2043_v3  ;;  %v3757_v3 = vld [vmem:[%s4182_s17 + $0x1] ss:$0 sm:$0xff] }
 0x9ee   : > { %v1922_v6 = vsel %vm1921_vm14, %v3809_v8, %v1918_v16  ;;  %v2041_v8 = vld [vmem:[%s5025_s5 + $0x30] sm:$0xff] }
 0x9ef   : > { %v1927_v23 = vsel %vm1924_vm2, %v1926_v19, %v1922_v6  ;;  %2090 = vmatpush.msrb.mxu0 %v2042_v5 }
 0x9f0   : > { %v1928_v24 = vmul.f32 %v4638_v45, %v1927_v23 }
 0x9f1   : > { %2091 = vmatpush.msrb.mxu0 %v2041_v8  ;;  %v3759_v8 = vld [vmem:[%s4986_s3 + $0x1] ss:$0 sm:$0xff]  ;;  %s5031_s3 = smov 8  }
 0x9f2   : > { %3493 = vmatmul.msk.f32.vlgmr.msrb.gmra.mxu1 %vm1664_vm11, %v1928_v24  ;;  %v1713_v32 = vpop.f32.mrf.mxu3  ;;  %v2036_v24 = vld [vmem:[%s5025_s5 + $0x8] sm:$0xff] }
 0x9f3   : > { %2092 = vmatpush.msrb.mxu0 %v2040_v10 }
 0x9f5   : > { %2093 = vmatpush.msrb.mxu0 %v2039_v12 }
 0x9f6   : > { %v1850_v27 = vpop.permute.xlu1 %1849 }
 0x9f7   : > { %3488 = vmatpush.msk.msra.mxu3 %vm1692_vm12, %v1850_v27  ;;  %2094 = vmatpush.msrb.mxu0 %v2038_v14 }
 0x9f8   : > { %3489 = vmatmul.msk.f32.vlgmr.msra.gmra.mxu3 %vm1664_vm11, %v1848_v28 }
 0x9f9   : > { %2095 = vmatpush.msrb.mxu0 %v2037_v17 }
 0x9fb   : > { %2096 = vmatpush.msrb.mxu0 %v2036_v24 }
 0x9fd   : > { %2097 = vmatpush.msrb.mxu0 %v2035_v25 }
 0xa5f   : > { %v1793_v29 = vpop.f32.mrf.mxu1 }
 0xa60   : > { %1957 = vrot.lane.b32.xlu0 %v1793_v29, %s4954_s16  ;;  %s5022_s16 = sld [smem:[#allocation34_spill]] }
 0xa66   : > { %s5023_s4 = smov %s5022_s16  ;;  %v2033_v55 = vld [vmem:[%s5022_s16 + $0x18] sm:$0xff]  ;;  %s5026_s16 = sld [smem:[#allocation32_spill]] }
 0xa67   : > { %2070 = vmatpush.msrb.mxu3 %v2033_v55  ;;  %v2032_v56 = vld [vmem:[%s5023_s4 + $0x10] sm:$0xff]  ;;  %v2030_v57 = vld [vmem:[%s5023_s4] sm:$0xff] }
 0xa69   : > { %2071 = vmatpush.msrb.mxu3 %v2032_v56 }
 0xa6c   : > { %s5027_s6 = smov %s5026_s16  ;;  %v3751_v16 = vld [vmem:[%s5026_s16] ss:$0 sm:$0xff]  ;;  %s5029_s16 = smov 112  }
 0xa6f   : > { %v1953_v30 = vpop.f32.mrf.mxu1 }
 0xa70   : > { %1965 = vrot.lane.b32.xlu1 %v1953_v30, %s5019_s15  ;;  %v3754_v30 = vld [vmem:[#allocation7] ss:$0 sm:$0xff] }
 0xa7b   : > { %v1873_v33 = vpop.f32.mrf.mxu3 }
 0xa7c   : > { %1961 = vrot.lane.b32.xlu0 %v1873_v33, %s5020_s18 }
 0xad2   : > { %v1958_v38 = vpop.permute.xlu0 %1957 }
 0xad3   : > { %v1968_v39 = vsel %vm1142_vm1, %v1713_v32, %v1958_v38 }
 0xae2   : > { %v1966_v41 = vpop.permute.xlu1 %1965 }
 0xaee   : > { %v1962_v40 = vpop.permute.xlu0 %1961 }
 0xaef   : > { %v1969_v42 = vsel %vm1472_vm5, %v1968_v39, %v1962_v40 }
 0xaf0   : > { %v1970_v43 = vsel %vm1474_vm6, %v1969_v42, %v1966_v41  ;;  %v3499_v41 = vld [vmem:[%s4987_s13 + $0x38] sm:$0xff] }
 0xaf1   : > { %3494 = vmatmul.msk.f32.vlgmr.msrb.gmra.mxu2 %vm1066_vm0, %v1970_v43  ;;  %v3504_v42 = vld [vmem:[%s4187_s21 + $0x38] sm:$0xff]  ;;  %2181 = vmatpush.msra.mxu1 %v3499_v41 }
 0xaf2   : > { %v3509_v43 = vld [vmem:[%s4197_s29 + $0x38] sm:$0xff]  ;;  %2204 = vmatpush.msra.mxu2 %v3504_v42 }
 0xb74   : > { %v1994_v45 = vpop.f32.mrf.mxu2 }
 0xb75   : > { %v1995_v46 = vadd.f32 %v3750_v44, %v1994_v45  ;;  %v3498_v44 = vld [vmem:[%s4987_s13 + $0x30] sm:$0xff] }
 0xb76   : > { %v3503_v45 = vld [vmem:[%s4187_s21 + $0x30] sm:$0xff]  ;;  %2182 = vmatpush.msra.mxu1 %v3498_v44 }
 0xb77   : > { %v1997_v47 = vadd.f32 %v1995_v46, %v4598_v50  ;;  %v2031_v50 = vld [vmem:[%s5023_s4 + $0x8] sm:$0xff]  ;;  %v3508_v46 = vld [vmem:[%s4197_s29 + $0x30] sm:$0xff]  ;;  %2205 = vmatpush.msra.mxu2 %v3503_v45 }
 0xb78   : > { %2072 = vmatpush.msrb.mxu3 %v2031_v50 }
 0xb79   : > { %v2000_v48 = vsel %vm1066_vm0, %v1997_v47, 0.0 }
 0xb7a   : > { %2001 = vadd.xlane.f32.xlu0 %v2000_v48  ;;  %2073 = vmatpush.msrb.mxu3 %v2030_v57  ;;  %v3502_v48 = vld [vmem:[%s4187_s21 + $0x28] sm:$0xff] }
 0xb7b   : > { %2206 = vmatpush.msra.mxu2 %v3502_v48 }
 0xb7c   : > { %2227 = vmatpush.msra.mxu3 %v3509_v43 }
 0xb7e   : > { %2228 = vmatpush.msra.mxu3 %v3508_v46 }
 0xbed   : > { %v2002_v49 = vpop.xlane.xlu0 %2001 }
 0xbee   : > { %v2003_v51 = vmul.f32 %v2002_v49, %v4574_v22  ;;  %v3507_v49 = vld [vmem:[%s4197_s29 + $0x28] sm:$0xff] }
 0xbef   : > { %2229 = vmatpush.msra.mxu3 %v3507_v49 }
 0xbf0   : > { %v2004_v52 = vsub.f32 %v1997_v47, %v2003_v51  ;;  %v3497_v47 = vld [vmem:[%s4987_s13 + $0x28] sm:$0xff]  ;;  %v3496_v51 = vld [vmem:[%s4987_s13 + $0x20] sm:$0xff]  ;;  %s5030_s13 = smov 104  }
 0xbf1   : > { %2183 = vmatpush.msra.mxu1 %v3497_v47 }
 0xbf2   : > { %v2005_v53 = vmul.f32 %v2004_v52, %v2004_v52 }
 0xbf3   : > { %2184 = vmatpush.msra.mxu1 %v3496_v51 }
 0xbf4   : > { %v2006_v54 = vsel %vm1066_vm0, %v2005_v53, 0.0  ;;  %v3506_v53 = vld [vmem:[%s4197_s29 + $0x20] sm:$0xff] }
 0xbf5   : > { %2007 = vadd.xlane.f32.xlu1 %v2006_v54  ;;  %2230 = vmatpush.msra.mxu3 %v3506_v53 }
 0xc68   : > { %v2008_v60 = vpop.xlane.xlu1 %2007 }
 0xc69   : > { %v2009_v61 = vmul.f32 %v2008_v60, %v4574_v22 }
 0xc6b   : > { %v2010_v63 = vadd.f32 1e-05, %v2009_v61  ;;  %v3755_v61 = vld [vmem:[#allocation8] ss:$0 sm:$0xff] }
 0xc6d   : > { %3810 = vrsqrt.f32 %v2010_v63  ;;  %vm2017_vm8 = vweird.f32 %v2010_v63 }
 0xc73   : > { %v3811_v4 = vpop.eup %3810 }
 0xc74   : > { %v2012_v7 = vmul.f32 %v3811_v4, %v2010_v63  ;;  %vm2018_vm7 = vweird.f32 %v3811_v4 }
 0xc75   : > { %vm2019_vm9 = vmor %vm2017_vm8, %vm2018_vm7 }
 0xc76   : > { %v2013_v9 = vmul.f32 %v3811_v4, %v2012_v7  ;;  %v3758_v7 = vld [vmem:[%s4192_s25 + $0x1] ss:$0 sm:$0xff] }
 0xc78   : > { %v2014_v11 = vmul.f32 0.5, %v2013_v9 }
 0xc7a   : > { %v2015_v13 = vsub.f32 1.5, %v2014_v11 }
 0xc7c   : > { %v2016_v15 = vmul.f32 %v3811_v4, %v2015_v13 }
 0xc7e   : > { %v2020_v18 = vsel %vm2019_vm9, %v3811_v4, %v2016_v15 }
 0xc7f   : > { %v2021_v19 = vmul.f32 %v2020_v18, %v2004_v52  ;;  %v3501_v52 = vld [vmem:[%s4187_s21 + $0x20] sm:$0xff] }
 0xc80   : > { %2207 = vmatpush.msra.mxu2 %v3501_v52 }
 0xc81   : > { %v2025_v6 = vmul.f32 %v3751_v16, %v2021_v19 }
 0xc83   : > { %v2029_v23 = vadd.f32 %v3752_v20, %v2025_v6 }
 0xc85   : > { %3495 = vmatmul.msk.f32.vlgmr.msrb.gmra.mxu3 %vm1066_vm0, %v2029_v23 }
 0xd08   : > { %v2075_v27 = vpop.f32.mrf.mxu3 }
 0xd09   : > { %v2076_v28 = vadd.f32 %v3753_v26, %v2075_v27 }
 0xd0b   : > { %v2078_v29 = vmax.f32 %v2076_v28, 0.0 }
 0xd0d   : > { %2098 = vmatmul.f32.vlgmr.msrb.gmra.mxu0 %v2078_v29 }
 0xd8a   : > { %v2099_v32 = vpop.f32.mrf.mxu0 }
 0xd8b   : > { %v2100_v33 = vadd.f32 %v3754_v30, %v2099_v32 }
 0xd8d   : > { %v2102_v34 = vadd.f32 %v2100_v33, %v2029_v23 }
 0xd8f   : > { %v2105_v35 = vsel %vm1066_vm0, %v2102_v34, 0.0 }
 0xd90   : > { %2106 = vadd.xlane.f32.xlu2 %v2105_v35 }
 0xe03   : > { %v2107_v36 = vpop.xlane.xlu2 %2106 }
 0xe04   : > { %v2108_v37 = vmul.f32 %v2107_v36, %v4574_v22 }
 0xe06   : > { %v2109_v38 = vsub.f32 %v2102_v34, %v2108_v37 }
 0xe08   : > { %v2110_v39 = vmul.f32 %v2109_v38, %v2109_v38 }
 0xe0a   : > { %v2111_v40 = vsel %vm1066_vm0, %v2110_v39, 0.0 }
 0xe0b   : > { %2112 = vadd.xlane.f32.xlu0 %v2111_v40 }
 0xe7e   : > { %v2113_v54 = vpop.xlane.xlu0 %2112 }
 0xe7f   : > { %v2114_v55 = vmul.f32 %v2113_v54, %v4574_v22 }
 0xe81   : > { %v2115_v56 = vadd.f32 1e-05, %v2114_v55 }
 0xe83   : > { %3812 = vrsqrt.f32 %v2115_v56  ;;  %vm2122_vm13 = vweird.f32 %v2115_v56 }
 0xe89   : > { %v3813_v50 = vpop.eup %3812 }
 0xe8a   : > { %v2117_v57 = vmul.f32 %v3813_v50, %v2115_v56  ;;  %vm2123_vm10 = vweird.f32 %v3813_v50 }
 0xe8b   : > { %vm2124_vm14 = vmor %vm2122_vm13, %vm2123_vm10 }
 0xe8c   : > { %v2118_v58 = vmul.f32 %v3813_v50, %v2117_v57 }
 0xe8e   : > { %v2119_v21 = vmul.f32 0.5, %v2118_v58 }
 0xe90   : > { %v2120_v59 = vsub.f32 1.5, %v2119_v21 }
 0xe92   : > { %v2121_v60 = vmul.f32 %v3813_v50, %v2120_v59 }
 0xe94   : > { %v2125_v62 = vsel %vm2124_vm14, %v3813_v50, %v2121_v60 }
 0xe95   : > { %v2126_v63 = vmul.f32 %v2125_v62, %v2109_v38 }
 0xe97   : > { %v2130_v1 = vmul.f32 %v3755_v61, %v2126_v63 }
 0xe99   : > { %v4707_v2 = vadd.f32 %v3756_v0, %v2130_v1 }
 0xe9b   : > { %3516 = vmatmul.msk.f32.vlgmr.msra.gmra.mxu1 %vm1066_vm0, %v4707_v2  ;;  %3517 = vmatmul.msk.f32.vlgmr.msra.gmra.mxu2 %vm1066_vm0, %v4707_v2 }
 0xe9c   : > { %3518 = vmatmul.msk.f32.vlgmr.msra.gmra.mxu3 %vm1066_vm0, %v4707_v2 }
 0xf18   : > { %v2186_v4 = vpop.f32.mrf.mxu1 }
 0xf19   : > { %v2187_v5 = vadd.f32 %v3757_v3, %v2186_v4 }
 0xf1b   : > { %2310 = vrot.lane.b32.xlu2 %v2187_v5, %s5028_s22 }
 0xf1e   : > { %v2209_v9 = vpop.f32.mrf.mxu2 }
 0xf1f   : > { %v2210_v10 = vadd.f32 %v3758_v7, %v2209_v9  ;;  %v2232_v11 = vpop.f32.mrf.mxu3 }
 0xf20   : > { %v4719_v12 = vadd.f32 %v3759_v8, %v2232_v11 }
 0xf21   : > { %2312 = vrot.lane.b32.xlu1 %v2210_v10, %s5028_s22  ;;  %3519 = vmatpush.xpose.msk.msrb.mxu1 %vm1142_vm1, %v2210_v10 }
 0xf22   : > { %2305 = vmatpush.msrb.mxu2 %v4719_v12 }
 0xf23   : > { %2393 = vrot.lane.b32.xlu2 %v2210_v10, %s5029_s16 }
 0xf24   : > { %3520 = vmatmul.msk.f32.vlgmr.msrb.gmra.mxu1 %vm1142_vm1, %v2187_v5 }
 0xf2b   : > { %2391 = vrot.lane.b32.xlu2 %v2187_v5, %s5029_s16 }
 0xf33   : > { %2473 = vrot.lane.b32.xlu2 %v2210_v10, %s5030_s13 }
 0xf75   : > { %v2311_v13 = vpop.permute.xlu2 %2310 }
 0xf7d   : > { %v2394_v14 = vpop.permute.xlu2 %2393 }
 0xf7e   : > { %3525 = vmatpush.xpose.msk.msra.mxu2 %vm1142_vm1, %v2394_v14 }
 0xf85   : > { %v2392_v39 = vpop.permute.xlu2 %2391 }
 0xf8d   : > { %v2474_v51 = vpop.permute.xlu2 %2473 }
 0xf93   : > { %v2313_v15 = vpop.permute.xlu1 %2312 }
 0xf94   : > { %3522 = vmatpush.xpose.msk.msrb.mxu3 %vm1142_vm1, %v2313_v15 }
 0xf97   : > { %3523 = vmatmul.msk.f32.vlgmr.msrb.gmra.mxu3 %vm1142_vm1, %v2311_v13 }
 0xfa1   : > { %v2258_v16 = vpop.f32.mrf.mxu1 }
 0xfa2   : > { %v2261_v18 = vmul.f32 0.35355338, %v2258_v16 }
 0xfa4   : > { %v2262_v19 = vadd.f32 %v2261_v18, %v4531_v31 }
 0xfa6   : > { %v2263_v20 = vsel %vm1142_vm1, %v2262_v19, -inf }
 0xfa7   : > { %2264 = vmax.xlane.f32.xlu0 %v2263_v20 }
0x101a   : > { %v2335_v6 = vpop.f32.mrf.mxu3  ;;  %v2265_v23 = vpop.xlane.xlu0 %2264 }
0x101b   : > { %v2338_v17 = vmul.f32 0.35355338, %v2335_v6  ;;  %v2266_v24 = vsub.f32 %v2262_v19, %v2265_v23 }
0x101d   : > { %v2267_v25 = vmul.f32 1.442695, %v2266_v24  ;;  %v2339_v26 = vadd.f32 %v2338_v17, %v4531_v31 }
0x101f   : > { %3814 = vpow2.f32 %v2267_v25  ;;  %v2340_v27 = vsel %vm1142_vm1, %v2339_v26, -inf }
0x1020   : > { %2341 = vmax.xlane.f32.xlu0 %v2340_v27 }
0x1025   : > { %v3815_v28 = vpop.eup %3814 }
0x1026   : > { %v2269_v29 = vsel %vm1142_vm1, %v3815_v28, 0.0 }
0x1028   : > { %2270 = vadd.xlane.f32.xlu0 %v2269_v29 }
0x103c   : > { %2365 = vrot.lane.b32.xlu0 %v4719_v12, %s5028_s22 }
0x1044   : > { %2471 = vrot.lane.b32.xlu0 %v2187_v5, %s5030_s13 }
0x1093   : > { %v2342_v30 = vpop.xlane.xlu0 %2341 }
0x1094   : > { %v2343_v32 = vsub.f32 %v2339_v26, %v2342_v30 }
0x1096   : > { %v2344_v33 = vmul.f32 1.442695, %v2343_v32 }
0x1098   : > { %3816 = vpow2.f32 %v2344_v33 }
0x109b   : > { %v2271_v34 = vpop.xlane.xlu0 %2270 }
0x109c   : > { %3818 = vrcp.f32 %v2271_v34  ;;  %v2283_v41 = vand.u32 2147483648, %v2271_v34  ;;  %v2281_v43 = vand.u32 2147483647, %v2271_v34  ;;  %vm2277_vm2 = vweird.f32 %v2271_v34 }
0x109e   : > { %v3817_v35 = vpop.eup %3816  ;;  %v2284_v45 = vor.u32 1.1754944e-38, %v2283_v41  ;;  %vm2282_vm4 = vcmp.eq.f32.partialorder %v2281_v43, 8.507059e+37 }
0x109f   : > { %v2346_v36 = vsel %vm1142_vm1, %v3817_v35, 0.0 }
0x10a0   : > { %2347 = vadd.xlane.f32.xlu1 %v2346_v36 }
0x10a2   : > { %v3819_v37 = vpop.eup %3818 }
0x10a3   : > { %v2273_v38 = vmul.f32 %v3819_v37, %v2271_v34  ;;  %vm2278_vm15 = vweird.f32 %v3819_v37 }
0x10a4   : > { %vm2279_vm3 = vmor %vm2277_vm2, %vm2278_vm15 }
0x10a5   : > { %v2274_v40 = vsub.f32 1.0, %v2273_v38 }
0x10a7   : > { %v2275_v42 = vmul.f32 %v3819_v37, %v2274_v40 }
0x10a9   : > { %v2276_v44 = vadd.f32 %v3819_v37, %v2275_v42 }
0x10ab   : > { %v2280_v46 = vsel %vm2279_vm3, %v3819_v37, %v2276_v44 }
0x10ac   : > { %v2285_v47 = vsel %vm2282_vm4, %v2284_v45, %v2280_v46 }
0x10ad   : > { %v2286_v48 = vmul.f32 %v3815_v28, %v2285_v47 }
0x10ae   : > { %v2366_v49 = vpop.permute.xlu0 %2365 }
0x10af   : > { %3521 = vmatmul.msk.f32.vlgmr.msrb.gmra.mxu2 %vm1142_vm1, %v2286_v48  ;;  %2386 = vmatpush.msra.mxu1 %v2366_v49 }
0x10b1   : > { %3528 = vmatpush.xpose.msk.msrb.mxu1 %vm1142_vm1, %v2474_v51  ;;  %v3514_v51 = vld [vmem:[%s4207_s8 + $0x38] sm:$0xff] }
0x10b6   : > { %v2472_v62 = vpop.permute.xlu0 %2471 }
0x10b7   : > { %3526 = vmatmul.msk.f32.vlgmr.msra.gmra.mxu2 %vm1142_vm1, %v2392_v39 }
0x1113   : > { %v2348_v52 = vpop.xlane.xlu1 %2347 }
0x1114   : > { %3820 = vrcp.f32 %v2348_v52  ;;  %v2360_v56 = vand.u32 2147483648, %v2348_v52  ;;  %v2358_v57 = vand.u32 2147483647, %v2348_v52  ;;  %vm2354_vm8 = vweird.f32 %v2348_v52 }
0x1116   : > { %v2361_v21 = vor.u32 1.1754944e-38, %v2360_v56  ;;  %vm2359_vm10 = vcmp.eq.f32.partialorder %v2358_v57, 8.507059e+37 }
0x111a   : > { %v3821_v53 = vpop.eup %3820 }
0x111b   : > { %v2350_v54 = vmul.f32 %v3821_v53, %v2348_v52  ;;  %vm2355_vm7 = vweird.f32 %v3821_v53  ;;  %v3513_v52 = vld [vmem:[%s4207_s8 + $0x30] sm:$0xff] }
0x111c   : > { %vm2356_vm9 = vmor %vm2354_vm8, %vm2355_vm7 }
0x111d   : > { %v2351_v55 = vsub.f32 1.0, %v2350_v54  ;;  %v3511_v54 = vld [vmem:[%s4207_s8 + $0x20] sm:$0xff] }
0x111f   : > { %v2352_v50 = vmul.f32 %v3821_v53, %v2351_v55 }
0x1121   : > { %v2353_v58 = vadd.f32 %v3821_v53, %v2352_v50 }
0x1123   : > { %v2357_v59 = vsel %vm2356_vm9, %v3821_v53, %v2353_v58  ;;  %v3512_v53 = vld [vmem:[%s4207_s8 + $0x28] sm:$0xff] }
0x1124   : > { %v2362_v60 = vsel %vm2359_vm10, %v2361_v21, %v2357_v59  ;;  %v3760_v59 = vld [vmem:[%s4212_s14 + $0x1] ss:$0 sm:$0xff] }
0x1125   : > { %v2363_v61 = vmul.f32 %v3817_v35, %v2362_v60 }
0x1127   : > { %3524 = vmatmul.msk.f32.vlgmr.msra.gmra.mxu1 %vm1142_vm1, %v2363_v61 }
0x112f   : > { %3529 = vmatmul.msk.f32.vlgmr.msrb.gmra.mxu1 %vm1142_vm1, %v2472_v62 }
0x1132   : > { %v4745_v63 = vpop.f32.mrf.mxu2 }
0x113a   : > { %v2416_v0 = vpop.f32.mrf.mxu2 }
0x113b   : > { %v2419_v1 = vmul.f32 0.35355338, %v2416_v0 }
0x113d   : > { %v2420_v3 = vadd.f32 %v2419_v1, %v4531_v31  ;;  %v3542_v1 = vld [vmem:[%s4237_s12 + $0x38] sm:$0xff] }
0x113e   : > { %2696 = vmatpush.msra.mxu1 %v3542_v1 }
0x113f   : > { %v2421_v4 = vsel %vm1142_vm1, %v2420_v3, -inf }
0x1140   : > { %2422 = vmax.xlane.f32.xlu2 %v2421_v4  ;;  %v3539_v4 = vld [vmem:[%s4237_s12 + $0x20] sm:$0xff] }
0x1158   : > { %2525 = vrot.lane.b32.xlu2 %v4719_v12, %s5030_s13 }
0x11a4   : > { %v2388_v5 = vpop.f32.mrf.mxu1 }
0x11ac   : > { %v2496_v7 = vpop.f32.mrf.mxu1 }
0x11ad   : > { %v2499_v8 = vmul.f32 0.35355338, %v2496_v7 }
0x11af   : > { %v2500_v9 = vadd.f32 %v2499_v8, %v4531_v31 }
0x11b1   : > { %v2501_v10 = vsel %vm1142_vm1, %v2500_v9, -inf }
0x11b2   : > { %2502 = vmax.xlane.f32.xlu0 %v2501_v10 }
0x11b3   : > { %v2423_v11 = vpop.xlane.xlu2 %2422 }
0x11b4   : > { %v2424_v13 = vsub.f32 %v2420_v3, %v2423_v11  ;;  %v3540_v3 = vld [vmem:[%s4237_s12 + $0x28] sm:$0xff]  ;;  %v3537_v11 = vld [vmem:[%s5006_s23 + $0x38] sm:$0xff] }
0x11b5   : > { %2673 = vmatpush.msra.mxu0 %v3537_v11 }
0x11b6   : > { %v2425_v14 = vmul.f32 1.442695, %v2424_v13  ;;  %v3536_v13 = vld [vmem:[%s5006_s23 + $0x30] sm:$0xff] }
0x11b7   : > { %2674 = vmatpush.msra.mxu0 %v3536_v13 }
0x11b8   : > { %3822 = vpow2.f32 %v2425_v14  ;;  %v3535_v14 = vld [vmem:[%s5006_s23 + $0x28] sm:$0xff] }
0x11b9   : > { %2675 = vmatpush.msra.mxu0 %v3535_v14 }
0x11bb   : > { %v2526_v15 = vpop.permute.xlu2 %2525 }
0x11bc   : > { %2546 = vmatpush.msrb.mxu2 %v2526_v15  ;;  %v3534_v15 = vld [vmem:[%s5006_s23 + $0x20] sm:$0xff] }
0x11bd   : > { %2676 = vmatpush.msra.mxu0 %v3534_v15 }
0x11be   : > { %v3823_v16 = vpop.eup %3822 }
0x11bf   : > { %v2427_v18 = vsel %vm1142_vm1, %v3823_v16, 0.0 }
0x11c0   : > { %2428 = vadd.xlane.f32.xlu1 %v2427_v18 }
0x11c6   : > { %2552 = vrot.lane.b32.xlu0 %v2388_v5, %s5031_s3  ;;  %v4779_v5 = vld [vmem:[%s4583_s20] sm:$0xf] }
0x1225   : > { %v2503_v19 = vpop.xlane.xlu0 %2502 }
0x1226   : > { %v2504_v20 = vsub.f32 %v2500_v9, %v2503_v19 }
0x1228   : > { %v2505_v6 = vmul.f32 1.442695, %v2504_v20 }
0x122a   : > { %3824 = vpow2.f32 %v2505_v6 }
0x1230   : > { %v3825_v31 = vpop.eup %3824 }
0x1231   : > { %v2507_v23 = vsel %vm1142_vm1, %v3825_v31, 0.0 }
0x1232   : > { %2508 = vadd.xlane.f32.xlu1 %v2507_v23 }
0x1233   : > { %v2429_v17 = vpop.xlane.xlu1 %2428 }
0x1234   : > { %3826 = vrcp.f32 %v2429_v17  ;;  %vm2435_vm3 = vweird.f32 %v2429_v17  ;;  %v2439_v39 = vand.u32 2147483647, %v2429_v17 }
0x1236   : > { %vm2440_vm8 = vcmp.eq.f32.partialorder %v2439_v39, 8.507059e+37 }
0x1238   : > { %v2553_v56 = vpop.permute.xlu0 %2552 }
0x1239   : > { %v2563_v50 = vsel %vm1142_vm1, %v4745_v63, %v2553_v56  ;;  %v3541_v63 = vld [vmem:[%s4237_s12 + $0x30] sm:$0xff] }
0x123a   : > { %v3827_v24 = vpop.eup %3826  ;;  %2697 = vmatpush.msra.mxu1 %v3541_v63 }
0x123b   : > { %v2431_v26 = vmul.f32 %v3827_v24, %v2429_v17  ;;  %vm2436_vm14 = vweird.f32 %v3827_v24 }
0x123c   : > { %vm2437_vm7 = vmor %vm2435_vm3, %vm2436_vm14  ;;  %2698 = vmatpush.msra.mxu1 %v3540_v3 }
0x123d   : > { %v2432_v27 = vsub.f32 1.0, %v2431_v26 }
0x123e   : > { %2699 = vmatpush.msra.mxu1 %v3539_v4 }
0x123f   : > { %v2433_v30 = vmul.f32 %v3827_v24, %v2432_v27  ;;  %3555 = vmatmul.msk.f32.vlgmr.msra.gmra.mxu1 %vm1066_vm0, %v4779_v5 }
0x1241   : > { %v2434_v36 = vadd.f32 %v3827_v24, %v2433_v30 }
0x1243   : > { %v2438_v42 = vsel %vm2437_vm7, %v3827_v24, %v2434_v36 }
0x124b   : > { %2445 = vrot.lane.b32.xlu1 %v4719_v12, %s5029_s16  ;;  %v2441_v12 = vand.u32 2147483648, %v2429_v17 }
0x124d   : > { %v2442_v44 = vor.u32 1.1754944e-38, %v2441_v12  ;;  %v3764_v12 = vld [vmem:[%s5012_s1 + $0x1] ss:$0 sm:$0xff] }
0x124f   : > { %v2443_v45 = vsel %vm2440_vm8, %v2442_v44, %v2438_v42 }
0x1250   : > { %v2444_v47 = vmul.f32 %v3823_v16, %v2443_v45  ;;  %v3763_v16 = vld [vmem:[%s5011_s9 + $0x1] ss:$0 sm:$0xff] }
0x12a5   : > { %v2509_v25 = vpop.xlane.xlu1 %2508 }
0x12a6   : > { %3828 = vrcp.f32 %v2509_v25  ;;  %v2521_v33 = vand.u32 2147483648, %v2509_v25  ;;  %v2519_v35 = vand.u32 2147483647, %v2509_v25  ;;  %vm2515_vm15 = vweird.f32 %v2509_v25 }
0x12a8   : > { %v2522_v38 = vor.u32 1.1754944e-38, %v2521_v33  ;;  %vm2520_vm4 = vcmp.eq.f32.partialorder %v2519_v35, 8.507059e+37 }
0x12ac   : > { %v3829_v28 = vpop.eup %3828 }
0x12ad   : > { %v2511_v29 = vmul.f32 %v3829_v28, %v2509_v25  ;;  %vm2516_vm13 = vweird.f32 %v3829_v28 }
0x12ae   : > { %vm2517_vm2 = vmor %vm2515_vm15, %vm2516_vm13 }
0x12af   : > { %v2512_v32 = vsub.f32 1.0, %v2511_v29 }
0x12b1   : > { %v2513_v34 = vmul.f32 %v3829_v28, %v2512_v32  ;;  %v3762_v32 = vld [vmem:[%s5010_s11 + $0x1] ss:$0 sm:$0xff] }
0x12b3   : > { %v2514_v37 = vadd.f32 %v3829_v28, %v2513_v34 }
0x12b5   : > { %v2518_v40 = vsel %vm2517_vm2, %v3829_v28, %v2514_v37  ;;  %v3761_v28 = vld [vmem:[%s5008_s7 + $0x1] ss:$0 sm:$0xff] }
0x12b6   : > { %v2523_v41 = vsel %vm2520_vm4, %v2522_v38, %v2518_v40 }
0x12b7   : > { %v2524_v43 = vmul.f32 %v3825_v31, %v2523_v41 }
0x12b9   : > { %3530 = vmatmul.msk.f32.vlgmr.msrb.gmra.mxu2 %vm1142_vm1, %v2524_v43 }
0x12bc   : > { %v2701_v18 = vpop.f32.mrf.mxu1 }
0x12bd   : > { %v2446_v46 = vpop.permute.xlu1 %2445  ;;  %v2702_v19 = vadd.f32 %v3763_v16, %v2701_v18 }
0x12be   : > { %2466 = vmatpush.msra.mxu3 %v2446_v46  ;;  %v3547_v46 = vld [vmem:[%s5014_s26 + $0x38] sm:$0xff] }
0x12bf   : > { %3527 = vmatmul.msk.f32.vlgmr.msra.gmra.mxu3 %vm1142_vm1, %v2444_v47  ;;  %2719 = vmatpush.msra.mxu2 %v3547_v46  ;;  %v3546_v47 = vld [vmem:[%s5014_s26 + $0x30] sm:$0xff] }
0x12c0   : > { %2584 = vmatpush.msrb.mxu3 %v3514_v51 }
0x12c1   : > { %2720 = vmatpush.msra.mxu2 %v3546_v47 }
0x12c2   : > { %2585 = vmatpush.msrb.mxu3 %v3513_v52 }
0x12c4   : > { %2586 = vmatpush.msrb.mxu3 %v3512_v53 }
0x12c6   : > { %2587 = vmatpush.msrb.mxu3 %v3511_v54 }
0x12c8   : > { %3557 = vmatpush.xpose.msk.msra.mxu3 %vm1142_vm1, %v2702_v19 }
0x133c   : > { %v2548_v49 = vpop.f32.mrf.mxu2 }
0x1342   : > { %v2468_v48 = vpop.f32.mrf.mxu3 }
0x1343   : > { %2556 = vrot.lane.b32.xlu1 %v2468_v48, %s5020_s18  ;;  %v3545_v48 = vld [vmem:[%s5014_s26 + $0x28] sm:$0xff] }
0x1344   : > { %2721 = vmatpush.msra.mxu2 %v3545_v48 }
0x134b   : > { %2560 = vrot.lane.b32.xlu1 %v2548_v49, %s5019_s15  ;;  %v3544_v49 = vld [vmem:[%s5014_s26 + $0x20] sm:$0xff] }
0x134c   : > { %2722 = vmatpush.msra.mxu2 %v3544_v49 }
0x134d   : > { %3556 = vmatmul.msk.f32.vlgmr.msra.gmra.mxu2 %vm1066_vm0, %v4779_v5 }
0x1353   : > { %2806 = vrot.lane.b32.xlu1 %v2702_v19, %s5028_s22 }
0x135b   : > { %2886 = vrot.lane.b32.xlu1 %v2702_v19, %s5029_s16 }
0x1363   : > { %2966 = vrot.lane.b32.xlu1 %v2702_v19, %s5030_s13 }
0x13b5   : > { %v2557_v55 = vpop.permute.xlu1 %2556 }
0x13b6   : > { %v2564_v57 = vsel %vm1472_vm5, %v2563_v50, %v2557_v55 }
0x13bd   : > { %v2561_v58 = vpop.permute.xlu1 %2560 }
0x13be   : > { %v2565_v21 = vsel %vm1474_vm6, %v2564_v57, %v2561_v58 }
0x13bf   : > { %3531 = vmatmul.msk.f32.vlgmr.msrb.gmra.mxu3 %vm1066_vm0, %v2565_v21 }
0x13c5   : > { %v2807_v35 = vpop.permute.xlu1 %2806 }
0x13c6   : > { %3561 = vmatpush.xpose.msk.msrb.mxu1 %vm1142_vm1, %v2807_v35 }
0x13cd   : > { %v2887_v36 = vpop.permute.xlu1 %2886 }
0x13ce   : > { %3565 = vmatpush.xpose.msk.msrb.mxu3 %vm1142_vm1, %v2887_v36 }
0x13d0   : > { %v2724_v1 = vpop.f32.mrf.mxu2 }
0x13d5   : > { %v2967_v37 = vpop.permute.xlu1 %2966 }
0x13d6   : > { %3569 = vmatpush.xpose.msk.msra.mxu1 %vm1142_vm1, %v2967_v37 }
0x1442   : > { %v2589_v60 = vpop.f32.mrf.mxu3 }
0x1443   : > { %v2590_v61 = vadd.f32 %v3760_v59, %v2589_v60 }
0x1445   : > { %v2592_v62 = vadd.f32 %v2590_v61, %v4707_v2 }
0x1447   : > { %v2597_v0 = vsel %vm1066_vm0, %v2592_v62, 0.0 }
0x1448   : > { %2598 = vadd.xlane.f32.xlu2 %v2597_v0  ;;  %v3765_v0 = vld [vmem:[%s5016_s10 + $0x1] ss:$0 sm:$0xff] }
0x1449   : > { %v2725_v3 = vadd.f32 %v3765_v0, %v2724_v1 }
0x144b   : > { %3559 = vmatpush.msk.msrb.mxu0 %vm1692_vm12, %v2725_v3 }
0x14bb   : > { %v2599_v2 = vpop.xlane.xlu2 %2598 }
0x14bc   : > { %v2600_v7 = vmul.f32 %v2599_v2, %v4574_v22 }
0x14be   : > { %v2601_v8 = vsub.f32 %v2592_v62, %v2600_v7 }
0x14c0   : > { %v2602_v9 = vmul.f32 %v2601_v8, %v2601_v8 }
0x14c2   : > { %v2603_v10 = vsel %vm1066_vm0, %v2602_v9, 0.0 }
0x14c3   : > { %2604 = vadd.xlane.f32.xlu0 %v2603_v10 }
0x1536   : > { %v2605_v20 = vpop.xlane.xlu0 %2604 }
0x1537   : > { %v2606_v6 = vmul.f32 %v2605_v20, %v4574_v22 }
0x1539   : > { %v2607_v31 = vadd.f32 1e-05, %v2606_v6 }
0x153b   : > { %3830 = vrsqrt.f32 %v2607_v31  ;;  %vm2614_vm10 = vweird.f32 %v2607_v31 }
0x1541   : > { %v3831_v23 = vpop.eup %3830 }
0x1542   : > { %v2609_v17 = vmul.f32 %v3831_v23, %v2607_v31  ;;  %vm2615_vm9 = vweird.f32 %v3831_v23 }
0x1543   : > { %vm2616_vm13 = vmor %vm2614_vm10, %vm2615_vm9 }
0x1544   : > { %v2610_v24 = vmul.f32 %v3831_v23, %v2609_v17 }
0x1546   : > { %v2611_v25 = vmul.f32 0.5, %v2610_v24 }
0x1548   : > { %v2612_v26 = vsub.f32 1.5, %v2611_v25 }
0x154a   : > { %v2613_v27 = vmul.f32 %v3831_v23, %v2612_v26 }
0x154c   : > { %v2617_v29 = vsel %vm2616_vm13, %v3831_v23, %v2613_v27 }
0x154d   : > { %v2618_v30 = vmul.f32 %v2617_v29, %v2601_v8 }
0x154f   : > { %v2622_v33 = vmul.f32 %v3761_v28, %v2618_v30 }
0x1551   : > { %v4797_v34 = vadd.f32 %v3762_v32, %v2622_v33 }
0x1553   : > { %3554 = vmatmul.msk.f32.vlgmr.msra.gmra.mxu0 %vm1066_vm0, %v4797_v34 }
0x15d0   : > { %v2678_v38 = vpop.f32.mrf.mxu0 }
0x15d1   : > { %v2679_v39 = vadd.f32 %v3764_v12, %v2678_v38 }
0x15d3   : > { %2964 = vrot.lane.b32.xlu2 %v2679_v39, %s5030_s13  ;;  %2804 = vrot.lane.b32.xlu1 %v2679_v39, %s5028_s22 }
0x15d4   : > { %3558 = vmatmul.msk.f32.vlgmr.msra.gmra.mxu3 %vm1142_vm1, %v2679_v39 }
0x15db   : > { %2884 = vrot.lane.b32.xlu1 %v2679_v39, %s5029_s16 }
0x162d   : > { %v2965_v41 = vpop.permute.xlu2 %2964 }
0x1645   : > { %v2805_v40 = vpop.permute.xlu1 %2804 }
0x1646   : > { %3562 = vmatmul.msk.f32.vlgmr.msrb.gmra.mxu1 %vm1142_vm1, %v2805_v40 }
0x164d   : > { %v2885_v42 = vpop.permute.xlu1 %2884 }
0x164e   : > { %3566 = vmatmul.msk.f32.vlgmr.msrb.gmra.mxu3 %vm1142_vm1, %v2885_v42  ;;  %3570 = vmatmul.msk.f32.vlgmr.msra.gmra.mxu1 %vm1142_vm1, %v2965_v41 }
0x1657   : > { %v2750_v43 = vpop.f32.mrf.mxu3 }
0x1658   : > { %v2753_v44 = vmul.f32 0.35355338, %v2750_v43 }
0x165a   : > { %v2754_v45 = vsel %vm1664_vm11, %v2753_v44, -inf }
0x165b   : > { %2755 = vmax.xlane.f32.xlu1 %v2754_v45 }
0x1674   : > { %2857 = vrot.lane.b32.xlu1 %v2725_v3, %s5028_s22 }
0x16c3   : > { %v2829_v51 = vpop.f32.mrf.mxu1 }
0x16c4   : > { %v2832_v52 = vmul.f32 0.35355338, %v2829_v51 }
0x16c6   : > { %v2833_v53 = vsel %vm1664_vm11, %v2832_v52, -inf }
0x16c7   : > { %2834 = vmax.xlane.f32.xlu0 %v2833_v53 }
0x16cb   : > { %v2989_v54 = vpop.f32.mrf.mxu1 }
0x16cc   : > { %v2992_v55 = vmul.f32 0.35355338, %v2989_v54 }
0x16ce   : > { %v2756_v56 = vpop.xlane.xlu1 %2755  ;;  %v2993_v50 = vsel %vm1664_vm11, %v2992_v55, -inf }
0x16cf   : > { %v2757_v57 = vsub.f32 %v2753_v44, %v2756_v56  ;;  %2994 = vmax.xlane.f32.xlu0 %v2993_v50 }
0x16d1   : > { %v2758_v58 = vmul.f32 1.442695, %v2757_v57  ;;  %v2909_v21 = vpop.f32.mrf.mxu3 }
0x16d2   : > { %v2912_v59 = vmul.f32 0.35355338, %v2909_v21 }
0x16d3   : > { %3832 = vpow2.f32 %v2758_v58 }
0x16d4   : > { %v2913_v60 = vsel %vm1664_vm11, %v2912_v59, -inf }
0x16d7   : > { %2914 = vmax.xlane.f32.xlu0 %v2913_v60 }
0x16d9   : > { %v3833_v61 = vpop.eup %3832 }
0x16da   : > { %v2760_v62 = vsel %vm1664_vm11, %v3833_v61, 0.0 }
0x16df   : > { %2761 = vadd.xlane.f32.xlu0 %v2760_v62 }
0x16e6   : > { %v2858_v32 = vpop.permute.xlu1 %2857 }
0x16e7   : > { %3563 = vmatpush.msk.msrb.mxu2 %vm1692_vm12, %v2858_v32 }
0x173a   : > { %v2835_v63 = vpop.xlane.xlu0 %2834 }
0x173b   : > { %v2836_v4 = vsub.f32 %v2832_v52, %v2835_v63 }
0x173d   : > { %v2837_v5 = vmul.f32 1.442695, %v2836_v4 }
0x173f   : > { %3834 = vpow2.f32 %v2837_v5 }
0x1742   : > { %v2995_v2 = vpop.xlane.xlu0 %2994 }
0x1743   : > { %v2996_v11 = vsub.f32 %v2992_v55, %v2995_v2 }
0x1745   : > { %v3835_v7 = vpop.eup %3834  ;;  %v2997_v14 = vmul.f32 1.442695, %v2996_v11  ;;  %v3552_v11 = vld [vmem:[%s5018_s28 + $0x38] sm:$0xff] }
0x1746   : > { %v2839_v8 = vsel %vm1664_vm11, %v3835_v7, 0.0  ;;  %3077 = vmatpush.msra.mxu3 %v3552_v11 }
0x1747   : > { %2840 = vadd.xlane.f32.xlu2 %v2839_v8 }
0x174a   : > { %v2915_v9 = vpop.xlane.xlu0 %2914 }
0x174b   : > { %v2916_v10 = vsub.f32 %v2912_v59, %v2915_v9 }
0x174d   : > { %v2917_v13 = vmul.f32 1.442695, %v2916_v10 }
0x174f   : > { %3836 = vpow2.f32 %v2917_v13  ;;  %v3551_v13 = vld [vmem:[%s5018_s28 + $0x30] sm:$0xff] }
0x1750   : > { %3078 = vmatpush.msra.mxu3 %v3551_v13 }
0x1752   : > { %v2762_v15 = vpop.xlane.xlu0 %2761 }
0x1753   : > { %3838 = vrcp.f32 %v2762_v15  ;;  %v2774_v23 = vand.u32 2147483648, %v2762_v15  ;;  %v2772_v24 = vand.u32 2147483647, %v2762_v15  ;;  %vm2768_vm15 = vweird.f32 %v2762_v15 }
0x1754   : > { %3840 = vpow2.f32 %v2997_v14  ;;  %v3550_v14 = vld [vmem:[%s5018_s28 + $0x28] sm:$0xff] }
0x1755   : > { %v4827_v16 = vpop.eup %3836  ;;  %v2775_v27 = vor.u32 1.1754944e-38, %v2774_v23  ;;  %vm2773_vm3 = vcmp.eq.f32.partialorder %v2772_v24, 8.507059e+37  ;;  %3079 = vmatpush.msra.mxu3 %v3550_v14  ;;  %v3766_v23 = vld [vmem:[%s5021_s2 + $0x1] ss:$0 sm:$0xff] }
0x1756   : > { %v2919_v18 = vsel %vm1664_vm11, %v4827_v16, 0.0 }
0x1757   : > { %2920 = vadd.xlane.f32.xlu0 %v2919_v18 }
0x1759   : > { %v3839_v19 = vpop.eup %3838 }
0x175a   : > { %v2764_v20 = vmul.f32 %v3839_v19, %v2762_v15  ;;  %v4831_v6 = vpop.eup %3840  ;;  %vm2769_vm14 = vweird.f32 %v3839_v19  ;;  %v3549_v15 = vld [vmem:[%s5018_s28 + $0x20] sm:$0xff] }
0x175b   : > { %v2999_v25 = vsel %vm1664_vm11, %v4831_v6, 0.0  ;;  %vm2770_vm2 = vmor %vm2768_vm15, %vm2769_vm14  ;;  %3080 = vmatpush.msra.mxu3 %v3549_v15 }
0x175c   : > { %v2765_v31 = vsub.f32 1.0, %v2764_v20 }
0x175e   : > { %v2766_v17 = vmul.f32 %v3839_v19, %v2765_v31 }
0x175f   : > { %3000 = vadd.xlane.f32.xlu0 %v2999_v25  ;;  %2937 = vrot.lane.b32.xlu2 %v2725_v3, %s5029_s16 }
0x1760   : > { %v2767_v26 = vadd.f32 %v3839_v19, %v2766_v17 }
0x1762   : > { %v2771_v28 = vsel %vm2770_vm2, %v3839_v19, %v2767_v26 }
0x1763   : > { %v2776_v29 = vsel %vm2773_vm3, %v2775_v27, %v2771_v28 }
0x1764   : > { %v2777_v30 = vmul.f32 %v3833_v61, %v2776_v29 }
0x1766   : > { %3560 = vmatmul.msk.f32.vlgmr.msrb.gmra.mxu0 %vm1664_vm11, %v2777_v30 }
0x1773   : > { %3017 = vrot.lane.b32.xlu0 %v2725_v3, %s5030_s13  ;;  %s5032_s13 = sld [smem:[#allocation40_spill]] }
0x17ba   : > { %v2841_v33 = vpop.xlane.xlu2 %2840 }
0x17bb   : > { %3842 = vrcp.f32 %v2841_v33  ;;  %v2853_v38 = vand.u32 2147483648, %v2841_v33  ;;  %v2851_v40 = vand.u32 2147483647, %v2841_v33  ;;  %vm2847_vm7 = vweird.f32 %v2841_v33 }
0x17bd   : > { %v2854_v42 = vor.u32 1.1754944e-38, %v2853_v38  ;;  %vm2852_vm9 = vcmp.eq.f32.partialorder %v2851_v40, 8.507059e+37  ;;  %v3592_v38 = vld [vmem:[%s5025_s5 + $0xe8] sm:$0xff] }
0x17c1   : > { %v3843_v35 = vpop.eup %3842 }
0x17c2   : > { %v2843_v36 = vmul.f32 %v3843_v35, %v2841_v33  ;;  %v2938_v37 = vpop.permute.xlu2 %2937  ;;  %vm2848_vm4 = vweird.f32 %v3843_v35  ;;  %v3578_v33 = vld [vmem:[%s5023_s4 + $0x38] sm:$0xff] }
0x17c3   : > { %3567 = vmatpush.msk.msra.mxu0 %vm1692_vm12, %v2938_v37  ;;  %vm2849_vm8 = vmor %vm2847_vm7, %vm2848_vm4  ;;  %v3594_v37 = vld [vmem:[%s5025_s5 + $0xf8] sm:$0xff] }
0x17c4   : > { %v2844_v12 = vsub.f32 1.0, %v2843_v36  ;;  %v3575_v36 = vld [vmem:[%s5023_s4 + $0x20] sm:$0xff]  ;;  %3176 = vmatpush.msrb.mxu1 %v3594_v37  ;;  %v3773_v37 = vld [vmem:[#allocation11] ss:$0 sm:$0xff] }
0x17c5   : > { %3164 = vmatpush.msrb.mxu0 %v3578_v33 }
0x17c6   : > { %v2845_v39 = vmul.f32 %v3843_v35, %v2844_v12  ;;  %v3593_v12 = vld [vmem:[%s5025_s5 + $0xf0] sm:$0xff] }
0x17c7   : > { %3177 = vmatpush.msrb.mxu1 %v3593_v12 }
0x17c8   : > { %v2846_v41 = vadd.f32 %v3843_v35, %v2845_v39 }
0x17c9   : > { %3178 = vmatpush.msrb.mxu1 %v3592_v38 }
0x17ca   : > { %v2850_v43 = vsel %vm2849_vm8, %v3843_v35, %v2846_v41  ;;  %v2921_v44 = vpop.xlane.xlu0 %2920  ;;  %v3577_v35 = vld [vmem:[%s5023_s4 + $0x30] sm:$0xff]  ;;  %v3591_v41 = vld [vmem:[%s5025_s5 + $0xe0] sm:$0xff] }
0x17cb   : > { %v2855_v45 = vsel %vm2852_vm9, %v2854_v42, %v2850_v43  ;;  %3844 = vrcp.f32 %v2921_v44  ;;  %v2933_v52 = vand.u32 2147483648, %v2921_v44  ;;  %v2931_v54 = vand.u32 2147483647, %v2921_v44  ;;  %3165 = vmatpush.msrb.mxu0 %v3577_v35  ;;  %v3590_v43 = vld [vmem:[%s5025_s5 + $0xd8] sm:$0xff]  ;;  %3179 = vmatpush.msrb.mxu1 %v3591_v41 }
0x17cc   : > { %v2856_v46 = vmul.f32 %v3835_v7, %v2855_v45  ;;  %vm2927_vm13 = vweird.f32 %v2921_v44  ;;  %v3588_v45 = vld [vmem:[%s5025_s5 + $0xc8] sm:$0xff] }
0x17cd   : > { %v2934_v50 = vor.u32 1.1754944e-38, %v2933_v52  ;;  %vm2932_vm15 = vcmp.eq.f32.partialorder %v2931_v54, 8.507059e+37  ;;  %3180 = vmatpush.msrb.mxu1 %v3590_v43 }
0x17ce   : > { %3564 = vmatmul.msk.f32.vlgmr.msrb.gmra.mxu2 %vm1664_vm11, %v2856_v46  ;;  %v3587_v46 = vld [vmem:[%s5025_s5 + $0xc0] sm:$0xff] }
0x17d1   : > { %v3845_v47 = vpop.eup %3844 }
0x17d2   : > { %v2923_v48 = vmul.f32 %v3845_v47, %v2921_v44  ;;  %v3001_v49 = vpop.xlane.xlu0 %3000  ;;  %vm2928_vm10 = vweird.f32 %v3845_v47  ;;  %v3589_v44 = vld [vmem:[%s5025_s5 + $0xd0] sm:$0xff] }
0x17d3   : > { %3846 = vrcp.f32 %v3001_v49  ;;  %vm2929_vm14 = vmor %vm2927_vm13, %vm2928_vm10  ;;  %v3013_v61 = vand.u32 2147483648, %v3001_v49  ;;  %v3011_v0 = vand.u32 2147483647, %v3001_v49  ;;  %vm3007_vm3 = vweird.f32 %v3001_v49  ;;  %3181 = vmatpush.msrb.mxu1 %v3589_v44 }
0x17d4   : > { %v2924_v51 = vsub.f32 1.0, %v2923_v48  ;;  %v3586_v48 = vld [vmem:[%s5025_s5 + $0xb8] sm:$0xff] }
0x17d5   : > { %v3014_v63 = vor.u32 1.1754944e-38, %v3013_v61  ;;  %vm3012_vm7 = vcmp.eq.f32.partialorder %v3011_v0, 8.507059e+37  ;;  %3182 = vmatpush.msrb.mxu1 %v3588_v45  ;;  %v3581_v0 = vld [vmem:[%s5025_s5 + $0x90] sm:$0xff] }
0x17d6   : > { %v2925_v53 = vmul.f32 %v3845_v47, %v2924_v51  ;;  %v3585_v51 = vld [vmem:[%s5025_s5 + $0xb0] sm:$0xff] }
0x17d7   : > { %3183 = vmatpush.msrb.mxu1 %v3587_v46 }
0x17d8   : > { %v2926_v55 = vadd.f32 %v3845_v47, %v2925_v53  ;;  %v3584_v53 = vld [vmem:[%s5025_s5 + $0xa8] sm:$0xff] }
0x17d9   : > { %v3847_v56 = vpop.eup %3846  ;;  %3184 = vmatpush.msrb.mxu1 %v3586_v48 }
0x17da   : > { %v2930_v57 = vsel %vm2929_vm14, %v3845_v47, %v2926_v55  ;;  %v3003_v58 = vmul.f32 %v3847_v56, %v3001_v49  ;;  %vm3008_vm2 = vweird.f32 %v3847_v56  ;;  %v3583_v55 = vld [vmem:[%s5025_s5 + $0xa0] sm:$0xff] }
0x17db   : > { %v2935_v21 = vsel %vm2932_vm15, %v2934_v50, %v2930_v57  ;;  %vm3009_vm4 = vmor %vm3007_vm3, %vm3008_vm2  ;;  %3185 = vmatpush.msrb.mxu1 %v3585_v51  ;;  %v3582_v50 = vld [vmem:[%s5025_s5 + $0x98] sm:$0xff] }
0x17dc   : > { %v3004_v59 = vsub.f32 1.0, %v3003_v58  ;;  %v2936_v60 = vmul.f32 %v4827_v16, %v2935_v21  ;;  %v3767_v58 = vld [vmem:[%s5027_s6 + $0x1] ss:$0 sm:$0xff] }
0x17dd   : > { %3186 = vmatpush.msrb.mxu1 %v3584_v53 }
0x17de   : > { %v3005_v62 = vmul.f32 %v3847_v56, %v3004_v59  ;;  %3568 = vmatmul.msk.f32.vlgmr.msra.gmra.mxu0 %vm1664_vm11, %v2936_v60  ;;  %v3768_v60 = vld [vmem:[#allocation2 + $0x1] ss:$0 sm:$0xff] }
0x17df   : > { %3187 = vmatpush.msrb.mxu1 %v3583_v55 }
0x17e0   : > { %v3006_v1 = vadd.f32 %v3847_v56, %v3005_v62 }
0x17e1   : > { %3188 = vmatpush.msrb.mxu1 %v3582_v50 }
0x17e2   : > { %v3010_v3 = vsel %vm3009_vm4, %v3847_v56, %v3006_v1  ;;  %v3580_v1 = vld [vmem:[%s5025_s5 + $0x88] sm:$0xff] }
0x17e3   : > { %v3015_v4 = vsel %vm3012_vm7, %v3014_v63, %v3010_v3  ;;  %v2801_v8 = vpop.f32.mrf.mxu0  ;;  %3189 = vmatpush.msrb.mxu1 %v3581_v0  ;;  %v3579_v63 = vld [vmem:[%s5025_s5 + $0x80] sm:$0xff] }
0x17e4   : > { %v3016_v5 = vmul.f32 %v4831_v6, %v3015_v4  ;;  %v3769_v3 = vld [vmem:[#allocation5 + $0x1] ss:$0 sm:$0xff] }
0x17e5   : > { %v3018_v2 = vpop.permute.xlu0 %3017  ;;  %3190 = vmatpush.msrb.mxu1 %v3580_v1 }
0x17e6   : > { %3571 = vmatpush.msk.msra.mxu2 %vm1692_vm12, %v3018_v2 }
0x17e7   : > { %3572 = vmatmul.msk.f32.vlgmr.msra.gmra.mxu2 %vm1664_vm11, %v3016_v5  ;;  %3191 = vmatpush.msrb.mxu1 %v3579_v63 }
0x1851   : > { %v2881_v7 = vpop.f32.mrf.mxu2 }
0x1852   : > { %3045 = vrot.lane.b32.xlu0 %v2881_v7, %s5031_s3  ;;  %v3770_v7 = vld [vmem:[#allocation7 + $0x1] ss:$0 sm:$0xff]  ;;  %s5033_s3 = sld [smem:[#allocation38_spill]] }
0x185b   : > { %v2961_v9 = vpop.f32.mrf.mxu0 }
0x185c   : > { %3049 = vrot.lane.b32.xlu1 %v2961_v9, %s5020_s18  ;;  %s1030_s18 = sand.u32 1, %s5032_s13  }
0x185d   : > { %s3456_s20 = sshll.u32 %s1030_s18, 3  ;;  %s3264_s5 = scalar_lea.sflag [#allocation4], %s1030_s18 }
0x185e   : > { %s1032_s1 = scalar_lea.vmem [#allocation13], %s3456_s20 }
0x185f   : > { %s3276_s2 = sshll.u32 %s1032_s1, 4  ;;  %s3277_s2 = int_to_ptr.vmem [resolvable:$true] %s3276_s2 }
0x186a   : > { %v3041_v10 = vpop.f32.mrf.mxu2 }
0x186b   : > { %3053 = vrot.lane.b32.xlu0 %v3041_v10, %s5019_s15  ;;  %s3598_s15 = sshll.u32 %s4340_s0, 3  ;;  %s4053_s0 = scalar_lea.hbm %s5033_s3, 16 }
0x186c   : > { %s3274_s16 = scalar_lea.hbm %s5033_s3, %s3598_s15 }
0x18c4   : > { %v3046_v16 = vpop.permute.xlu0 %3045 }
0x18c5   : > { %v3056_v19 = vsel %vm1142_vm1, %v2801_v8, %v3046_v16 }
0x18ce   : > { %v3050_v18 = vpop.permute.xlu1 %3049 }
0x18cf   : > { %v3057_v20 = vsel %vm1472_vm5, %v3056_v19, %v3050_v18  ;;  %v3234_v19 = vld [vmem:[%s4307_s27 + $0x18] sm:$0xff] }
0x18d0   : > { %3254 = vmatpush.msrb.mxu2 %v3234_v19 }
0x18dd   : > { %v3054_v6 = vpop.permute.xlu0 %3053 }
0x18de   : > { %v3058_v31 = vsel %vm1474_vm6, %v3057_v20, %v3054_v6  ;;  %v3233_v20 = vld [vmem:[%s4307_s27 + $0x10] sm:$0xff]  ;;  %v3232_v6 = vld [vmem:[%s4307_s27 + $0x8] sm:$0xff] }
0x18df   : > { %3573 = vmatmul.msk.f32.vlgmr.msra.gmra.mxu3 %vm1066_vm0, %v3058_v31  ;;  %3255 = vmatpush.msrb.mxu2 %v3233_v20  ;;  %v3231_v31 = vld [vmem:[%s4307_s27] sm:$0xff] }
0x18e1   : > { %3256 = vmatpush.msrb.mxu2 %v3232_v6 }
0x18e3   : > { %3257 = vmatpush.msrb.mxu2 %v3231_v31 }
0x1962   : > { %v3082_v17 = vpop.f32.mrf.mxu3 }
0x1963   : > { %v3083_v24 = vadd.f32 %v3766_v23, %v3082_v17 }
0x1965   : > { %v3085_v25 = vadd.f32 %v3083_v24, %v4797_v34  ;;  %v3576_v34 = vld [vmem:[%s5023_s4 + $0x28] sm:$0xff]  ;;  %s3278_s4 = sshll.u32 %s3274_s16, 4  ;;  %s3279_s4 = int_to_ptr.hbm [resolvable:$true] %s3278_s4 }
0x1966   : > { %3166 = vmatpush.msrb.mxu0 %v3576_v34  ;;  %v3772_v34 = vld [vmem:[#allocation10 + $0x1] ss:$0 sm:$0xff]  ;;  %s4047_s6 = sshra.s32 %s3279_s4, 4  ;;  %s4048_s6 = int_to_ptr.hbm [resolvable:$true] %s4047_s6 }
0x1967   : > { %v3090_v26 = vsel %vm1066_vm0, %v3085_v25, 0.0  ;;  %s4049_s7 = scalar_lea.hbm %s4048_s6, 8  ;;  %p4054_p2 = scmp.lt.s32.totalorder %s4048_s6, %s5033_s3 }
0x1968   : > { %3091 = vadd.xlane.f32.xlu1 %v3090_v26  ;;  %3167 = vmatpush.msrb.mxu0 %v3575_v36  ;;  %p4050_p9 = scmp.ne.s32.totalorder %s4048_s6, %s4049_s7  ;;  %p4055_p3 = scmp.lt.s32.totalorder %s4053_s0, %s4049_s7 }
0x196a   : > { %p4051_p12 = pnand %p4050_p9, %p4357_p5  ;;  %p4056_p4 = por %p4055_p3, %p4054_p2 }
0x196c   : > { %p4052_p0 = pneg %p4051_p12 }
0x196e   : > { %p4057_p7 = pnand %p4056_p4, %p4052_p0 }
0x19db   : > { %v3092_v27 = vpop.xlane.xlu1 %3091 }
0x19dc   : > { %v3093_v28 = vmul.f32 %v3092_v27, %v4574_v22 }
0x19de   : > { %v3094_v29 = vsub.f32 %v3085_v25, %v3093_v28 }
0x19e0   : > { %v3095_v30 = vmul.f32 %v3094_v29, %v3094_v29 }
0x19e2   : > { %v3096_v32 = vsel %vm1066_vm0, %v3095_v30, 0.0 }
0x19e3   : > { %3097 = vadd.xlane.f32.xlu0 %v3096_v32  ;;  %v3771_v32 = vld [vmem:[#allocation8 + $0x1] ss:$0 sm:$0xff] }
0x1a56   : > { %v3098_v39 = vpop.xlane.xlu0 %3097 }
0x1a57   : > { %v3099_v40 = vmul.f32 %v3098_v39, %v4574_v22 }
0x1a59   : > { %v3100_v42 = vadd.f32 1e-05, %v3099_v40 }
0x1a5b   : > { %3848 = vrsqrt.f32 %v3100_v42  ;;  %vm3107_vm5 = vweird.f32 %v3100_v42 }
0x1a61   : > { %v3849_v47 = vpop.eup %3848 }
0x1a62   : > { %v3102_v49 = vmul.f32 %v3849_v47, %v3100_v42  ;;  %vm3108_vm1 = vweird.f32 %v3849_v47 }
0x1a63   : > { %vm3109_vm6 = vmor %vm3107_vm5, %vm3108_vm1 }
0x1a64   : > { %v3103_v52 = vmul.f32 %v3849_v47, %v3102_v49 }
0x1a66   : > { %v3104_v54 = vmul.f32 0.5, %v3103_v52 }
0x1a68   : > { %v3105_v56 = vsub.f32 1.5, %v3104_v54 }
0x1a6a   : > { %v3106_v57 = vmul.f32 %v3849_v47, %v3105_v56 }
0x1a6c   : > { %v3110_v21 = vsel %vm3109_vm6, %v3849_v47, %v3106_v57 }
0x1a6d   : > { %v3111_v59 = vmul.f32 %v3110_v21, %v3094_v29 }
0x1a6f   : > { %v3115_v61 = vmul.f32 %v3767_v58, %v3111_v59 }
0x1a71   : > { %v3119_v62 = vadd.f32 %v3768_v60, %v3115_v61 }
0x1a73   : > { %3595 = vmatmul.msk.f32.vlgmr.msrb.gmra.mxu0 %vm1066_vm0, %v3119_v62 }
0x1af0   : > { %v3169_v4 = vpop.f32.mrf.mxu0 }
0x1af1   : > { %v3170_v5 = vadd.f32 %v3769_v3, %v3169_v4 }
0x1af3   : > { %v3172_v2 = vmax.f32 %v3170_v5, 0.0 }
0x1af5   : > { %3192 = vmatmul.f32.vlgmr.msrb.gmra.mxu1 %v3172_v2 }
0x1b72   : > { %v3193_v8 = vpop.f32.mrf.mxu1 }
0x1b73   : > { %v3194_v9 = vadd.f32 %v3770_v7, %v3193_v8 }
0x1b75   : > { %v3196_v10 = vadd.f32 %v3194_v9, %v3119_v62 }
0x1b77   : > { %v3201_v11 = vsel %vm1066_vm0, %v3196_v10, 0.0 }
0x1b78   : > { %3202 = vadd.xlane.f32.xlu2 %v3201_v11 }
0x1beb   : > { %v3203_v13 = vpop.xlane.xlu2 %3202 }
0x1bec   : > { %v3204_v14 = vmul.f32 %v3203_v13, %v4574_v22 }
0x1bee   : > { %v3205_v15 = vsub.f32 %v3196_v10, %v3204_v14 }
0x1bf0   : > { %v3206_v16 = vmul.f32 %v3205_v15, %v3205_v15 }
0x1bf2   : > { %v3207_v18 = vsel %vm1066_vm0, %v3206_v16, 0.0 }
0x1bf3   : > { %3208 = vadd.xlane.f32.xlu1 %v3207_v18 }
0x1c66   : > { %v3209_v23 = vpop.xlane.xlu1 %3208 }
0x1c67   : > { %v3210_v17 = vmul.f32 %v3209_v23, %v4574_v22 }
0x1c69   : > { %v3211_v24 = vadd.f32 1e-05, %v3210_v17 }
0x1c6b   : > { %3850 = vrsqrt.f32 %v3211_v24  ;;  %vm3218_vm12 = vweird.f32 %v3211_v24 }
0x1c71   : > { %v3851_v25 = vpop.eup %3850 }
0x1c72   : > { %v3213_v26 = vmul.f32 %v3851_v25, %v3211_v24  ;;  %vm3219_vm11 = vweird.f32 %v3851_v25 }
0x1c73   : > { %vm3220_vm8 = vmor %vm3218_vm12, %vm3219_vm11 }
0x1c74   : > { %v3214_v27 = vmul.f32 %v3851_v25, %v3213_v26 }
0x1c76   : > { %v3215_v28 = vmul.f32 0.5, %v3214_v27 }
0x1c78   : > { %v3216_v29 = vsub.f32 1.5, %v3215_v28 }
0x1c7a   : > { %v3217_v30 = vmul.f32 %v3851_v25, %v3216_v29 }
0x1c7c   : > { %v3221_v33 = vsel %vm3220_vm8, %v3851_v25, %v3217_v30 }
0x1c7d   : > { %v3222_v35 = vmul.f32 %v3221_v33, %v3205_v15 }
0x1c7f   : > { %v3226_v36 = vmul.f32 %v3771_v32, %v3222_v35 }
0x1c81   : > { %v3230_v22 = vadd.f32 %v3772_v34, %v3226_v36 }
0x1c83   : > { %3596 = vmatmul.msk.f32.vlgmr.msrb.gmra.mxu2 %vm1066_vm0, %v3230_v22 }
0x1d06   : > { %v3259_v12 = vpop.f32.mrf.mxu2 }
0x1d07   : > { %v3260_v38 = vadd.f32 %v3773_v37, %v3259_v12 }
0x1d09   : > { %3262 = vst [vmem:[%s1032_s1] sm:$0xff] %v3260_v38 }
0x1d0a   : > { %4060 = shalt.err (!%p4057_p7)
}
0x1d0b   : > { %3625 = dma.vmem_to_hbm [thread:$0]  (%p4357_p5), %s3277_s2, 128, %s3279_s4, %s3264_s5  }
0x1d0c PF: > { %s5035_s13 = sld [smem:[#allocation42_spill]] }
0x1d0d   : > { %s5036_s1 = sld [smem:[#allocation39_spill]] }
0x1d12   : > { %p3662_p8 = scmp.ge.s32.totalorder %s5035_s13, 2 }
0x1d13   : > { %s3290_s20 = sand.u32 1, %s5036_s1  }
0x1d14   : > { %p3647_p11 = pnand %p3662_p8, %p4361_p6  ;;  %s3291_s15 = scalar_lea.sflag [#allocation4], %s3290_s20 }
0x1d16   : > { %p3648_p13 = pneg %p3647_p11 }
0x1d18   : > { %4094 = dma.done.wait (%p3648_p13), %s3291_s15, 128  }
0x1d19   : > { %4096 = vsyncadd (%p3648_p13), %s3291_s15, 4294967168  ;;  %s5038_s22 = sld [smem:[#allocation43_spill]] }
0x1d1a   : > { %s5039_s15 = sld [smem:[#allocation40_spill]] }
0x1d1b   : > { %s5040_s16 = sld [smem:[#allocation41_spill]] }
0x1d1c   : > { %s5041_s18 = sld [smem:[#allocation44_spill]] }
0x1d1f   : > { %p75_p1 = scmp.ge.s32.totalorder %s5038_s22, 4  }
0x1d21   :  { %77 = sbr.rel (!%p75_p1) target bundleno = 64 (0x40), region = 259 }
0x1d26   :  { %3297 = vsyncpa [#allocation3], 1 }
0x1d27   :  { %3299 = vsyncpa [#allocation3 + $0x1], 1 }
0x1d28   :  { %3300 = vsyncpa [#allocation6], 1 }
0x1d29   :  { %3301 = vsyncpa [#allocation9], 1 }
0x1d2a   :  { %3302 = vsyncpa [#allocation12], 1 }
0x1d2b   :  { %3303 = vsyncpa [#allocation4], 1 }
0x1d2c   :  { %3305 = vsyncpa [#allocation4 + $0x1], 1 }

</bundles_post_ra>
